<compile_context>
chip_gen: v6e
topology: v6e:2x2x1
jax: 0.10.0
libtpu: 0.0.40
codegen_flags: <defaults>
</compile_context>

<pallas_src>
import functools

import jax
import jax.numpy as jnp
from jax.experimental import pallas as pl
from jax.experimental.pallas import tpu as pltpu


def _patch_expand_kernel(x_ref, w_ref, seg_ref, segt_ref, scat_ref, gb_ref,
                         o_ref, *, eps, n_group):
    x = x_ref[0]                                   # (C, T*W)
    w = w_ref[...]                                 # (2C, C)
    # 1x1 conv == channel matmul over the tile, f32 accumulation (default MXU precision).
    y = jnp.dot(w, x, preferred_element_type=jnp.float32)            # (2C, TW)

    two_c = w.shape[0]
    ch = two_c // 4                                # dim // 2 channels per (p1, p2) group
    hi = jax.lax.Precision.HIGHEST

    seg = seg_ref[...]                             # (TW, T):  lane h*W + w -> row h
    segt = segt_ref[...]                           # (T, TW):  row h -> lanes

    # --- per-(channel, h) sums over w; LayerNorm group = (p2 pair, w), size 2W ----
    sums = jnp.dot(y, seg, preferred_element_type=jnp.float32, precision=hi)   # (2C, T)
    m0 = (sums[0 * ch:1 * ch] + sums[1 * ch:2 * ch]) / n_group       # p1 = 0 pairs
    m1 = (sums[2 * ch:3 * ch] + sums[3 * ch:4 * ch]) / n_group       # p1 = 1 pairs
    mean_all = jnp.concatenate([m0, m0, m1, m1], axis=0)             # (2C, T)
    mean_full = jnp.dot(mean_all, segt,
                        preferred_element_type=jnp.float32, precision=hi)      # (2C, TW)

    # --- two-pass variance (no catastrophic cancellation) -------------------------
    d = y - mean_full
    vs = jnp.dot(d * d, seg, preferred_element_type=jnp.float32, precision=hi)  # (2C, T)
    v0 = (vs[0 * ch:1 * ch] + vs[1 * ch:2 * ch]) / n_group
    v1 = (vs[2 * ch:3 * ch] + vs[3 * ch:4 * ch]) / n_group
    inv0 = jax.lax.rsqrt(v0 + eps)
    inv1 = jax.lax.rsqrt(v1 + eps)
    inv_all = jnp.concatenate([inv0, inv0, inv1, inv1], axis=0)      # (2C, T)
    inv_full = jnp.dot(inv_all, segt,
                       preferred_element_type=jnp.float32, precision=hi)        # (2C, TW)

    nrm = d * inv_full                             # (2C, TW), pre-affine LayerNorm

    # --- in-kernel rearrange: scatter group q = 2*p1 + p2, lane m = h*W + w to the
    #     final lane order l = (2h + p1)*2W + 2w + p2 via resident one-hot matmuls.
    out = jnp.dot(nrm[0 * ch:1 * ch], scat_ref[0], preferred_element_type=jnp.float32)
    out = out + jnp.dot(nrm[1 * ch:2 * ch], scat_ref[1], preferred_element_type=jnp.float32)
    out = out + jnp.dot(nrm[2 * ch:3 * ch], scat_ref[2], preferred_element_type=jnp.float32)
    out = out + jnp.dot(nrm[3 * ch:4 * ch], scat_ref[3], preferred_element_type=jnp.float32)

    # gamma/beta in their natural order: output lane l uses index (l mod 2W) = 2w + p2.
    gam = gb_ref[0:1, :]                           # (1, 4TW)
    bet = gb_ref[1:2, :]
    o_ref[0] = (out * gam + bet).astype(o_ref.dtype)                 # (ch, 4TW), lane-dense


def _pick_rows_per_tile(H, W):
    # Smallest T dividing H with T*W a multiple of 128 (lane-dense x block).
    # Small T keeps the scatter matmul (~T x the conv MACs) and the resident
    # scatter matrices (~T^2 bytes) cheap; the output block is 4*T*W lanes, so
    # it is already >= 512 lanes whenever W >= 32.
    for t in range(1, H + 1):
        if H % t == 0 and (t * W) % 128 == 0:
            return t
    raise ValueError(f"H={H}, W={W}: cannot row-tile H*W into 128-lane multiples")


def patch_expand(x, w, gamma, beta, *, eps=1e-5, rows_per_tile=None):
    """PatchExpand forward.  x: (B, C, H, W) NCHW; w: (2C, C) 1x1-conv weight."""
    B, C, H, W = x.shape
    C2 = 2 * C
    ch = C2 // 4
    HW = H * W
    # nn.LayerNorm(dim // 2) applied to a (..., 2W) tensor requires 2W == dim // 2.
    assert gamma.shape == (C // 2,) and beta.shape == (C // 2,) and 2 * W == C // 2
    assert ch % 8 == 0, "dim//2 must be a multiple of 8 for aligned sublane slices/stores"

    T = rows_per_tile if rows_per_tile is not None else _pick_rows_per_tile(H, W)
    assert H % T == 0 and (T * W) % 128 == 0, (T, W)
    TW = T * W
    n_tiles = H // T

    x_flat = x.reshape(B, C, HW)                   # free metadata reshape (NCHW contiguous)

    f32 = jnp.float32
    # Segment matrices: lane (h_local*W + w)  <->  row h_local inside the tile.
    row_of_lane = jnp.arange(TW, dtype=jnp.int32) // W
    w_of_lane = jnp.arange(TW, dtype=jnp.int32) % W
    seg = jax.nn.one_hot(row_of_lane, T, dtype=f32)          # (TW, T)
    segt = seg.T                                             # (T, TW)

    # One-hot scatter matrices for the rearrange 'b (p1 p2 c) h w -> b c (h p1) (w p2)':
    # group q = 2*p1 + p2, source lane m = h*W + w, dest lane l = (2h+p1)*2W + 2w + p2.
    mats = []
    for p1 in (0, 1):
        for p2 in (0, 1):
            dst = 4 * W * row_of_lane + 2 * W * p1 + 2 * w_of_lane + p2
            mats.append(jax.nn.one_hot(dst, 4 * TW, dtype=f32))
    scat = jnp.stack(mats)                                   # (4, TW, 4*TW)

    # gamma/beta tiled into final lane order (period 2W == normalized_shape).
    gb = jnp.stack([jnp.tile(gamma.astype(f32), 2 * T),
                    jnp.tile(beta.astype(f32), 2 * T)])      # (2, 4*TW)

    # Rough per-step VMEM estimate; raise the scoped limit only if we need to
    # (keeps headroom on v7x's 64 MiB physical VMEM).
    fb = 4
    per_step = (2 * C * TW + 2 * ch * 4 * TW) * fb                   # double-buffered blocks
    resident = (C2 * C + 2 * TW * T + 4 * TW * 4 * TW + 2 * 4 * TW) * fb
    temps = 8 * C2 * TW * fb                                         # y, d, mean/inv_full, nrm, out
    est = per_step + resident + temps
    vmem_limit = None if est < 24 * 1024 * 1024 else int(min(56 * 1024 * 1024, 1.5 * est))

    out_flat = pl.pallas_call(
        functools.partial(_patch_expand_kernel, eps=eps, n_group=2.0 * W),
        out_shape=jax.ShapeDtypeStruct((B, ch, 4 * HW), x.dtype),
        grid_spec=pltpu.PrefetchScalarGridSpec(
            num_scalar_prefetch=0,
            grid=(B, n_tiles),
            in_specs=[
                pl.BlockSpec((1, C, TW), lambda b, t: (b, 0, t)),
                pl.BlockSpec((C2, C), lambda b, t: (0, 0)),              # resident
                pl.BlockSpec((TW, T), lambda b, t: (0, 0)),              # resident
                pl.BlockSpec((T, TW), lambda b, t: (0, 0)),              # resident
                pl.BlockSpec((4, TW, 4 * TW), lambda b, t: (0, 0, 0)),   # resident
                pl.BlockSpec((2, 4 * TW), lambda b, t: (0, 0)),          # resident
            ],
            out_specs=pl.BlockSpec((1, ch, 4 * TW), lambda b, t: (b, 0, t)),
        ),
        compiler_params=pltpu.CompilerParams(
            dimension_semantics=("parallel", "parallel"),
            vmem_limit_bytes=vmem_limit),
    )(x_flat, w, seg, segt, scat, gb)

    # The kernel already wrote the final (h p1, w p2) element order -> free reshape only.
    return out_flat.reshape(B, ch, 2 * H, 2 * W)


def patch_expand_reference(x, w, gamma, beta, *, eps=1e-5):
    """Pure-JAX reference matching the PyTorch forward exactly (full f32)."""
    B, C, H, W = x.shape
    c_half = (2 * C) // 4
    y = jnp.einsum('oc,bchw->bohw', w, x, precision='highest')       # 1x1 conv
    y = y.reshape(B, 2, 2, c_half, H, W)                             # (p1, p2, c)
    y = jnp.transpose(y, (0, 3, 4, 1, 5, 2)).reshape(B, c_half, 2 * H, 2 * W)
    mean = jnp.mean(y, axis=-1, keepdims=True)
    var = jnp.mean((y - mean) ** 2, axis=-1, keepdims=True)
    return (y - mean) / jnp.sqrt(var + eps) * gamma + beta


if __name__ == "__main__":
    # LayerNorm(dim // 2) over the expanded width axis requires 2 * W == dim // 2
    # ->  dim = 64, W = 16.  Row tile T = 8 -> grid (2, 2), 128-lane x blocks,
    # 512-lane output blocks.
    B, DIM, H, W = 2, 64, 16, 16
    key = jax.random.PRNGKey(0)
    kx, kw, kg, kb = jax.random.split(key, 4)

    x = jax.random.normal(kx, (B, DIM, H, W), dtype=jnp.float32)
    # Conv2d(dim, 2*dim, k=1, bias=False) weight, squeezed (2*dim, dim, 1, 1) -> (2*dim, dim)
    w = 0.05 * jax.random.normal(kw, (2 * DIM, DIM), dtype=jnp.float32)
    gamma = 1.0 + 0.1 * jax.random.normal(kg, (DIM // 2,), dtype=jnp.float32)
    beta = 0.1 * jax.random.normal(kb, (DIM // 2,), dtype=jnp.float32)

    out = jax.block_until_ready(patch_expand(x, w, gamma, beta))
    ref = patch_expand_reference(x, w, gamma, beta)

    assert out.shape == (B, DIM // 2, 2 * H, 2 * W), out.shape
    # Tolerance covers the two default-precision MXU passes (the 1x1 conv and the
    # final rearrange scatter); LayerNorm statistics themselves are exact f32.
    assert jnp.allclose(out, ref, atol=2e-2, rtol=2e-2), float(jnp.max(jnp.abs(out - ref)))
    print("KERNEL_OK")
</pallas_src>

<mosaic_0001>
module attributes {stable_mosaic.version = 11 : i64} {
  func.func @_patch_expand_kernel(%arg0: i32, %arg1: i32, %arg2: memref<1x64x128xf32, #tpu.memory_space<vmem>>, %arg3: memref<128x64xf32, #tpu.memory_space<vmem>>, %arg4: memref<128x8xf32, #tpu.memory_space<vmem>>, %arg5: memref<8x128xf32, #tpu.memory_space<vmem>>, %arg6: memref<4x128x512xf32, #tpu.memory_space<vmem>>, %arg7: memref<2x512xf32, #tpu.memory_space<vmem>>, %arg8: memref<1x32x512xf32, #tpu.memory_space<vmem>>) attributes {dimension_semantics = [#tpu.dimension_semantics<parallel>, #tpu.dimension_semantics<parallel>], iteration_bounds = array<i64: 2, 2>, scalar_prefetch = 0 : i64, scratch_operands = 0 : i64, tpu.core_type = #tpu.core_type<tc>, window_params = [{transform_indices = @transform_0, window_bounds = array<i64: 1, 64, 128>}, {pipeline_mode = #tpu.pipeline_mode<synchronous>, transform_indices = @transform_1, window_bounds = array<i64: 128, 64>}, {pipeline_mode = #tpu.pipeline_mode<synchronous>, transform_indices = @transform_2, window_bounds = array<i64: 128, 8>}, {pipeline_mode = #tpu.pipeline_mode<synchronous>, transform_indices = @transform_3, window_bounds = array<i64: 8, 128>}, {pipeline_mode = #tpu.pipeline_mode<synchronous>, transform_indices = @transform_4, window_bounds = array<i64: 4, 128, 512>}, {pipeline_mode = #tpu.pipeline_mode<synchronous>, transform_indices = @transform_5, window_bounds = array<i64: 2, 512>}, {transform_indices = @transform_6, window_bounds = array<i64: 1, 32, 512>}]} {
    %c0 = arith.constant 0 : index
    %c0_0 = arith.constant 0 : index
    %c0_1 = arith.constant 0 : index
    %0 = vector.load %arg2[%c0, %c0_0, %c0_1] : memref<1x64x128xf32, #tpu.memory_space<vmem>>, vector<1x64x128xf32>
    %1 = vector.shape_cast %0 : vector<1x64x128xf32> to vector<64x128xf32>
    %c0_2 = arith.constant 0 : index
    %c0_3 = arith.constant 0 : index
    %2 = vector.load %arg3[%c0_2, %c0_3] : memref<128x64xf32, #tpu.memory_space<vmem>>, vector<128x64xf32>
    %cst = arith.constant dense<0.000000e+00> : vector<128x128xf32>
    %3 = tpu.matmul %2, %1, %cst {dimension_numbers = #tpu.dot_dimension_numbers<[1], [0], [0], [1], [0, 0, 1, 1], [], []>} : vector<128x64xf32>, vector<64x128xf32>, vector<128x128xf32> -> vector<128x128xf32>
    %c0_4 = arith.constant 0 : index
    %c0_5 = arith.constant 0 : index
    %4 = vector.load %arg4[%c0_4, %c0_5] : memref<128x8xf32, #tpu.memory_space<vmem>>, vector<128x8xf32>
    %c0_6 = arith.constant 0 : index
    %c0_7 = arith.constant 0 : index
    %5 = vector.load %arg5[%c0_6, %c0_7] : memref<8x128xf32, #tpu.memory_space<vmem>>, vector<8x128xf32>
    %cst_8 = arith.constant dense<0.000000e+00> : vector<128x8xf32>
    %6 = tpu.matmul %3, %4, %cst_8 {dimension_numbers = #tpu.dot_dimension_numbers<[1], [0], [0], [1], [0, 0, 1, 1], [], []>, precision = #tpu.contract_precision<fp32>} : vector<128x128xf32>, vector<128x8xf32>, vector<128x8xf32> -> vector<128x8xf32>
    %7 = vector.extract_strided_slice %6 {offsets = [0, 0], sizes = [32, 8], strides = [1, 1]} : vector<128x8xf32> to vector<32x8xf32>
    %8 = vector.extract_strided_slice %6 {offsets = [32, 0], sizes = [32, 8], strides = [1, 1]} : vector<128x8xf32> to vector<32x8xf32>
    %9 = arith.addf %7, %8 : vector<32x8xf32>
    %cst_9 = arith.constant 3.200000e+01 : f32
    %10 = vector.broadcast %cst_9 : f32 to vector<32x8xf32>
    %11 = arith.divf %9, %10 : vector<32x8xf32>
    %12 = vector.extract_strided_slice %6 {offsets = [64, 0], sizes = [32, 8], strides = [1, 1]} : vector<128x8xf32> to vector<32x8xf32>
    %13 = vector.extract_strided_slice %6 {offsets = [96, 0], sizes = [32, 8], strides = [1, 1]} : vector<128x8xf32> to vector<32x8xf32>
    %14 = arith.addf %12, %13 : vector<32x8xf32>
    %cst_10 = arith.constant 3.200000e+01 : f32
    %15 = vector.broadcast %cst_10 : f32 to vector<32x8xf32>
    %16 = arith.divf %14, %15 : vector<32x8xf32>
    %17 = tpu.concatenate %11, %11, %16, %16 in 0 : vector<32x8xf32>, vector<32x8xf32>, vector<32x8xf32>, vector<32x8xf32> -> vector<128x8xf32>
    %cst_11 = arith.constant dense<0.000000e+00> : vector<128x128xf32>
    %18 = tpu.matmul %17, %5, %cst_11 {dimension_numbers = #tpu.dot_dimension_numbers<[1], [0], [0], [1], [0, 0, 1, 1], [], []>, precision = #tpu.contract_precision<fp32>} : vector<128x8xf32>, vector<8x128xf32>, vector<128x128xf32> -> vector<128x128xf32>
    %19 = arith.subf %3, %18 : vector<128x128xf32>
    %20 = arith.mulf %19, %19 : vector<128x128xf32>
    %cst_12 = arith.constant dense<0.000000e+00> : vector<128x8xf32>
    %21 = tpu.matmul %20, %4, %cst_12 {dimension_numbers = #tpu.dot_dimension_numbers<[1], [0], [0], [1], [0, 0, 1, 1], [], []>, precision = #tpu.contract_precision<fp32>} : vector<128x128xf32>, vector<128x8xf32>, vector<128x8xf32> -> vector<128x8xf32>
    %22 = vector.extract_strided_slice %21 {offsets = [0, 0], sizes = [32, 8], strides = [1, 1]} : vector<128x8xf32> to vector<32x8xf32>
    %23 = vector.extract_strided_slice %21 {offsets = [32, 0], sizes = [32, 8], strides = [1, 1]} : vector<128x8xf32> to vector<32x8xf32>
    %24 = arith.addf %22, %23 : vector<32x8xf32>
    %cst_13 = arith.constant 3.200000e+01 : f32
    %25 = vector.broadcast %cst_13 : f32 to vector<32x8xf32>
    %26 = arith.divf %24, %25 : vector<32x8xf32>
    %27 = vector.extract_strided_slice %21 {offsets = [64, 0], sizes = [32, 8], strides = [1, 1]} : vector<128x8xf32> to vector<32x8xf32>
    %28 = vector.extract_strided_slice %21 {offsets = [96, 0], sizes = [32, 8], strides = [1, 1]} : vector<128x8xf32> to vector<32x8xf32>
    %29 = arith.addf %27, %28 : vector<32x8xf32>
    %cst_14 = arith.constant 3.200000e+01 : f32
    %30 = vector.broadcast %cst_14 : f32 to vector<32x8xf32>
    %31 = arith.divf %29, %30 : vector<32x8xf32>
    %cst_15 = arith.constant 9.99999974E-6 : f32
    %32 = vector.broadcast %cst_15 : f32 to vector<32x8xf32>
    %33 = arith.addf %26, %32 : vector<32x8xf32>
    %34 = math.rsqrt %33 : vector<32x8xf32>
    %cst_16 = arith.constant 9.99999974E-6 : f32
    %35 = vector.broadcast %cst_16 : f32 to vector<32x8xf32>
    %36 = arith.addf %31, %35 : vector<32x8xf32>
    %37 = math.rsqrt %36 : vector<32x8xf32>
    %38 = tpu.concatenate %34, %34, %37, %37 in 0 : vector<32x8xf32>, vector<32x8xf32>, vector<32x8xf32>, vector<32x8xf32> -> vector<128x8xf32>
    %cst_17 = arith.constant dense<0.000000e+00> : vector<128x128xf32>
    %39 = tpu.matmul %38, %5, %cst_17 {dimension_numbers = #tpu.dot_dimension_numbers<[1], [0], [0], [1], [0, 0, 1, 1], [], []>, precision = #tpu.contract_precision<fp32>} : vector<128x8xf32>, vector<8x128xf32>, vector<128x128xf32> -> vector<128x128xf32>
    %40 = arith.mulf %19, %39 : vector<128x128xf32>
    %41 = vector.extract_strided_slice %40 {offsets = [0, 0], sizes = [32, 128], strides = [1, 1]} : vector<128x128xf32> to vector<32x128xf32>
    %c0_18 = arith.constant 0 : index
    %c0_19 = arith.constant 0 : index
    %c0_20 = arith.constant 0 : index
    %42 = vector.load %arg6[%c0_18, %c0_19, %c0_20] : memref<4x128x512xf32, #tpu.memory_space<vmem>>, vector<1x128x512xf32>
    %43 = vector.shape_cast %42 : vector<1x128x512xf32> to vector<128x512xf32>
    %cst_21 = arith.constant dense<0.000000e+00> : vector<32x512xf32>
    %44 = tpu.matmul %41, %43, %cst_21 {dimension_numbers = #tpu.dot_dimension_numbers<[1], [0], [0], [1], [0, 0, 1, 1], [], []>} : vector<32x128xf32>, vector<128x512xf32>, vector<32x512xf32> -> vector<32x512xf32>
    %45 = vector.extract_strided_slice %40 {offsets = [32, 0], sizes = [32, 128], strides = [1, 1]} : vector<128x128xf32> to vector<32x128xf32>
    %c1 = arith.constant 1 : index
    %c0_22 = arith.constant 0 : index
    %c0_23 = arith.constant 0 : index
    %46 = vector.load %arg6[%c1, %c0_22, %c0_23] : memref<4x128x512xf32, #tpu.memory_space<vmem>>, vector<1x128x512xf32>
    %47 = vector.shape_cast %46 : vector<1x128x512xf32> to vector<128x512xf32>
    %cst_24 = arith.constant dense<0.000000e+00> : vector<32x512xf32>
    %48 = tpu.matmul %45, %47, %cst_24 {dimension_numbers = #tpu.dot_dimension_numbers<[1], [0], [0], [1], [0, 0, 1, 1], [], []>} : vector<32x128xf32>, vector<128x512xf32>, vector<32x512xf32> -> vector<32x512xf32>
    %49 = arith.addf %44, %48 : vector<32x512xf32>
    %50 = vector.extract_strided_slice %40 {offsets = [64, 0], sizes = [32, 128], strides = [1, 1]} : vector<128x128xf32> to vector<32x128xf32>
    %c2 = arith.constant 2 : index
    %c0_25 = arith.constant 0 : index
    %c0_26 = arith.constant 0 : index
    %51 = vector.load %arg6[%c2, %c0_25, %c0_26] : memref<4x128x512xf32, #tpu.memory_space<vmem>>, vector<1x128x512xf32>
    %52 = vector.shape_cast %51 : vector<1x128x512xf32> to vector<128x512xf32>
    %cst_27 = arith.constant dense<0.000000e+00> : vector<32x512xf32>
    %53 = tpu.matmul %50, %52, %cst_27 {dimension_numbers = #tpu.dot_dimension_numbers<[1], [0], [0], [1], [0, 0, 1, 1], [], []>} : vector<32x128xf32>, vector<128x512xf32>, vector<32x512xf32> -> vector<32x512xf32>
    %54 = arith.addf %49, %53 : vector<32x512xf32>
    %55 = vector.extract_strided_slice %40 {offsets = [96, 0], sizes = [32, 128], strides = [1, 1]} : vector<128x128xf32> to vector<32x128xf32>
    %c3 = arith.constant 3 : index
    %c0_28 = arith.constant 0 : index
    %c0_29 = arith.constant 0 : index
    %56 = vector.load %arg6[%c3, %c0_28, %c0_29] : memref<4x128x512xf32, #tpu.memory_space<vmem>>, vector<1x128x512xf32>
    %57 = vector.shape_cast %56 : vector<1x128x512xf32> to vector<128x512xf32>
    %cst_30 = arith.constant dense<0.000000e+00> : vector<32x512xf32>
    %58 = tpu.matmul %55, %57, %cst_30 {dimension_numbers = #tpu.dot_dimension_numbers<[1], [0], [0], [1], [0, 0, 1, 1], [], []>} : vector<32x128xf32>, vector<128x512xf32>, vector<32x512xf32> -> vector<32x512xf32>
    %59 = arith.addf %54, %58 : vector<32x512xf32>
    %c0_31 = arith.constant 0 : index
    %c0_32 = arith.constant 0 : index
    %60 = vector.load %arg7[%c0_31, %c0_32] : memref<2x512xf32, #tpu.memory_space<vmem>>, vector<1x512xf32>
    %c1_33 = arith.constant 1 : index
    %c0_34 = arith.constant 0 : index
    %61 = vector.load %arg7[%c1_33, %c0_34] : memref<2x512xf32, #tpu.memory_space<vmem>>, vector<1x512xf32>
    %62 = vector.broadcast %60 : vector<1x512xf32> to vector<32x512xf32>
    %63 = arith.mulf %59, %62 : vector<32x512xf32>
    %64 = vector.broadcast %61 : vector<1x512xf32> to vector<32x512xf32>
    %65 = arith.addf %63, %64 : vector<32x512xf32>
    %c0_35 = arith.constant 0 : index
    %c0_36 = arith.constant 0 : index
    %c0_37 = arith.constant 0 : index
    %66 = vector.load %arg8[%c0_35, %c0_36, %c0_37] : memref<1x32x512xf32, #tpu.memory_space<vmem>>, vector<1x32x512xf32>
    %67 = vector.shape_cast %66 : vector<1x32x512xf32> to vector<32x512xf32>
    %68 = vector.shape_cast %65 : vector<32x512xf32> to vector<1x32x512xf32>
    tpu.vector_store %arg8[%c0_35, %c0_36, %c0_37], %68 {strides = array<i32>} : memref<1x32x512xf32, #tpu.memory_space<vmem>>, vector<1x32x512xf32>,
    return
  }
  func.func @transform_0(%arg0: i32, %arg1: i32) -> (i32, i32, i32) {
    %c0_i32 = arith.constant 0 : i32
    %c0_i32_0 = arith.constant 0 : i32
    return %arg0, %c0_i32, %arg1 : i32, i32, i32
  }
  func.func @transform_1(%arg0: i32, %arg1: i32) -> (i32, i32) {
    %c0_i32 = arith.constant 0 : i32
    %c0_i32_0 = arith.constant 0 : i32
    %c0_i32_1 = arith.constant 0 : i32
    return %c0_i32, %c0_i32_0 : i32, i32
  }
  func.func @transform_2(%arg0: i32, %arg1: i32) -> (i32, i32) {
    %c0_i32 = arith.constant 0 : i32
    %c0_i32_0 = arith.constant 0 : i32
    %c0_i32_1 = arith.constant 0 : i32
    return %c0_i32, %c0_i32_0 : i32, i32
  }
  func.func @transform_3(%arg0: i32, %arg1: i32) -> (i32, i32) {
    %c0_i32 = arith.constant 0 : i32
    %c0_i32_0 = arith.constant 0 : i32
    %c0_i32_1 = arith.constant 0 : i32
    return %c0_i32, %c0_i32_0 : i32, i32
  }
  func.func @transform_4(%arg0: i32, %arg1: i32) -> (i32, i32, i32) {
    %c0_i32 = arith.constant 0 : i32
    %c0_i32_0 = arith.constant 0 : i32
    %c0_i32_1 = arith.constant 0 : i32
    %c0_i32_2 = arith.constant 0 : i32
    return %c0_i32, %c0_i32_0, %c0_i32_1 : i32, i32, i32
  }
  func.func @transform_5(%arg0: i32, %arg1: i32) -> (i32, i32) {
    %c0_i32 = arith.constant 0 : i32
    %c0_i32_0 = arith.constant 0 : i32
    %c0_i32_1 = arith.constant 0 : i32
    return %c0_i32, %c0_i32_0 : i32, i32
  }
  func.func @transform_6(%arg0: i32, %arg1: i32) -> (i32, i32, i32) {
    %c0_i32 = arith.constant 0 : i32
    %c0_i32_0 = arith.constant 0 : i32
    return %arg0, %c0_i32, %arg1 : i32, i32, i32
  }
}

</mosaic_0001>

<bundles_post_ra>
// kernel: tpu_custom_call.1
= control target key start
LH: loop header
LB: loop body
LE: loop exit
PB: predicated region body
PF: predicated region fallthrough
CT: control target
= control target key end

     0   :  { %11 = vsyncpa [#allocation4], 0  ;;  %s11208_s0 = inlined_call_operand.vmem [shape: f32[2,64,256], index: 0, kind: input, shape index: {}]   ;;  %s11209_s1 = inlined_call_operand.vmem [shape: f32[128,64], index: 1, kind: input, shape index: {}]   ;;  %s11210_s2 = inlined_call_operand.vmem [shape: f32[128,8], index: 2, kind: input, shape index: {}]   ;;  %s11211_s3 = inlined_call_operand.vmem [shape: f32[8,128], index: 3, kind: input, shape index: {}]   ;;  %s11212_s4 = inlined_call_operand.hbm [shape: f32[4,128,512], index: 4, kind: input, shape index: {}]   ;;  %s11213_s5 = inlined_call_operand.vmem [shape: f32[2,512], index: 5, kind: input, shape index: {}]   ;;  %s11214_s6 = inlined_call_operand.hbm [shape: f32[2,32,1024], index: 6, kind: output, shape index: {}]  }
   0x1   :  { %12 = vsyncpa [#allocation5], 0 }
   0x2   :  { %14 = vsyncpa [#allocation5 + $0x1], 0  ;;  %s8664_s21 = smov 0   ;;  %s8666_s22 = smov 0  }
   0x3   :  { %s8668_s23 = smov 0   ;;  %s8670_s24 = smov 0  }
   0x4   :  { %s8672_s25 = smov 0   ;;  %s8674_s26 = smov 0  }
   0x5   :  { %s8676_s27 = smov 0   ;;  %s8678_s28 = smov 0  }
   0x6 LB: > { %11453 = sst [smem:[#allocation9_spill]] %s8591_s21  ;;  %s6690_s29 = sadd.s32 4294967295, %s8619_s28   ;;  %s8619_s28 = sphi %s8678_s28, %s20_s28   ;;  %s8615_s27 = sphi %s8676_s27, %s11842_s27   ;;  %s8611_s26 = sphi %s8674_s26, %s11841_s26   ;;  %s8607_s25 = sphi %s8672_s25, %s11840_s25   ;;  %s8603_s24 = sphi %s8670_s24, %s11839_s24   ;;  %s8599_s23 = sphi %s8668_s23, %s11838_s23   ;;  %s8595_s22 = sphi %s8666_s22, %s11837_s22   ;;  %s8591_s21 = sphi %s8664_s21, %s11836_s21  }
   0x7   : > { %s6691_s30 = sadd.s32 4294967294, %s8619_s28   ;;  %s29_s7 = sadd.s32 1, %s8611_s26 }
   0x8   : > { %s32_s8 = sadd.s32 1, %s8615_s27  ;;  %p30_p0 = scmp.ge.s32.totalorder %s29_s7, 2 }
   0x9   : > { %s41_s9 = sadd.s32 1, %s8599_s23  ;;  %p48_p1 = scmp.ne.s32.totalorder %s8599_s23, %s8595_s22 }
   0xa   : > { %p49_p2 = scmp.eq.s32.totalorder %s8619_s28, 0  ;;  %s11844_s7 = smov (%p30_p0, %s29_s7), 0 }
   0xb   : > { %11454 = sst [smem:[#allocation10_spill]] %s11844_s7  ;;  %s11846_s8 = smov (!%p30_p0, %s32_s8), %s8615_s27 }
   0xc   : > { %s37_s10 = ssub.s32 %s8611_s26, %s11844_s7  ;;  %p8717_p3 = por %p49_p2, %p48_p1 }
   0xd   : > { %p34_p4 = scmp.ge.s32.totalorder %s11846_s8, 2  ;;  %p185_p5 = scmp.eq.s32.totalorder %s6690_s29, 3 }
   0xe   : > { %p190_p6 = scmp.ne.s32.totalorder %s8595_s22, %s8591_s21  ;;  %p191_p7 = scmp.eq.s32.totalorder %s6691_s30, 3 }
   0xf   : > { %s11848_s8 = smov (%p34_p4, %s11846_s8), 0  ;;  %p8725_p8 = por %p185_p5, %p48_p1 }
  0x10   : > { %11456 = sst [smem:[#allocation11_spill]] %s11848_s8  ;;  %p8729_p9 = por %p191_p7, %p190_p6 }
  0x11   : > { %s11457_s12 = scalar_select %p8725_p8, 1, 0 }
  0x12   : > { %s11458_s13 = scalar_select %p8729_p9, 1, 0 }
  0x13   : > { %s36_s14 = ssub.s32 %s8615_s27, %s11848_s8  ;;  %p6692_p10 = scmp.ge.s32.totalorder %s8619_s28, 1 }
  0x14   : > { %11459 = sst [smem:[#allocation12_spill]] %s11458_s13  ;;  %s38_s15 = sor.u32 %s37_s10, %s36_s14 }
  0x15   : > { %p198_p11 = scmp.lt.s32.totalorder %s8619_s28, 5  ;;  %p39_p12 = scmp.eq.s32.totalorder %s38_s15, 0 }
  0x16   : > { %p8741_p0 = scmp.eq.s32.totalorder %s6690_s29, 0  ;;  %s8621_s19 = smov [#allocation3]  }
  0x17   : > { %p8737_p13 = pnand %p6692_p10, %p198_p11  ;;  %s219_s20 = sshll.u32 %s8621_s19, 4  ;;  %s220_s20 = int_to_ptr.vmem [resolvable:$true] %s219_s20 }
  0x18   : > { %s8746_s18 = scalar_select %p39_p12, %s8599_s23, %s41_s9  }
  0x19   : > { %p8399_p1 = pneg %p8737_p13  ;;  %s8508_s30 = scalar_lea.vmem %s220_s20, 32768 }
  0x1a   : > { %11462 = sst [smem:[#allocation13_spill]] %s8746_s18  ;;  %p8509_p5 = scmp.ne.s32.totalorder %s220_s20, %s8508_s30 }
  0x1b   : > { %p8400_p2 = pnand %p8741_p0, %p8399_p1  ;;  %p8516_p10 = scmp.lt.s32.totalorder %s220_s20, %s220_s20 }
  0x1c   : > { %p8517_p11 = scmp.lt.s32.totalorder %s8508_s30, %s8508_s30 }
  0x1d   : > { %p8499_p4 = pneg %p8400_p2 }
  0x1e   : > { %p8518_p9 = por %p8517_p11, %p8516_p10 }
  0x1f   : > { %p8511_p6 = pnand %p8509_p5, %p8499_p4 }
  0x21   : > { %p8512_p7 = pneg %p8511_p6 }
  0x23   : > { %p8519_p8 = pnand %p8518_p9, %p8512_p7 }
  0x25   : > { %8522 = shalt.err (!%p8519_p8)
}
  0x26   : > { %s8622_s29 = smov 512   ;;  %s8623_s9 = smov 32  }
  0x27   : > { %8402 = dma.hbm_to_vmem [thread:$0]  (!%p8400_p2), %s11212_s4, 32768, %s220_s20, [#allocation4], %s8622_s29, %s8622_s29, %s8623_s9  }
  0x28   : > { %p6694_p12 = scmp.ge.s32.totalorder %s8619_s28, 4 }
  0x2a   : > { %232 = sbr.rel (%p6694_p12) target bundleno = 57 (0x39), region = 36 }
  0x2f   : > { %235 = sbr.rel (!%p8717_p3) target bundleno = 57 (0x39), region = 40  ;;  %s237_s15 = sand.u32 (%p8717_p3), 1, %s8599_s23  }
  0x30   : > { %s6696_s19 = sshll.u32 (%p8717_p3), %s8615_s27, 4  ;;  %s6695_s30 = sshll.u32 (%p8717_p3), %s237_s15, 6 }
  0x31   : > { %s241_s8 = sadd.s32 (%p8717_p3), %s8611_s26, %s6696_s19  ;;  %s239_s20 = scalar_lea.vmem (%p8717_p3), [#allocation2], %s6695_s30 }
  0x32   : > { %s6697_s7 = sshll.u32 (%p8717_p3), %s241_s8, 3 }
  0x33   : > { %s243_s21 = scalar_lea.vmem (%p8717_p3), %s11208_s0, %s6697_s7 }
  0x34   : > { %v286_v0 = vld [vmem:[%s243_s21] sm:$0xff]  ;;  %v288_v1 = vld [vmem:[%s243_s21 + $0x10] sm:$0xff] }
  0x35   : > { %v290_v2 = vld [vmem:[%s243_s21 + $0x20] sm:$0xff]  ;;  %287 = vst [vmem:[%s239_s20] sm:$0xff] %v286_v0  ;;  %289 = vst [vmem:[%s239_s20 + $0x8] sm:$0xff] %v288_v1  ;;  %v292_v3 = vld [vmem:[%s243_s21 + $0x30] sm:$0xff] }
  0x36   : > { %291 = vst [vmem:[%s239_s20 + $0x10] sm:$0xff] %v290_v2  ;;  %v294_v4 = vld [vmem:[%s243_s21 + $0x40] sm:$0xff]  ;;  %v296_v5 = vld [vmem:[%s243_s21 + $0x50] sm:$0xff]  ;;  %293 = vst [vmem:[%s239_s20 + $0x18] sm:$0xff] %v292_v3 }
  0x37   : > { %295 = vst [vmem:[%s239_s20 + $0x20] sm:$0xff] %v294_v4  ;;  %297 = vst [vmem:[%s239_s20 + $0x28] sm:$0xff] %v296_v5  ;;  %v298_v6 = vld [vmem:[%s243_s21 + $0x60] sm:$0xff]  ;;  %v300_v7 = vld [vmem:[%s243_s21 + $0x70] sm:$0xff] }
  0x38   : > { %299 = vst [vmem:[%s239_s20 + $0x30] sm:$0xff] %v298_v6  ;;  %301 = vst [vmem:[%s239_s20 + $0x38] sm:$0xff] %v300_v7 }
  0x39 PF: > { %310 = sbr.rel (%p8737_p13) target bundleno = 1844 (0x734), region = 78 }
  0x3e   : > { %s8767_s7 = sand.u32 1, %s8595_s22  }
  0x3f   : > { %s6699_s8 = sshll.u32 %s8767_s7, 6 }
  0x40   : > { %s8770_s11 = scalar_lea.vmem [#allocation2], %s6699_s8 }
  0x41   : > { %8582 = dma.done.wait (%p8741_p0), [#allocation4], 32768  }
  0x42   : > { %8584 = vsyncadd (%p8741_p0), [#allocation4], 4294934528  ;;  %v354_v8 = vld [vmem:[%s8770_s11 + $0x38] sm:$0xff]  ;;  %v353_v9 = vld [vmem:[%s8770_s11 + $0x30] sm:$0xff]  ;;  %vm371_vm0 = vcmask 523264   ;;  %vm1885_vm1 = vcmask 64512  }
  0x43   : > { %7337 = vmatprep.subr.mxu0 %v354_v8  ;;  %v352_v10 = vld [vmem:[%s8770_s11 + $0x28] sm:$0xff]  ;;  %v355_v11 = vld [vmem:[%s11209_s1] sm:$0xff]  ;;  %v350_v13 = vld [vmem:[%s8770_s11 + $0x18] sm:$0xff]  ;;  %s6701_s19 = sshll.u32 %s8767_s7, 7  ;;  %s6720_s20 = sshll.u32 %s8603_s24, 2 }
  0x44   : > { %7338 = vmatpush3.msra.mxu0 %v354_v8  ;;  %7353 = vmatprep.mubr.msk.f32.mxu0 %vm371_vm0, %v355_v11  ;;  %v351_v12 = vld [vmem:[%s8770_s11 + $0x20] sm:$0xff]  ;;  %v349_v14 = vld [vmem:[%s8770_s11 + $0x10] sm:$0xff]  ;;  %v580_v15 = vld [vmem:[%s11210_s2 + $0x78] sm:$0xff]  ;;  %s11094_s30 = scalar_lea.vmem [#allocation6], %s6701_s19  ;;  %s6721_s8 = sshll.u32 %s8607_s25, 5 }
  0x45   : > { %7339 = vmatprep.subr.mxu0 %v353_v9  ;;  %v579_v16 = vld [vmem:[%s11210_s2 + $0x70] sm:$0xff]  ;;  %v578_v17 = vld [vmem:[%s11210_s2 + $0x68] sm:$0xff]  ;;  %v8795_v18 = vand.u32 4294901760, %v580_v15  ;;  %v577_v21 = vld [vmem:[%s11210_s2 + $0x60] sm:$0xff]  ;;  %s11118_s24 = sadd.s32 %s6721_s8, %s6720_s20  ;;  %s6594_s21 = sshll.u32 %s11094_s30, 4  ;;  %s11149_s21 = int_to_ptr.vmem [resolvable:$true] %s6594_s21 }
  0x46   : > { %7340 = vmatpush3.msra.mxu0 %v353_v9  ;;  %v8797_v19 = vand.u32 4294901760, %v579_v16  ;;  %v8799_v20 = vand.u32 4294901760, %v578_v17  ;;  %v576_v22 = vld [vmem:[%s11210_s2 + $0x58] sm:$0xff]  ;;  %v575_v23 = vld [vmem:[%s11210_s2 + $0x50] sm:$0xff]  ;;  %v348_v24 = vld [vmem:[%s8770_s11 + $0x8] sm:$0xff]  ;;  %v8811_v25 = vand.u32 4294901760, %v577_v21 }
  0x47   : > { %7341 = vmatprep.subr.mxu0 %v352_v10  ;;  %11463 = vst [vmem:[#allocation14_spill] sm:$0xff] %v8795_v18  ;;  %v8813_v26 = vand.u32 4294901760, %v576_v22  ;;  %v8815_v27 = vand.u32 4294901760, %v575_v23  ;;  %v574_v28 = vld [vmem:[%s11210_s2 + $0x48] sm:$0xff]  ;;  %v573_v29 = vld [vmem:[%s11210_s2 + $0x40] sm:$0xff]  ;;  %v8824_v30 = vsub.f32 %v580_v15, %v8795_v18  ;;  %7377 = vmatprep.subr.mxu1 %v8795_v18  ;;  %v357_v46 = vld [vmem:[%s11209_s1 + $0x10] sm:$0xff] }
  0x48   : > { %7342 = vmatpush3.msra.mxu0 %v352_v10  ;;  %11464 = vst [vmem:[#allocation15_spill] sm:$0xff] %v8797_v19  ;;  %11465 = vst [vmem:[#allocation16_spill] sm:$0xff] %v8799_v20  ;;  %v8827_v31 = vsub.f32 %v579_v16, %v8797_v19  ;;  %v8830_v32 = vsub.f32 %v578_v17, %v8799_v20  ;;  %v8833_v33 = vand.u32 4294901760, %v574_v28  ;;  %v347_v34 = vld [vmem:[%s8770_s11] sm:$0xff]  ;;  %7378 = vmatpush3.msra.mxu1 %v8795_v18  ;;  %v356_v42 = vld [vmem:[%s11209_s1 + $0x8] sm:$0xff]  ;;  %s6722_s25 = sshll.u32 %s11118_s24, 7 }
  0x49   : > { %7343 = vmatprep.subr.mxu0 %v351_v12  ;;  %11466 = vst [vmem:[#allocation17_spill] sm:$0xff] %v8811_v25  ;;  %11467 = vst [vmem:[#allocation18_spill] sm:$0xff] %v8813_v26  ;;  %v8837_v35 = vsub.f32 %v577_v21, %v8811_v25  ;;  %v8841_v36 = vsub.f32 %v576_v22, %v8813_v26  ;;  %v8844_v37 = vsub.f32 %v575_v23, %v8815_v27  ;;  %v572_v52 = vld [vmem:[%s11210_s2 + $0x38] sm:$0xff]  ;;  %v571_v53 = vld [vmem:[%s11210_s2 + $0x30] sm:$0xff]  ;;  %s11145_s17 = scalar_lea.hbm %s11214_s6, %s6722_s25  ;;  %s6579_s11 = scalar_lea.sflag [#allocation5], %s8767_s7 }
  0x4a   : > { %7344 = vmatpush3.msra.mxu0 %v351_v12  ;;  %11468 = vst [vmem:[#allocation19_spill] sm:$0xff] %v8815_v27  ;;  %11469 = vst [vmem:[#allocation20_spill] sm:$0xff] %v8824_v30  ;;  %v8846_v38 = vand.u32 4294901760, %v573_v29  ;;  %v8849_v39 = vand.u32 4294901760, %v8824_v30  ;;  %v8852_v40 = vand.u32 4294901760, %v8827_v31  ;;  %v8855_v41 = vand.u32 4294901760, %v8830_v32  ;;  %7379 = vmatprep.subr.mxu1 %v8797_v19 }
  0x4b   : > { %7345 = vmatprep.subr.mxu0 %v350_v13  ;;  %11470 = vst [vmem:[#allocation21_spill] sm:$0xff] %v8827_v31  ;;  %11471 = vst [vmem:[#allocation22_spill] sm:$0xff] %v8830_v32  ;;  %v8862_v43 = vand.u32 4294901760, %v8837_v35  ;;  %v8865_v44 = vand.u32 4294901760, %v8841_v36  ;;  %7380 = vmatpush3.msra.mxu1 %v8797_v19  ;;  %v8869_v45 = vsub.f32 %v574_v28, %v8833_v33  ;;  %v8882_v50 = vand.u32 4294901760, %v8844_v37  ;;  %v570_v54 = vld [vmem:[%s11210_s2 + $0x28] sm:$0xff] }
  0x4c   : > { %7346 = vmatpush3.msra.mxu0 %v350_v13  ;;  %11472 = vst [vmem:[#allocation23_spill] sm:$0xff] %v8833_v33  ;;  %11473 = vst [vmem:[#allocation24_spill] sm:$0xff] %v8837_v35  ;;  %v827_v47 = vsub.f32 %v8824_v30, %v8849_v39  ;;  %v834_v48 = vsub.f32 %v8827_v31, %v8852_v40  ;;  %v841_v49 = vsub.f32 %v8830_v32, %v8855_v41  ;;  %v358_v58 = vld [vmem:[%s11209_s1 + $0x18] sm:$0xff]  ;;  %v569_v61 = vld [vmem:[%s11210_s2 + $0x20] sm:$0xff]  ;;  %s8523_s18 = scalar_lea.vmem %s11149_s21, 2048  ;;  %p11829_p8 = scmp.ne.s32.totalorder %s11457_s12, 0 }
  0x4d   : > { %7347 = vmatprep.subr.mxu0 %v349_v14  ;;  %11474 = vst [vmem:[#allocation25_spill] sm:$0xff] %v8841_v36  ;;  %11475 = vst [vmem:[#allocation26_spill] sm:$0xff] %v8844_v37  ;;  %7381 = vmatprep.subr.mxu1 %v8799_v20  ;;  %v8886_v51 = vsub.f32 %v573_v29, %v8846_v38  ;;  %v848_v57 = vsub.f32 %v8837_v35, %v8862_v43  ;;  %v8912_v60 = vand.u32 4294901760, %v8869_v45  ;;  %v359_v62 = vld [vmem:[%s11209_s1 + $0x20] sm:$0xff]  ;;  %v568_v5 = vld [vmem:[%s11210_s2 + $0x18] sm:$0xff]  ;;  %p8524_p3 = scmp.ne.s32.totalorder %s11149_s21, %s8523_s18  ;;  %s8625_s29 = smov [#allocation6]  }
  0x4e   : > { %7348 = vmatpush3.msra.mxu0 %v349_v14  ;;  %11476 = vst [vmem:[#allocation27_spill] sm:$0xff] %v8846_v38  ;;  %11477 = vst [vmem:[#allocation28_spill] sm:$0xff] %v8849_v39  ;;  %7382 = vmatpush3.msra.mxu1 %v8799_v20  ;;  %v8898_v55 = vand.u32 4294901760, %v827_v47  ;;  %v8900_v56 = vand.u32 4294901760, %v834_v48  ;;  %v855_v59 = vsub.f32 %v8841_v36, %v8865_v44  ;;  %v8922_v63 = vand.u32 4294901760, %v841_v49  ;;  %v360_v10 = vld [vmem:[%s11209_s1 + $0x28] sm:$0xff] }
  0x4f   : > { %7349 = vmatprep.subr.mxu0 %v348_v24  ;;  %11478 = vst [vmem:[#allocation29_spill] sm:$0xff] %v8852_v40  ;;  %11479 = vst [vmem:[#allocation30_spill] sm:$0xff] %v8855_v41  ;;  %7383 = vmatprep.subr.mxu1 %v8811_v25  ;;  %v8925_v0 = vand.u32 4294901760, %v572_v52  ;;  %v8927_v1 = vand.u32 4294901760, %v571_v53  ;;  %v8929_v2 = vand.u32 4294901760, %v570_v54  ;;  %v862_v3 = vsub.f32 %v8844_v37, %v8882_v50  ;;  %v361_v12 = vld [vmem:[%s11209_s1 + $0x30] sm:$0xff]  ;;  %p8525_p9 = pnand %p8524_p3, %p11829_p8 }
  0x50   : > { %7350 = vmatpush3.msra.mxu0 %v348_v24  ;;  %11480 = vst [vmem:[#allocation31_spill] sm:$0xff] %v8862_v43  ;;  %11481 = vst [vmem:[#allocation32_spill] sm:$0xff] %v8865_v44  ;;  %7384 = vmatpush3.msra.mxu1 %v8811_v25  ;;  %v8935_v4 = vand.u32 4294901760, %v8886_v51  ;;  %v8943_v6 = vand.u32 4294901760, %v848_v57  ;;  %v8951_v9 = vand.u32 4294901760, %v569_v61  ;;  %v869_v11 = vsub.f32 %v8869_v45, %v8912_v60  ;;  %v362_v24 = vld [vmem:[%s11209_s1 + $0x38] sm:$0xff] }
  0x51   : > { %11482 = vst [vmem:[#allocation33_spill] sm:$0xff] %v8869_v45  ;;  %7351 = vmatprep.subr.mxu0 %v347_v34  ;;  %11483 = vst [vmem:[#allocation34_spill] sm:$0xff] %v8882_v50  ;;  %7385 = vmatprep.subr.mxu1 %v8813_v26  ;;  %v8946_v7 = vsub.f32 %v572_v52, %v8925_v0  ;;  %v8949_v8 = vsub.f32 %v571_v53, %v8927_v1  ;;  %v8964_v13 = vand.u32 4294901760, %v855_v59  ;;  %v363_v28 = vld [vmem:[%s11209_s1 + $0x40] sm:$0xff]  ;;  %v364_v52 = vld [vmem:[%s11209_s1 + $0x48] sm:$0xff]  ;;  %p8526_p13 = pneg %p8525_p9  ;;  %s8527_s9 = sshll.u32 %s8625_s29, 4  ;;  %s8528_s9 = int_to_ptr.vmem [resolvable:$false] %s8527_s9 }
  0x52   : > { %7352 = vmatpush3.msra.mxu0 %v347_v34  ;;  %11484 = vst [vmem:[#allocation35_spill] sm:$0xff] %v8886_v51  ;;  %11485 = vst [vmem:[#allocation36_spill] sm:$0xff] %v8898_v55  ;;  %7386 = vmatpush3.msra.mxu1 %v8813_v26  ;;  %v8971_v15 = vsub.f32 %v570_v54, %v8929_v2  ;;  %v8973_v16 = vand.u32 4294901760, %v568_v5  ;;  %v8979_v17 = vand.u32 4294901760, %v862_v3  ;;  %v8998_v29 = vand.u32 4294901760, %v869_v11  ;;  %v365_v53 = vld [vmem:[%s11209_s1 + $0x50] sm:$0xff]  ;;  %p8530_p0 = scmp.lt.s32.totalorder %s11149_s21, %s8528_s9 }
  0x53   : > { %7354 = vmatmul.mubr.msk.f32.vlgmr.msra.gmra.mxu0 %vm371_vm0, %v356_v42  ;;  %11486 = vst [vmem:[#allocation37_spill] sm:$0xff] %v8900_v56  ;;  %11487 = vst [vmem:[#allocation38_spill] sm:$0xff] %v8912_v60  ;;  %7433 = vmatprep.subr.mxu0 %v8898_v55  ;;  %v8967_v14 = vand.u32 4294901760, %v8946_v7  ;;  %v876_v21 = vsub.f32 %v8886_v51, %v8935_v4  ;;  %v8984_v22 = vand.u32 4294901760, %v8949_v8  ;;  %v367_v3 = vld [vmem:[%s11209_s1 + $0x60] sm:$0xff]  ;;  %s8529_s10 = scalar_lea.vmem %s8528_s9, 4096 }
  0x54   : > { %7356 = vmatprep.mubr.msk.f32.mxu0 %vm371_vm0, %v357_v46  ;;  %11488 = vst [vmem:[#allocation39_spill] sm:$0xff] %v8922_v63  ;;  %11489 = vst [vmem:[#allocation40_spill] sm:$0xff] %v8925_v0  ;;  %7434 = vmatpush3.msra.mxu0 %v8898_v55  ;;  %v8987_v23 = vsub.f32 %v569_v61, %v8951_v9  ;;  %v9004_v42 = vand.u32 4294901760, %v8971_v15  ;;  %v9007_v46 = vsub.f32 %v568_v5, %v8973_v16  ;;  %p8531_p1 = scmp.lt.s32.totalorder %s8529_s10, %s8523_s18 }
  0x55   : > { %11490 = vst [vmem:[#allocation41_spill] sm:$0xff] %v8927_v1  ;;  %11491 = vst [vmem:[#allocation42_spill] sm:$0xff] %v8929_v2  ;;  %7435 = vmatprep.subr.mxu0 %v8900_v56  ;;  %7387 = vmatprep.subr.mxu1 %v8815_v27  ;;  %v883_v34 = vsub.f32 %v8946_v7, %v8967_v14  ;;  %v9013_v47 = vand.u32 4294901760, %v876_v21  ;;  %v890_v48 = vsub.f32 %v8949_v8, %v8984_v22  ;;  %v369_v21 = vld [vmem:[%s11209_s1 + $0x70] sm:$0xff] }
  0x56   : > { %11492 = vst [vmem:[#allocation43_spill] sm:$0xff] %v8935_v4  ;;  %11493 = vst [vmem:[#allocation44_spill] sm:$0xff] %v8943_v6  ;;  %7436 = vmatpush3.msra.mxu0 %v8900_v56  ;;  %7388 = vmatpush3.msra.mxu1 %v8815_v27  ;;  %v9018_v49 = vand.u32 4294901760, %v8987_v23  ;;  %v897_v57 = vsub.f32 %v8971_v15, %v9004_v42  ;;  %p8532_p2 = por %p8531_p1, %p8530_p0 }
  0x57   : > { %7357 = vmatmul.mubr.msk.f32.gmra.mxu0 %vm371_vm0, %v358_v58  ;;  %11494 = vst [vmem:[#allocation45_spill] sm:$0xff] %v8946_v7  ;;  %11495 = vst [vmem:[#allocation46_spill] sm:$0xff] %v8949_v8  ;;  %7437 = vmatprep.subr.mxu0 %v8922_v63  ;;  %v9029_v54 = vand.u32 4294901760, %v883_v34  ;;  %v9035_v58 = vand.u32 4294901760, %v9007_v46  ;;  %v9041_v59 = vand.u32 4294901760, %v890_v48  ;;  %v567_v34 = vld [vmem:[%s11210_s2 + $0x10] sm:$0xff] }
  0x58   : > { %11496 = vst [vmem:[#allocation47_spill] sm:$0xff] %v8951_v9  ;;  %7359 = vmatprep.mubr.msk.f32.mxu0 %vm371_vm0, %v359_v62  ;;  %11497 = vst [vmem:[#allocation48_spill] sm:$0xff] %v8964_v13  ;;  %7438 = vmatpush3.msra.mxu0 %v8922_v63  ;;  %v904_v61 = vsub.f32 %v8987_v23, %v9018_v49  ;;  %v366_v62 = vld [vmem:[%s11209_s1 + $0x58] sm:$0xff]  ;;  %v9054_v5 = vand.u32 4294901760, %v897_v57  ;;  %v9098_v48 = vand.u32 4294901760, %v567_v34  ;;  %p8533_p4 = pnand %p8532_p2, %p8526_p13 }
  0x59   : > { %11498 = vst [vmem:[#allocation49_spill] sm:$0xff] %v8967_v14  ;;  %11499 = vst [vmem:[#allocation50_spill] sm:$0xff] %v8971_v15  ;;  %7439 = vmatprep.subr.mxu0 %v8943_v6  ;;  %7389 = vmatprep.subr.mxu1 %v8833_v33 }
  0x5a   : > { %11500 = vst [vmem:[#allocation51_spill] sm:$0xff] %v8973_v16  ;;  %11501 = vst [vmem:[#allocation52_spill] sm:$0xff] %v8979_v17  ;;  %7440 = vmatpush3.msra.mxu0 %v8943_v6  ;;  %7390 = vmatpush3.msra.mxu1 %v8833_v33  ;;  %v9063_v11 = vand.u32 4294901760, %v904_v61  ;;  %v565_v61 = vld [vmem:[%s11210_s2] sm:$0xff] }
  0x5b   : > { %7360 = vmatmul.mubr.msk.f32.gmra.mxu0 %vm371_vm0, %v360_v10  ;;  %11502 = vst [vmem:[#allocation53_spill] sm:$0xff] %v8984_v22  ;;  %11503 = vst [vmem:[#allocation54_spill] sm:$0xff] %v8987_v23  ;;  %7441 = vmatprep.subr.mxu0 %v8964_v13  ;;  %v911_v10 = vsub.f32 %v9007_v46, %v9035_v58 }
  0x5c   : > { %7362 = vmatprep.mubr.msk.f32.mxu0 %vm371_vm0, %v361_v12  ;;  %11504 = vst [vmem:[#allocation55_spill] sm:$0xff] %v8998_v29  ;;  %11505 = vst [vmem:[#allocation56_spill] sm:$0xff] %v9004_v42  ;;  %7442 = vmatpush3.msra.mxu0 %v8964_v13  ;;  %v368_v12 = vld [vmem:[%s11209_s1 + $0x68] sm:$0xff] }
  0x5d   : > { %11506 = vst [vmem:[#allocation57_spill] sm:$0xff] %v9007_v46  ;;  %7443 = vmatprep.subr.mxu0 %v8979_v17  ;;  %11507 = vst [vmem:[#allocation58_spill] sm:$0xff] %v9013_v47  ;;  %7391 = vmatprep.subr.mxu1 %v8846_v38 }
  0x5e   : > { %11508 = vst [vmem:[#allocation59_spill] sm:$0xff] %v9018_v49  ;;  %7444 = vmatpush3.msra.mxu0 %v8979_v17  ;;  %11509 = vst [vmem:[#allocation60_spill] sm:$0xff] %v9029_v54  ;;  %7392 = vmatpush3.msra.mxu1 %v8846_v38 }
  0x5f   : > { %7363 = vmatmul.mubr.msk.f32.gmra.mxu0 %vm371_vm0, %v362_v24  ;;  %7445 = vmatprep.subr.mxu0 %v8998_v29  ;;  %11510 = vst [vmem:[#allocation61_spill] sm:$0xff] %v9035_v58  ;;  %11511 = vst [vmem:[#allocation62_spill] sm:$0xff] %v9041_v59  ;;  %v9074_v24 = vand.u32 4294901760, %v911_v10  ;;  %v9119_v10 = vand.u32 4294901760, %v565_v61 }
  0x60   : > { %7365 = vmatprep.mubr.msk.f32.mxu0 %vm371_vm0, %v363_v28  ;;  %7446 = vmatpush3.msra.mxu0 %v8998_v29  ;;  %11512 = vst [vmem:[#allocation63_spill] sm:$0xff] %v9054_v5  ;;  %11513 = vst [vmem:[#allocation64_spill] sm:$0xff] %v9063_v11  ;;  %v370_v28 = vld [vmem:[%s11209_s1 + $0x78] sm:$0xff] }
  0x61   : > { %7447 = vmatprep.subr.mxu0 %v9013_v47  ;;  %7393 = vmatprep.subr.mxu1 %v8925_v0  ;;  %11514 = vst [vmem:[#allocation65_spill] sm:$0xff] %v9074_v24  ;;  %11515 = vst [vmem:[#allocation66_spill] sm:$0xff] %v9098_v48 }
  0x62   : > { %7448 = vmatpush3.msra.mxu0 %v9013_v47  ;;  %7394 = vmatpush3.msra.mxu1 %v8925_v0  ;;  %11520 = vst [vmem:[#allocation71_spill] sm:$0xff] %v9119_v10 }
  0x63   : > { %7366 = vmatmul.mubr.msk.f32.gmra.mxu0 %vm371_vm0, %v364_v52  ;;  %7449 = vmatprep.subr.mxu0 %v9029_v54  ;;  %v566_v52 = vld [vmem:[%s11210_s2 + $0x8] sm:$0xff] }
  0x64   : > { %7368 = vmatprep.mubr.msk.f32.mxu0 %vm371_vm0, %v365_v53  ;;  %7450 = vmatpush3.msra.mxu0 %v9029_v54  ;;  %v9104_v53 = vsub.f32 %v567_v34, %v9098_v48  ;;  %v9106_v57 = vand.u32 4294901760, %v566_v52 }
  0x65   : > { %7451 = vmatprep.subr.mxu0 %v9041_v59  ;;  %7395 = vmatprep.subr.mxu1 %v8927_v1 }
  0x66   : > { %7452 = vmatpush3.msra.mxu0 %v9041_v59  ;;  %7396 = vmatpush3.msra.mxu1 %v8927_v1  ;;  %11516 = vst [vmem:[#allocation67_spill] sm:$0xff] %v9104_v53  ;;  %11517 = vst [vmem:[#allocation68_spill] sm:$0xff] %v9106_v57 }
  0x67   : > { %7369 = vmatmul.mubr.msk.f32.gmra.mxu0 %vm371_vm0, %v366_v62  ;;  %7453 = vmatprep.subr.mxu0 %v9054_v5  ;;  %v9114_v62 = vand.u32 4294901760, %v9104_v53 }
  0x68   : > { %7371 = vmatprep.mubr.msk.f32.mxu0 %vm371_vm0, %v367_v3  ;;  %7454 = vmatpush3.msra.mxu0 %v9054_v5  ;;  %v9117_v3 = vsub.f32 %v566_v52, %v9106_v57 }
  0x69   : > { %7455 = vmatprep.subr.mxu0 %v9063_v11  ;;  %7397 = vmatprep.subr.mxu1 %v8929_v2  ;;  %11518 = vst [vmem:[#allocation69_spill] sm:$0xff] %v9114_v62 }
  0x6a   : > { %7456 = vmatpush3.msra.mxu0 %v9063_v11  ;;  %7398 = vmatpush3.msra.mxu1 %v8929_v2  ;;  %11519 = vst [vmem:[#allocation70_spill] sm:$0xff] %v9117_v3 }
  0x6b   : > { %7372 = vmatmul.mubr.msk.f32.gmra.mxu0 %vm371_vm0, %v368_v12  ;;  %7457 = vmatprep.subr.mxu0 %v9074_v24  ;;  %v918_v12 = vsub.f32 %v9104_v53, %v9114_v62 }
  0x6c   : > { %7374 = vmatprep.mubr.msk.f32.mxu0 %vm371_vm0, %v369_v21  ;;  %7458 = vmatpush3.msra.mxu0 %v9074_v24  ;;  %v9126_v21 = vand.u32 4294901760, %v9117_v3 }
  0x6d   : > { %7399 = vmatprep.subr.mxu1 %v8951_v9  ;;  %v9133_v34 = vand.u32 4294901760, %v918_v12 }
  0x6e   : > { %7400 = vmatpush3.msra.mxu1 %v8951_v9  ;;  %11521 = vst [vmem:[#allocation72_spill] sm:$0xff] %v9126_v21  ;;  %v925_v52 = vsub.f32 %v9117_v3, %v9126_v21 }
  0x6f   : > { %7375 = vmatmul.mubr.msk.f32.gmra.mxu0 %vm371_vm0, %v370_v28  ;;  %7401 = vmatprep.subr.mxu1 %v8973_v16  ;;  %v9129_v28 = vsub.f32 %v565_v61, %v9119_v10  ;;  %11523 = vst [vmem:[#allocation74_spill] sm:$0xff] %v9133_v34 }
  0x70   : > { %7402 = vmatpush3.msra.mxu1 %v8973_v16  ;;  %7459 = vmatprep.subr.mxu0 %v9133_v34  ;;  %v9142_v11 = vand.u32 4294901760, %v925_v52 }
  0x71   : > { %7403 = vmatprep.subr.mxu1 %v9098_v48  ;;  %11522 = vst [vmem:[#allocation73_spill] sm:$0xff] %v9129_v28  ;;  %v9138_v24 = vand.u32 4294901760, %v9129_v28  ;;  %7460 = vmatpush3.msra.mxu0 %v9133_v34 }
  0x72   : > { %7404 = vmatpush3.msra.mxu1 %v9098_v48  ;;  %11525 = vst [vmem:[#allocation76_spill] sm:$0xff] %v9142_v11  ;;  %7461 = vmatprep.subr.mxu0 %v9142_v11 }
  0x73   : > { %7405 = vmatprep.subr.mxu1 %v9106_v57  ;;  %11524 = vst [vmem:[#allocation75_spill] sm:$0xff] %v9138_v24  ;;  %v932_v61 = vsub.f32 %v9129_v28, %v9138_v24  ;;  %7462 = vmatpush3.msra.mxu0 %v9142_v11 }
  0x74   : > { %7406 = vmatpush3.msra.mxu1 %v9106_v57 }
  0x75   : > { %7407 = vmatprep.subr.mxu1 %v9119_v10  ;;  %v9148_v12 = vand.u32 4294901760, %v932_v61 }
  0x76   : > { %7408 = vmatpush3.msra.mxu1 %v9119_v10 }
  0x77   : > { %7489 = vmatprep.subr.mxu1 %v8824_v30  ;;  %11526 = vst [vmem:[#allocation77_spill] sm:$0xff] %v9148_v12  ;;  %7463 = vmatprep.subr.mxu0 %v9148_v12 }
  0x78   : > { %7464 = vmatpush3.msra.mxu0 %v9148_v12 }
  0x79   : > { %7545 = vmatprep.subr.mxu0 %v8795_v18 }
 0x113   : > { %v9154_v5 = vpop.f32.mrf.mxu0 }
 0x114   : > { %11527 = vst [vmem:[#allocation78_spill] sm:$0xff] %v9154_v5  ;;  %v9157_v52 = vand.u32 4294901760, %v9154_v5 }
 0x115   : > { %v9159_v59 = vpop.f32.mrf.mxu0 }
 0x116   : > { %11528 = vst [vmem:[#allocation79_spill] sm:$0xff] %v9157_v52  ;;  %11529 = vst [vmem:[#allocation80_spill] sm:$0xff] %v9159_v59  ;;  %v9163_v34 = vsub.f32 %v9154_v5, %v9157_v52  ;;  %v9166_v61 = vand.u32 4294901760, %v9159_v59 }
 0x117   : > { %v9168_v11 = vpop.f32.mrf.mxu0 }
 0x118   : > { %11530 = vst [vmem:[#allocation81_spill] sm:$0xff] %v9166_v61  ;;  %11531 = vst [vmem:[#allocation82_spill] sm:$0xff] %v9168_v11  ;;  %v9171_v12 = vand.u32 4294901760, %v9168_v11  ;;  %7465 = vmatprep.mubr.f32.mxu0 %v9166_v61  ;;  %v9176_v54 = vsub.f32 %v9159_v59, %v9166_v61  ;;  %v11255_v47 = vand.u32 4294901760, %v9163_v34 }
 0x119   : > { %v9179_v29 = vpop.f32.mrf.mxu0  ;;  %7466 = vmatmul.mubr.f32.vlgmr.msra.gmra.mxu0 %v9157_v52 }
 0x11a   : > { %11532 = vst [vmem:[#allocation83_spill] sm:$0xff] %v9171_v12  ;;  %11533 = vst [vmem:[#allocation84_spill] sm:$0xff] %v9179_v29  ;;  %v9184_v5 = vsub.f32 %v9168_v11, %v9171_v12  ;;  %v9187_v17 = vand.u32 4294901760, %v9179_v29  ;;  %7546 = vmatpush3.msra.mxu0 %v8795_v18  ;;  %v11263_v13 = vand.u32 4294901760, %v9176_v54  ;;  %v676_v59 = vsub.f32 %v9163_v34, %v11255_v47 }
 0x11b   : > { %v9191_v6 = vpop.f32.mrf.mxu0  ;;  %7547 = vmatprep.subr.mxu0 %v8797_v19 }
 0x11c   : > { %11534 = vst [vmem:[#allocation85_spill] sm:$0xff] %v9187_v17  ;;  %11535 = vst [vmem:[#allocation86_spill] sm:$0xff] %v9191_v6  ;;  %v9199_v63 = vsub.f32 %v9179_v29, %v9187_v17  ;;  %v9202_v11 = vand.u32 4294901760, %v9191_v6  ;;  %7468 = vmatprep.mubr.f32.mxu0 %v9187_v17  ;;  %7548 = vmatpush3.msra.mxu0 %v8797_v19  ;;  %v666_v56 = vsub.f32 %v9176_v54, %v11263_v13 }
 0x11d   : > { %v9209_v55 = vpop.f32.mrf.mxu0  ;;  %7469 = vmatmul.mubr.f32.gmra.mxu0 %v9171_v12  ;;  %7549 = vmatprep.subr.mxu0 %v8799_v20  ;;  %v677_v12 = vand.u32 4294901760, %v676_v59  ;;  %v11542_v59 = vand.u32 4294901760, %v9184_v5 }
 0x11e   : > { %11536 = vst [vmem:[#allocation87_spill] sm:$0xff] %v9202_v11  ;;  %11537 = vst [vmem:[#allocation88_spill] sm:$0xff] %v9209_v55  ;;  %v9215_v29 = vand.u32 4294901760, %v9209_v55  ;;  %7550 = vmatpush3.msra.mxu0 %v8799_v20  ;;  %v667_v24 = vand.u32 4294901760, %v666_v56  ;;  %v11270_v21 = vand.u32 4294901760, %v9199_v63  ;;  %v9221_v17 = vsub.f32 %v9191_v6, %v9202_v11 }
 0x11f   : > { %v9223_v13 = vpop.f32.mrf.mxu0  ;;  %7551 = vmatprep.subr.mxu0 %v8811_v25 }
 0x120   : > { %11538 = vst [vmem:[#allocation89_spill] sm:$0xff] %v9215_v29  ;;  %11539 = vst [vmem:[#allocation90_spill] sm:$0xff] %v9223_v13  ;;  %v9228_v47 = vsub.f32 %v9209_v55, %v9215_v29  ;;  %7409 = vmatprep.mubr.f32.mxu1 %v667_v24  ;;  %7471 = vmatprep.mubr.f32.mxu0 %v9215_v29  ;;  %v686_v56 = vsub.f32 %v9199_v63, %v11270_v21  ;;  %v9235_v62 = vand.u32 4294901760, %v9223_v13 }
 0x121   : > { %7552 = vmatpush3.msra.mxu0 %v8811_v25  ;;  %v9238_v6 = vpop.f32.mrf.mxu0  ;;  %7410 = vmatmul.mubr.f32.vlgmr.msra.gmra.mxu1 %v677_v12  ;;  %v696_v55 = vsub.f32 %v9184_v5, %v11542_v59 }
 0x122   : > { %11540 = vst [vmem:[#allocation91_spill] sm:$0xff] %v9235_v62  ;;  %11541 = vst [vmem:[#allocation92_spill] sm:$0xff] %v9238_v6  ;;  %v9244_v24 = vand.u32 4294901760, %v9238_v6  ;;  %7472 = vmatmul.mubr.f32.gmra.mxu0 %v9202_v11  ;;  %7490 = vmatpush3.msra.mxu1 %v8824_v30  ;;  %v687_v21 = vand.u32 4294901760, %v686_v56  ;;  %v11282_v29 = vand.u32 4294901760, %v9228_v47  ;;  %v9265_v30 = vsub.f32 %v9223_v13, %v9235_v62 }
 0x123   : > { %7553 = vmatprep.subr.mxu0 %v8813_v26  ;;  %7491 = vmatprep.subr.mxu1 %v8827_v31  ;;  %v9251_v52 = vpop.f32.mrf.mxu0  ;;  %v697_v11 = vand.u32 4294901760, %v696_v55  ;;  %v11549_v55 = vand.u32 4294901760, %v9221_v17 }
 0x124   : > { %11543 = vst [vmem:[#allocation93_spill] sm:$0xff] %v9244_v24  ;;  %11544 = vst [vmem:[#allocation94_spill] sm:$0xff] %v9251_v52  ;;  %v9256_v59 = vsub.f32 %v9238_v6, %v9244_v24  ;;  %7554 = vmatpush3.msra.mxu0 %v8813_v26  ;;  %7492 = vmatpush3.msra.mxu1 %v8827_v31  ;;  %v706_v56 = vsub.f32 %v9228_v47, %v11282_v29  ;;  %v9277_v29 = vand.u32 4294901760, %v9251_v52 }
 0x125   : > { %7555 = vmatprep.subr.mxu0 %v8815_v27  ;;  %7412 = vmatprep.mubr.f32.mxu1 %v687_v21  ;;  %v9268_v12 = vpop.f32.mrf.mxu0 }
 0x126   : > { %11545 = vst [vmem:[#allocation95_spill] sm:$0xff] %v9268_v12  ;;  %7474 = vmatprep.mubr.f32.mxu0 %v9244_v24  ;;  %7493 = vmatprep.subr.mxu1 %v8830_v32  ;;  %v9273_v31 = vand.u32 4294901760, %v9268_v12  ;;  %v11295_v6 = vand.u32 4294901760, %v9256_v59  ;;  %11547 = vst [vmem:[#allocation97_spill] sm:$0xff] %v9277_v29  ;;  %v707_v21 = vand.u32 4294901760, %v706_v56  ;;  %v716_v24 = vsub.f32 %v9221_v17, %v11549_v55 }
 0x127   : > { %7556 = vmatpush3.msra.mxu0 %v8815_v27  ;;  %7413 = vmatmul.mubr.f32.gmra.mxu1 %v697_v11  ;;  %v9280_v13 = vpop.f32.mrf.mxu0 }
 0x128   : > { %11546 = vst [vmem:[#allocation96_spill] sm:$0xff] %v9273_v31  ;;  %11548 = vst [vmem:[#allocation98_spill] sm:$0xff] %v9280_v13  ;;  %v9287_v58 = vsub.f32 %v9268_v12, %v9273_v31  ;;  %7475 = vmatmul.mubr.f32.gmra.mxu0 %v9235_v62  ;;  %7494 = vmatpush3.msra.mxu1 %v8830_v32  ;;  %v726_v56 = vsub.f32 %v9256_v59, %v11295_v6  ;;  %v717_v62 = vand.u32 4294901760, %v716_v24 }
 0x129   : > { %7557 = vmatprep.subr.mxu0 %v8833_v33  ;;  %7495 = vmatprep.subr.mxu1 %v8837_v35  ;;  %v9293_v11 = vpop.f32.mrf.mxu0  ;;  %v9306_v32 = vsub.f32 %v9251_v52, %v9277_v29  ;;  %v9315_v55 = vand.u32 4294901760, %v9280_v13  ;;  %v11554_v52 = vand.u32 4294901760, %v9265_v30 }
 0x12a   : > { %11550 = vst [vmem:[#allocation99_spill] sm:$0xff] %v9293_v11  ;;  %7558 = vmatpush3.msra.mxu0 %v8833_v33  ;;  %7496 = vmatpush3.msra.mxu1 %v8837_v35  ;;  %v9302_v12 = vand.u32 4294901760, %v9293_v11 }
 0x12b   : > { %7559 = vmatprep.subr.mxu0 %v8846_v38  ;;  %7415 = vmatprep.mubr.f32.mxu1 %v707_v21  ;;  %v9309_v61 = vpop.f32.mrf.mxu0  ;;  %11552 = vst [vmem:[#allocation101_spill] sm:$0xff] %v9315_v55  ;;  %v727_v21 = vand.u32 4294901760, %v726_v56  ;;  %v736_v6 = vsub.f32 %v9265_v30, %v11554_v52 }
 0x12c   : > { %11551 = vst [vmem:[#allocation100_spill] sm:$0xff] %v9309_v61  ;;  %7477 = vmatprep.mubr.f32.mxu0 %v9273_v31  ;;  %7497 = vmatprep.subr.mxu1 %v8841_v36  ;;  %v9320_v35 = vsub.f32 %v9293_v11, %v9302_v12  ;;  %v11556_v11 = vand.u32 4294901760, %v9287_v58 }
 0x12d   : > { %7560 = vmatpush3.msra.mxu0 %v8846_v38  ;;  %7416 = vmatmul.mubr.f32.gmra.mxu1 %v717_v62  ;;  %v9322_v24 = vpop.f32.mrf.mxu0 }
 0x12e   : > { %11553 = vst [vmem:[#allocation102_spill] sm:$0xff] %v9322_v24  ;;  %7478 = vmatmul.mubr.f32.gmra.mxu0 %v9277_v29  ;;  %7498 = vmatpush3.msra.mxu1 %v8841_v36  ;;  %v746_v62 = vsub.f32 %v9287_v58, %v11556_v11  ;;  %v9340_v52 = vand.u32 4294901760, %v9322_v24  ;;  %v9344_v36 = vsub.f32 %v9280_v13, %v9315_v55  ;;  %v737_v29 = vand.u32 4294901760, %v736_v6 }
 0x12f   : > { %7561 = vmatprep.subr.mxu0 %v8925_v0  ;;  %7499 = vmatprep.subr.mxu1 %v8844_v37  ;;  %v9331_v31 = vpop.f32.mrf.mxu0  ;;  %v11314_v49 = vand.u32 4294901760, %v9320_v35  ;;  %v9351_v11 = vand.u32 4294901760, %v9309_v61  ;;  %v11558_v13 = vand.u32 4294901760, %v9306_v32 }
 0x130   : > { %11555 = vst [vmem:[#allocation103_spill] sm:$0xff] %v9331_v31  ;;  %7562 = vmatpush3.msra.mxu0 %v8925_v0  ;;  %7500 = vmatpush3.msra.mxu1 %v8844_v37  ;;  %v747_v56 = vand.u32 4294901760, %v746_v62  ;;  %v9361_v6 = vsub.f32 %v9322_v24, %v9340_v52  ;;  %v9385_v62 = vand.u32 4294901760, %v9331_v31 }
 0x131   : > { %7563 = vmatprep.subr.mxu0 %v8927_v1  ;;  %7418 = vmatprep.mubr.f32.mxu1 %v727_v21  ;;  %v9354_v37 = vpop.f32.mrf.mxu0  ;;  %v756_v21 = vsub.f32 %v9306_v32, %v11558_v13 }
 0x132   : > { %7480 = vmatprep.mubr.f32.mxu0 %v9302_v12  ;;  %7501 = vmatprep.subr.mxu1 %v8869_v45  ;;  %11557 = vst [vmem:[#allocation104_spill] sm:$0xff] %v9354_v37  ;;  %v9374_v13 = vand.u32 4294901760, %v9354_v37 }
 0x133   : > { %7564 = vmatpush3.msra.mxu0 %v8927_v1  ;;  %7419 = vmatmul.mubr.f32.gmra.mxu1 %v737_v29  ;;  %v766_v29 = vsub.f32 %v9320_v35, %v11314_v49  ;;  %v757_v24 = vand.u32 4294901760, %v756_v21  ;;  %v11322_v49 = vand.u32 4294901760, %v9361_v6 }
 0x134   : > { %7481 = vmatmul.mubr.f32.gmra.mxu0 %v9315_v55  ;;  %7502 = vmatpush3.msra.mxu1 %v8869_v45  ;;  %v9378_v45 = vsub.f32 %v9309_v61, %v9351_v11  ;;  %v11559_v61 = vand.u32 4294901760, %v9344_v36 }
 0x135   : > { %7565 = vmatprep.subr.mxu0 %v8929_v2  ;;  %7503 = vmatprep.subr.mxu1 %v8886_v51 }
 0x136   : > { %7566 = vmatpush3.msra.mxu0 %v8929_v2  ;;  %7504 = vmatpush3.msra.mxu1 %v8886_v51  ;;  %v767_v51 = vand.u32 4294901760, %v766_v29  ;;  %v776_v55 = vsub.f32 %v9344_v36, %v11559_v61  ;;  %v786_v61 = vsub.f32 %v9361_v6, %v11322_v49 }
 0x137   : > { %7567 = vmatprep.subr.mxu0 %v8951_v9  ;;  %7421 = vmatprep.mubr.f32.mxu1 %v747_v56  ;;  %v9393_v56 = vsub.f32 %v9354_v37, %v9374_v13 }
 0x138   : > { %7483 = vmatprep.mubr.f32.mxu0 %v9340_v52  ;;  %7505 = vmatprep.subr.mxu1 %v8946_v7  ;;  %v777_v29 = vand.u32 4294901760, %v776_v55  ;;  %v11561_v55 = vand.u32 4294901760, %v9176_v54 }
 0x139   : > { %7568 = vmatpush3.msra.mxu0 %v8951_v9  ;;  %7422 = vmatmul.mubr.f32.gmra.mxu1 %v757_v24  ;;  %v9407_v24 = vsub.f32 %v9331_v31, %v9385_v62  ;;  %v11325_v21 = vand.u32 4294901760, %v9393_v56 }
 0x13a   : > { %7484 = vmatmul.mubr.f32.gmra.mxu0 %v9351_v11  ;;  %7506 = vmatpush3.msra.mxu1 %v8946_v7  ;;  %v787_v7 = vand.u32 4294901760, %v786_v61 }
 0x13b   : > { %7569 = vmatprep.subr.mxu0 %v8973_v16  ;;  %7507 = vmatprep.subr.mxu1 %v8949_v8 }
 0x13c   : > { %7570 = vmatpush3.msra.mxu0 %v8973_v16  ;;  %7508 = vmatpush3.msra.mxu1 %v8949_v8  ;;  %v11560_v8 = vand.u32 4294901760, %v9378_v45 }
 0x13d   : > { %7571 = vmatprep.subr.mxu0 %v9098_v48  ;;  %7424 = vmatprep.mubr.f32.mxu1 %v767_v51  ;;  %v815_v51 = vand.u32 4294901760, %v9407_v24 }
 0x13e   : > { %7486 = vmatprep.mubr.f32.mxu0 %v9374_v13  ;;  %7509 = vmatprep.subr.mxu1 %v8971_v15  ;;  %v796_v49 = vsub.f32 %v9378_v45, %v11560_v8  ;;  %v806_v8 = vsub.f32 %v9393_v56, %v11325_v21 }
 0x13f   : > { %7572 = vmatpush3.msra.mxu0 %v9098_v48  ;;  %7425 = vmatmul.mubr.f32.gmra.mxu1 %v777_v29  ;;  %v816_v29 = vsub.f32 %v9407_v24, %v815_v51 }
 0x140   : > { %7487 = vmatmul.mubr.f32.gmra.mxu0 %v9385_v62  ;;  %7510 = vmatpush3.msra.mxu1 %v8971_v15  ;;  %v797_v61 = vand.u32 4294901760, %v796_v49  ;;  %v807_v21 = vand.u32 4294901760, %v806_v8  ;;  %v11564_v8 = vand.u32 4294901760, %v9184_v5 }
 0x141   : > { %7573 = vmatprep.subr.mxu0 %v9106_v57  ;;  %7511 = vmatprep.subr.mxu1 %v8987_v23  ;;  %v817_v49 = vand.u32 4294901760, %v816_v29  ;;  %v11581_v29 = vld [vmem:[#allocation85_spill] sm:$0xff] }
 0x142   : > { %7574 = vmatpush3.msra.mxu0 %v9106_v57  ;;  %7577 = vmatprep.mubr.f32.mxu0 %v11561_v55  ;;  %v11562_v55 = vand.u32 4294901760, %v9163_v34 }
 0x143   : > { %7512 = vmatpush3.msra.mxu1 %v8987_v23  ;;  %7575 = vmatprep.subr.mxu0 %v9119_v10 }
 0x144   : > { %7427 = vmatprep.mubr.f32.mxu1 %v787_v7  ;;  %7513 = vmatprep.subr.mxu1 %v9007_v46  ;;  %v11563_v7 = vand.u32 4294901760, %v9199_v63 }
 0x145   : > { %7576 = vmatpush3.msra.mxu0 %v9119_v10  ;;  %7428 = vmatmul.mubr.f32.gmra.mxu1 %v797_v61  ;;  %v11565_v61 = vand.u32 4294901760, %v9228_v47 }
 0x146   : > { %7514 = vmatpush3.msra.mxu1 %v9007_v46  ;;  %7578 = vmatmul.mubr.f32.vlgmr.msra.gmra.mxu0 %v11562_v55  ;;  %v11582_v55 = vld [vmem:[#allocation72_spill] sm:$0xff] }
 0x147   : > { %7657 = vmatprep.subr.mxu0 %v8795_v18  ;;  %7515 = vmatprep.subr.mxu1 %v9104_v53 }
 0x148   : > { %7580 = vmatprep.mubr.f32.mxu0 %v11563_v7  ;;  %7658 = vmatpush3.msra.mxu0 %v8795_v18  ;;  %v11583_v7 = vld [vmem:[#allocation83_spill] sm:$0xff] }
 0x149   : > { %7516 = vmatpush3.msra.mxu1 %v9104_v53  ;;  %7659 = vmatprep.subr.mxu0 %v8797_v19 }
 0x14a   : > { %7430 = vmatprep.mubr.f32.mxu1 %v807_v21  ;;  %7517 = vmatprep.subr.mxu1 %v9117_v3  ;;  %v11566_v21 = vand.u32 4294901760, %v9221_v17 }
 0x14b   : > { %7660 = vmatpush3.msra.mxu0 %v8797_v19  ;;  %7431 = vmatmul.mubr.f32.gmra.mxu1 %v817_v49  ;;  %v11585_v49 = vld [vmem:[#allocation89_spill] sm:$0xff] }
 0x14c   : > { %7518 = vmatpush3.msra.mxu1 %v9117_v3  ;;  %7581 = vmatmul.mubr.f32.gmra.mxu0 %v11564_v8  ;;  %v11588_v8 = vld [vmem:[#allocation91_spill] sm:$0xff] }
 0x14d   : > { %7661 = vmatprep.subr.mxu0 %v8799_v20  ;;  %7519 = vmatprep.subr.mxu1 %v9129_v28 }
 0x14e   : > { %7521 = vmatprep.mubr.f32.mxu1 %v9176_v54  ;;  %7583 = vmatprep.mubr.f32.mxu0 %v11565_v61  ;;  %v11567_v54 = vand.u32 4294901760, %v9256_v59  ;;  %v11589_v61 = vld [vmem:[#allocation96_spill] sm:$0xff] }
 0x14f   : > { %7662 = vmatpush3.msra.mxu0 %v8799_v20  ;;  %7520 = vmatpush3.msra.mxu1 %v9129_v28 }
 0x150   : > { %7663 = vmatprep.subr.mxu0 %v8811_v25  ;;  %7601 = vmatprep.subr.mxu1 %v8849_v39 }
 0x151   : > { %7664 = vmatpush3.msra.mxu0 %v8811_v25  ;;  %7522 = vmatmul.mubr.f32.vlgmr.msra.gmra.mxu1 %v9163_v34  ;;  %v11568_v34 = vand.u32 4294901760, %v9265_v30 }
 0x152   : > { %7584 = vmatmul.mubr.f32.gmra.mxu0 %v11566_v21  ;;  %7602 = vmatpush3.msra.mxu1 %v8849_v39  ;;  %v11590_v21 = vld [vmem:[#allocation97_spill] sm:$0xff] }
 0x153   : > { %7665 = vmatprep.subr.mxu0 %v8813_v26  ;;  %7524 = vmatprep.mubr.f32.mxu1 %v9199_v63  ;;  %v11569_v63 = vand.u32 4294901760, %v9287_v58 }
 0x154   : > { %7586 = vmatprep.mubr.f32.mxu0 %v11567_v54  ;;  %7603 = vmatprep.subr.mxu1 %v8852_v40  ;;  %v11591_v54 = vld [vmem:[#allocation101_spill] sm:$0xff] }
 0x155   : > { %7666 = vmatpush3.msra.mxu0 %v8813_v26  ;;  %7604 = vmatpush3.msra.mxu1 %v8852_v40 }
 0x156   : > { %7667 = vmatprep.subr.mxu0 %v8815_v27  ;;  %7605 = vmatprep.subr.mxu1 %v8855_v41 }
 0x157   : > { %7668 = vmatpush3.msra.mxu0 %v8815_v27  ;;  %7525 = vmatmul.mubr.f32.gmra.mxu1 %v9184_v5  ;;  %v11570_v5 = vand.u32 4294901760, %v9306_v32 }
 0x158   : > { %7587 = vmatmul.mubr.f32.gmra.mxu0 %v11568_v34  ;;  %7606 = vmatpush3.msra.mxu1 %v8855_v41 }
 0x159   : > { %7669 = vmatprep.subr.mxu0 %v8833_v33  ;;  %7527 = vmatprep.mubr.f32.mxu1 %v9228_v47  ;;  %v11571_v47 = vand.u32 4294901760, %v9320_v35 }
 0x15a   : > { %7589 = vmatprep.mubr.f32.mxu0 %v11569_v63  ;;  %7607 = vmatprep.subr.mxu1 %v8862_v43 }
 0x15b   : > { %7670 = vmatpush3.msra.mxu0 %v8833_v33  ;;  %7608 = vmatpush3.msra.mxu1 %v8862_v43 }
 0x15c   : > { %7671 = vmatprep.subr.mxu0 %v8846_v38  ;;  %7609 = vmatprep.subr.mxu1 %v8865_v44 }
 0x15d   : > { %7672 = vmatpush3.msra.mxu0 %v8846_v38  ;;  %7528 = vmatmul.mubr.f32.gmra.mxu1 %v9221_v17  ;;  %v11572_v17 = vand.u32 4294901760, %v9344_v36 }
 0x15e   : > { %7590 = vmatmul.mubr.f32.gmra.mxu0 %v11570_v5  ;;  %7610 = vmatpush3.msra.mxu1 %v8865_v44 }
 0x15f   : > { %7673 = vmatprep.subr.mxu0 %v8925_v0  ;;  %7530 = vmatprep.mubr.f32.mxu1 %v9256_v59  ;;  %v11573_v59 = vand.u32 4294901760, %v9361_v6 }
 0x160   : > { %7592 = vmatprep.mubr.f32.mxu0 %v11571_v47  ;;  %7611 = vmatprep.subr.mxu1 %v8882_v50 }
 0x161   : > { %7674 = vmatpush3.msra.mxu0 %v8925_v0  ;;  %7612 = vmatpush3.msra.mxu1 %v8882_v50 }
 0x162   : > { %7675 = vmatprep.subr.mxu0 %v8927_v1  ;;  %7613 = vmatprep.subr.mxu1 %v8912_v60 }
 0x163   : > { %7676 = vmatpush3.msra.mxu0 %v8927_v1  ;;  %7531 = vmatmul.mubr.f32.gmra.mxu1 %v9265_v30  ;;  %v11574_v30 = vand.u32 4294901760, %v9378_v45 }
 0x164   : > { %7593 = vmatmul.mubr.f32.gmra.mxu0 %v11572_v17  ;;  %7614 = vmatpush3.msra.mxu1 %v8912_v60 }
 0x165   : > { %7677 = vmatprep.subr.mxu0 %v8929_v2  ;;  %7533 = vmatprep.mubr.f32.mxu1 %v9287_v58  ;;  %v11575_v58 = vand.u32 4294901760, %v9393_v56 }
 0x166   : > { %7595 = vmatprep.mubr.f32.mxu0 %v11573_v59  ;;  %7615 = vmatprep.subr.mxu1 %v8935_v4 }
 0x167   : > { %7678 = vmatpush3.msra.mxu0 %v8929_v2  ;;  %7616 = vmatpush3.msra.mxu1 %v8935_v4 }
 0x168   : > { %7679 = vmatprep.subr.mxu0 %v8951_v9  ;;  %7617 = vmatprep.subr.mxu1 %v8967_v14 }
 0x169   : > { %7680 = vmatpush3.msra.mxu0 %v8951_v9  ;;  %7534 = vmatmul.mubr.f32.gmra.mxu1 %v9306_v32  ;;  %v11576_v32 = vld [vmem:[#allocation59_spill] sm:$0xff] }
 0x16a   : > { %7596 = vmatmul.mubr.f32.gmra.mxu0 %v11574_v30  ;;  %7618 = vmatpush3.msra.mxu1 %v8967_v14 }
 0x16b   : > { %7681 = vmatprep.subr.mxu0 %v8973_v16  ;;  %7536 = vmatprep.mubr.f32.mxu1 %v9320_v35  ;;  %v11577_v35 = vld [vmem:[#allocation81_spill] sm:$0xff] }
 0x16c   : > { %7598 = vmatprep.mubr.f32.mxu0 %v11575_v58  ;;  %7619 = vmatprep.subr.mxu1 %v8984_v22 }
 0x16d   : > { %7682 = vmatpush3.msra.mxu0 %v8973_v16  ;;  %7620 = vmatpush3.msra.mxu1 %v8984_v22 }
 0x16e   : > { %7683 = vmatprep.subr.mxu0 %v9098_v48  ;;  %7621 = vmatprep.subr.mxu1 %v9004_v42 }
 0x16f   : > { %7684 = vmatpush3.msra.mxu0 %v9098_v48  ;;  %7537 = vmatmul.mubr.f32.gmra.mxu1 %v9344_v36  ;;  %v11578_v36 = vld [vmem:[#allocation61_spill] sm:$0xff] }
 0x170   : > { %7599 = vmatmul.mubr.f32.gmra.mxu0 %v815_v51  ;;  %7622 = vmatpush3.msra.mxu1 %v9004_v42  ;;  %v11579_v51 = vld [vmem:[#allocation79_spill] sm:$0xff] }
 0x171   : > { %7685 = vmatprep.subr.mxu0 %v9106_v57  ;;  %7539 = vmatprep.mubr.f32.mxu1 %v9361_v6  ;;  %v11580_v6 = vld [vmem:[#allocation69_spill] sm:$0xff] }
 0x172   : > { %7623 = vmatprep.subr.mxu1 %v11576_v32  ;;  %7686 = vmatpush3.msra.mxu0 %v9106_v57 }
 0x173   : > { %7689 = vmatprep.mubr.f32.mxu0 %v11577_v35  ;;  %7624 = vmatpush3.msra.mxu1 %v11576_v32 }
 0x174   : > { %7687 = vmatprep.subr.mxu0 %v9119_v10  ;;  %7625 = vmatprep.subr.mxu1 %v11578_v36 }
 0x175   : > { %7688 = vmatpush3.msra.mxu0 %v9119_v10  ;;  %7540 = vmatmul.mubr.f32.gmra.mxu1 %v9378_v45  ;;  %v11584_v45 = vld [vmem:[#allocation75_spill] sm:$0xff] }
 0x176   : > { %7626 = vmatpush3.msra.mxu1 %v11578_v36  ;;  %7690 = vmatmul.mubr.f32.vlgmr.msra.gmra.mxu0 %v11579_v51 }
 0x177   : > { %7542 = vmatprep.mubr.f32.mxu1 %v9393_v56  ;;  %7627 = vmatprep.subr.mxu1 %v11580_v6  ;;  %v11586_v56 = vld [vmem:[#allocation87_spill] sm:$0xff] }
 0x178   : > { %7692 = vmatprep.mubr.f32.mxu0 %v11581_v29  ;;  %7628 = vmatpush3.msra.mxu1 %v11580_v6 }
 0x179   : > { %7629 = vmatprep.subr.mxu1 %v11582_v55  ;;  %7543 = vmatmul.mubr.f32.gmra.mxu1 %v9407_v24  ;;  %v11587_v24 = vld [vmem:[#allocation93_spill] sm:$0xff] }
 0x17a   : > { %7630 = vmatpush3.msra.mxu1 %v11582_v55  ;;  %7693 = vmatmul.mubr.f32.gmra.mxu0 %v11583_v7 }
 0x17b   : > { %7631 = vmatprep.subr.mxu1 %v11584_v45  ;;  %7633 = vmatprep.mubr.f32.mxu1 %v11577_v35 }
 0x17c   : > { %7695 = vmatprep.mubr.f32.mxu0 %v11585_v49  ;;  %7632 = vmatpush3.msra.mxu1 %v11584_v45 }
 0x17d   : > { %8361 = vmatprep.subr.mxu1 %v8795_v18  ;;  %7634 = vmatmul.mubr.f32.vlgmr.msra.gmra.mxu1 %v11579_v51 }
 0x17e   : > { %8377 = vmatpush3.msra.mxu1 %v8795_v18  ;;  %7696 = vmatmul.mubr.f32.gmra.mxu0 %v11586_v56 }
 0x17f   : > { %7636 = vmatprep.mubr.f32.mxu1 %v11581_v29  ;;  %8362 = vmatprep.subr.mxu1 %v8797_v19 }
 0x180   : > { %7698 = vmatprep.mubr.f32.mxu0 %v11587_v24  ;;  %8378 = vmatpush3.msra.mxu1 %v8797_v19 }
 0x181   : > { %8363 = vmatprep.subr.mxu1 %v8799_v20  ;;  %7637 = vmatmul.mubr.f32.gmra.mxu1 %v11583_v7 }
 0x182   : > { %8379 = vmatpush3.msra.mxu1 %v8799_v20  ;;  %7699 = vmatmul.mubr.f32.gmra.mxu0 %v11588_v8 }
 0x183   : > { %7639 = vmatprep.mubr.f32.mxu1 %v11585_v49  ;;  %8364 = vmatprep.subr.mxu1 %v8811_v25 }
 0x184   : > { %7701 = vmatprep.mubr.f32.mxu0 %v11589_v61  ;;  %8380 = vmatpush3.msra.mxu1 %v8811_v25 }
 0x185   : > { %8365 = vmatprep.subr.mxu1 %v8813_v26  ;;  %7640 = vmatmul.mubr.f32.gmra.mxu1 %v11586_v56 }
 0x186   : > { %8381 = vmatpush3.msra.mxu1 %v8813_v26  ;;  %7702 = vmatmul.mubr.f32.gmra.mxu0 %v11590_v21 }
 0x187   : > { %7642 = vmatprep.mubr.f32.mxu1 %v11587_v24  ;;  %8366 = vmatprep.subr.mxu1 %v8815_v27 }
 0x188   : > { %7704 = vmatprep.mubr.f32.mxu0 %v9302_v12  ;;  %8382 = vmatpush3.msra.mxu1 %v8815_v27 }
 0x189   : > { %8367 = vmatprep.subr.mxu1 %v8833_v33  ;;  %7643 = vmatmul.mubr.f32.gmra.mxu1 %v11588_v8 }
 0x18a   : > { %8383 = vmatpush3.msra.mxu1 %v8833_v33  ;;  %7705 = vmatmul.mubr.f32.gmra.mxu0 %v11591_v54 }
 0x18b   : > { %7645 = vmatprep.mubr.f32.mxu1 %v11589_v61  ;;  %8368 = vmatprep.subr.mxu1 %v8846_v38 }
 0x18c   : > { %8384 = vmatpush3.msra.mxu1 %v8846_v38 }
 0x18d   : > { %8369 = vmatprep.subr.mxu1 %v8925_v0  ;;  %7646 = vmatmul.mubr.f32.gmra.mxu1 %v11590_v21 }
 0x18e   : > { %8385 = vmatpush3.msra.mxu1 %v8925_v0  ;;  %7648 = vmatprep.mubr.f32.mxu1 %v9302_v12  ;;  %v581_v12 = vld [vmem:[%s11211_s3] sm:$0xff] }
 0x18f   : > { %8370 = vmatprep.subr.mxu1 %v8927_v1  ;;  %v9619_v34 = vand.u32 4294901760, %v581_v12 }
 0x190   : > { %8386 = vmatpush3.msra.mxu1 %v8927_v1 }
 0x191   : > { %8371 = vmatprep.subr.mxu1 %v8929_v2  ;;  %7649 = vmatmul.mubr.f32.gmra.mxu1 %v11591_v54  ;;  %11592 = vst [vmem:[#allocation81_spill] sm:$0xff] %v9619_v34  ;;  %v9622_v63 = vsub.f32 %v581_v12, %v9619_v34 }
 0x192   : > { %8387 = vmatpush3.msra.mxu1 %v8929_v2  ;;  %7651 = vmatprep.mubr.f32.mxu1 %v9340_v52 }
 0x193   : > { %8372 = vmatprep.subr.mxu1 %v8951_v9  ;;  %11593 = vst [vmem:[#allocation79_spill] sm:$0xff] %v9622_v63 }
 0x194   : > { %8388 = vmatpush3.msra.mxu1 %v8951_v9 }
 0x195   : > { %8373 = vmatprep.subr.mxu1 %v8973_v16  ;;  %7652 = vmatmul.mubr.f32.gmra.mxu1 %v9351_v11 }
 0x196   : > { %8389 = vmatpush3.msra.mxu1 %v8973_v16  ;;  %7654 = vmatprep.mubr.f32.mxu1 %v9374_v13 }
 0x197   : > { %8374 = vmatprep.subr.mxu1 %v9098_v48 }
 0x198   : > { %8390 = vmatpush3.msra.mxu1 %v9098_v48 }
 0x199   : > { %8375 = vmatprep.subr.mxu1 %v9106_v57  ;;  %7655 = vmatmul.mubr.f32.gmra.mxu1 %v9385_v62 }
 0x19a   : > { %8391 = vmatpush3.msra.mxu1 %v9106_v57  ;;  %7707 = vmatprep.mubr.f32.mxu1 %v9340_v52  ;;  %v9627_v52 = vand.u32 4294901760, %v9622_v63 }
 0x19b   : > { %8376 = vmatprep.subr.mxu1 %v9119_v10 }
 0x19c   : > { %8392 = vmatpush3.msra.mxu1 %v9119_v10  ;;  %11594 = vst [vmem:[#allocation85_spill] sm:$0xff] %v9627_v52 }
 0x19d   : > { %7708 = vmatmul.mubr.f32.vlgmr.msra.gmra.mxu1 %v9351_v11  ;;  %7713 = vmatprep.subr.mxu1 %v9619_v34  ;;  %v2170_v11 = vsub.f32 %v9622_v63, %v9627_v52 }
 0x19e   : > { %7710 = vmatprep.mubr.f32.mxu1 %v9374_v13  ;;  %7714 = vmatpush3.msra.mxu1 %v9619_v34 }
 0x19f   : > { %7765 = vmatprep.subr.mxu1 %v9622_v63 }
 0x1a1   : > { %7711 = vmatmul.mubr.f32.gmra.mxu1 %v9385_v62  ;;  %v9632_v62 = vand.u32 4294901760, %v2170_v11 }
 0x1a3   : > { %11595 = vst [vmem:[#allocation83_spill] sm:$0xff] %v9632_v62  ;;  %7739 = vmatprep.subr.mxu0 %v9632_v62 }
 0x1a4   : > { %7740 = vmatpush3.msra.mxu0 %v9632_v62 }
 0x1a5   : > { %7791 = vmatprep.subr.mxu0 %v9619_v34 }
 0x1d9   : > { %v7467_v13 = vpop.f32.mrf.mxu0 }
 0x1db   : > { %v9637_v5 = vpop.f32.mrf.mxu0 }
 0x1dd   : > { %v7470_v47 = vpop.f32.mrf.mxu0 }
 0x1df   : > { %v9639_v17 = vpop.f32.mrf.mxu0 }
 0x1e1   : > { %v7411_v59 = vpop.f32.mrf.mxu1 }
 0x1e2   : > { %v9641_v30 = vadd.f32 %v7467_v13, %v7411_v59  ;;  %v9643_v58 = vpop.f32.mrf.mxu0 }
 0x1e3   : > { %v9645_v35 = vpop.f32.mrf.mxu1 }
 0x1e4   : > { %v9647_v51 = vpop.f32.mrf.mxu0 }
 0x1e7   : > { %v7414_v29 = vpop.f32.mrf.mxu1 }
 0x1e8   : > { %v9649_v7 = vadd.f32 %v7470_v47, %v7414_v29  ;;  %v9651_v49 = vpop.f32.mrf.mxu0 }
 0x1e9   : > { %v9653_v56 = vpop.f32.mrf.mxu1 }
 0x1ea   : > { %v9655_v24 = vpop.f32.mrf.mxu0 }
 0x1ed   : > { %v7417_v8 = vpop.f32.mrf.mxu1 }
 0x1ee   : > { %v7479_v61 = vpop.f32.mrf.mxu0 }
 0x1ef   : > { %v9657_v21 = vpop.f32.mrf.mxu1 }
 0x1f0   : > { %v9659_v54 = vpop.f32.mrf.mxu0 }
 0x1f3   : > { %v9661_v12 = vpop.f32.mrf.mxu1 }
 0x1f4   : > { %v7482_v11 = vpop.f32.mrf.mxu0 }
 0x1f5   : > { %v9663_v13 = vpop.f32.mrf.mxu1 }
 0x1f6   : > { %v9665_v59 = vpop.f32.mrf.mxu0 }
 0x1f9   : > { %v7423_v47 = vpop.f32.mrf.mxu1 }
 0x1fa   : > { %v9667_v29 = vadd.f32 %v7479_v61, %v7423_v47  ;;  %v7485_v45 = vpop.f32.mrf.mxu0 }
 0x1fb   : > { %v9669_v55 = vpop.f32.mrf.mxu1 }
 0x1fc   : > { %v9671_v62 = vpop.f32.mrf.mxu0 }
 0x1ff   : > { %v7426_v6 = vpop.f32.mrf.mxu1 }
 0x200   : > { %v9673_v36 = vadd.f32 %v7482_v11, %v7426_v6  ;;  %v7488_v32 = vpop.f32.mrf.mxu0 }
 0x201   : > { %v9675_v42 = vpop.f32.mrf.mxu1 }
 0x202   : > { %v9677_v22 = vpop.f32.mrf.mxu0 }
 0x205   : > { %v7429_v14 = vpop.f32.mrf.mxu1 }
 0x206   : > { %v9679_v4 = vadd.f32 %v7485_v45, %v7429_v14  ;;  %v7579_v60 = vpop.f32.mrf.mxu0 }
 0x207   : > { %v9681_v50 = vpop.f32.mrf.mxu1 }
 0x208   : > { %v1358_v61 = vpop.f32.mrf.mxu0 }
 0x20b   : > { %v7432_v47 = vpop.f32.mrf.mxu1 }
 0x20c   : > { %v9683_v44 = vadd.f32 %v7488_v32, %v7432_v47  ;;  %v7582_v43 = vpop.f32.mrf.mxu0 }
 0x20d   : > { %v9685_v41 = vpop.f32.mrf.mxu1 }
 0x20e   : > { %11596 = vst [vmem:[#allocation89_spill] sm:$0xff] %v9683_v44  ;;  %v9687_v6 = vpop.f32.mrf.mxu0 }
 0x211   : > { %v7523_v11 = vpop.f32.mrf.mxu1 }
 0x212   : > { %v7585_v40 = vpop.f32.mrf.mxu0 }
 0x213   : > { %v1164_v39 = vpop.f32.mrf.mxu1 }
 0x214   : > { %v1390_v28 = vpop.f32.mrf.mxu0 }
 0x217   : > { %v7526_v3 = vpop.f32.mrf.mxu1 }
 0x218   : > { %v7588_v53 = vpop.f32.mrf.mxu0 }
 0x219   : > { %v1178_v14 = vpop.f32.mrf.mxu1 }
 0x21a   : > { %v9689_v45 = vpop.f32.mrf.mxu0 }
 0x21d   : > { %v7529_v46 = vpop.f32.mrf.mxu1 }
 0x21e   : > { %v9691_v23 = vpop.f32.mrf.mxu0 }
 0x21f   : > { %11597 = vst [vmem:[#allocation87_spill] sm:$0xff] %v9691_v23  ;;  %v1192_v15 = vpop.f32.mrf.mxu1 }
 0x220   : > { %v9693_v32 = vpop.f32.mrf.mxu0 }
 0x221   : > { %11598 = vst [vmem:[#allocation93_spill] sm:$0xff] %v9693_v32 }
 0x223   : > { %v7532_v47 = vpop.f32.mrf.mxu1 }
 0x224   : > { %v9695_v31 = vpop.f32.mrf.mxu0 }
 0x225   : > { %11599 = vst [vmem:[#allocation91_spill] sm:$0xff] %v9695_v31  ;;  %v1206_v37 = vpop.f32.mrf.mxu1  ;;  %v995_v31 = vadd.f32 %v9647_v51, %v9657_v21 }
 0x226   : > { %v9697_v10 = vpop.f32.mrf.mxu0 }
 0x227   : > { %11600 = vst [vmem:[#allocation96_spill] sm:$0xff] %v9697_v10  ;;  %v1001_v10 = vadd.f32 %v9643_v58, %v7417_v8 }
 0x229   : > { %v9699_v57 = vpop.f32.mrf.mxu1  ;;  %v1200_v44 = vadd.f32 %v7529_v46, %v1001_v10 }
 0x22a   : > { %v9701_v48 = vpop.f32.mrf.mxu0 }
 0x22b   : > { %11601 = vst [vmem:[#allocation97_spill] sm:$0xff] %v9701_v48  ;;  %v9703_v16 = vpop.f32.mrf.mxu1  ;;  %v1399_v46 = vadd.f32 %v7585_v40, %v1200_v44 }
 0x22c   : > { %v9705_v9 = vpop.f32.mrf.mxu0 }
 0x22d   : > { %11602 = vst [vmem:[#allocation101_spill] sm:$0xff] %v9705_v9 }
 0x22f   : > { %v9707_v2 = vpop.f32.mrf.mxu1 }
 0x230   : > { %v9709_v1 = vpop.f32.mrf.mxu0 }
 0x231   : > { %11603 = vst [vmem:[#allocation105_spill] sm:$0xff] %v9709_v1  ;;  %v9711_v0 = vpop.f32.mrf.mxu1  ;;  %v971_v1 = vadd.f32 %v9637_v5, %v9645_v35  ;;  %v1013_v5 = vadd.f32 %v9651_v49, %v9661_v12  ;;  %v1193_v35 = vadd.f32 %v1192_v15, %v995_v31 }
 0x232   : > { %11604 = vst [vmem:[#allocation106_spill] sm:$0xff] %v9711_v0  ;;  %v9713_v38 = vpop.f32.mrf.mxu0 }
 0x233   : > { %11605 = vst [vmem:[#allocation107_spill] sm:$0xff] %v9713_v38  ;;  %v1172_v38 = vadd.f32 %v7523_v11, %v9641_v30  ;;  %v1165_v48 = vadd.f32 %v1164_v39, %v971_v1  ;;  %v1007_v30 = vadd.f32 %v9655_v24, %v9663_v13  ;;  %v1214_v51 = vadd.f32 %v7532_v47, %v1013_v5 }
 0x234   : > { %v1391_v23 = vadd.f32 %v1390_v28, %v1193_v35 }
 0x235   : > { %v9715_v33 = vpop.f32.mrf.mxu1  ;;  %v1367_v58 = vadd.f32 %v7579_v60, %v1172_v38  ;;  %v1359_v1 = vadd.f32 %v1358_v61, %v1165_v48  ;;  %v1207_v10 = vadd.f32 %v1206_v37, %v1007_v30  ;;  %v1019_v30 = vadd.f32 %v9659_v54, %v9669_v55 }
 0x236   : > { %v7691_v27 = vpop.f32.mrf.mxu0 }
 0x237   : > { %v9717_v26 = vpop.f32.mrf.mxu1  ;;  %v1407_v40 = vadd.f32 %v9689_v45, %v1207_v10  ;;  %v1228_v10 = vadd.f32 %v9699_v57, %v9667_v29  ;;  %v1221_v55 = vadd.f32 %v9703_v16, %v1019_v30  ;;  %v1031_v57 = vadd.f32 %v9665_v59, %v9675_v42  ;;  %v11610_v59 = vld [vmem:[#allocation87_spill] sm:$0xff] }
 0x238   : > { %11606 = vst [vmem:[#allocation108_spill] sm:$0xff] %v9717_v26  ;;  %v1774_v25 = vpop.f32.mrf.mxu0  ;;  %v1043_v16 = vadd.f32 %v9671_v62, %v9681_v50  ;;  %v1256_v29 = vadd.f32 %v9715_v33, %v9679_v4  ;;  %v1055_v4 = vadd.f32 %v9677_v22, %v9685_v41  ;;  %v11620_v30 = vld [vmem:[#allocation105_spill] sm:$0xff] }
 0x239   : > { %v9719_v20 = vpop.f32.mrf.mxu1 }
 0x23a   : > { %11607 = vst [vmem:[#allocation109_spill] sm:$0xff] %v9719_v20  ;;  %v7694_v19 = vpop.f32.mrf.mxu0  ;;  %v983_v20 = vadd.f32 %v9639_v17, %v9653_v56 }
 0x23b   : > { %v9721_v18 = vpop.f32.mrf.mxu1 }
 0x23c   : > { %11608 = vst [vmem:[#allocation110_spill] sm:$0xff] %v9721_v18  ;;  %v1786_v52 = vpop.f32.mrf.mxu0  ;;  %v1186_v18 = vadd.f32 %v7526_v3, %v9649_v7  ;;  %v1179_v8 = vadd.f32 %v1178_v14, %v983_v20  ;;  %v1415_v20 = vadd.f32 %v7588_v53, %v1214_v51 }
 0x23d   : > { %v7635_v63 = vpop.f32.mrf.mxu1 }
 0x23e   : > { %v7697_v0 = vpop.f32.mrf.mxu0  ;;  %v1604_v39 = vadd.f32 %v7635_v63, %v1367_v58  ;;  %v1383_v56 = vadd.f32 %v7582_v43, %v1186_v18  ;;  %v1375_v31 = vadd.f32 %v9687_v6, %v1179_v8 }
 0x23f   : > { %v1597_v9 = vpop.f32.mrf.mxu1  ;;  %v11609_v42 = vld [vmem:[#allocation108_spill] sm:$0xff] }
 0x240   : > { %v1798_v17 = vpop.f32.mrf.mxu0  ;;  %v1598_v7 = vadd.f32 %v1597_v9, %v1359_v1  ;;  %v1781_v60 = vadd.f32 %v7691_v27, %v1604_v39  ;;  %v1249_v62 = vadd.f32 %v11609_v42, %v1043_v16 }
 0x241   : > { %v7638_v32 = vpop.f32.mrf.mxu1 }
 0x242   : > { %v1616_v26 = vadd.f32 %v7638_v32, %v1383_v56  ;;  %v7700_v24 = vpop.f32.mrf.mxu0  ;;  %v1775_v37 = vadd.f32 %v1774_v25, %v1598_v7 }
 0x243   : > { %v1609_v11 = vpop.f32.mrf.mxu1 }
 0x244   : > { %v1610_v12 = vadd.f32 %v1609_v11, %v1375_v31  ;;  %v1793_v9 = vadd.f32 %v7694_v19, %v1616_v26 }
 0x245   : > { %v7641_v3 = vpop.f32.mrf.mxu1 }
 0x246   : > { %v1628_v21 = vadd.f32 %v7641_v3, %v1399_v46  ;;  %v1787_v27 = vadd.f32 %v1786_v52, %v1610_v12  ;;  %v11613_v12 = vld [vmem:[#allocation89_spill] sm:$0xff] }
 0x247   : > { %v1621_v38 = vpop.f32.mrf.mxu1 }
 0x248   : > { %v1805_v15 = vadd.f32 %v7697_v0, %v1628_v21  ;;  %v1622_v49 = vadd.f32 %v1621_v38, %v1391_v23  ;;  %v1810_v0 = vpop.f32.mrf.mxu0  ;;  %v1242_v38 = vadd.f32 %v9707_v2, %v9673_v36  ;;  %v11611_v2 = vld [vmem:[#allocation93_spill] sm:$0xff] }
 0x249   : > { %v7644_v63 = vpop.f32.mrf.mxu1  ;;  %v1423_v36 = vadd.f32 %v11611_v2, %v1221_v55 }
 0x24a   : > { %v1869_v44 = vadd.f32 %v1805_v15, %v1781_v60  ;;  %v1799_v18 = vadd.f32 %v1798_v17, %v1622_v49  ;;  %v1640_v43 = vadd.f32 %v7644_v63, %v1415_v20  ;;  %v7703_v21 = vpop.f32.mrf.mxu0  ;;  %v1431_v49 = vadd.f32 %v11610_v59, %v1228_v10  ;;  %v11612_v20 = vld [vmem:[#allocation106_spill] sm:$0xff]  ;;  %v11614_v63 = vld [vmem:[#allocation109_spill] sm:$0xff]  ;;  %v11621_v10 = vld [vmem:[#allocation79_spill] sm:$0xff] }
 0x24b   : > { %v1633_v48 = vpop.f32.mrf.mxu1 }
 0x24c   : > { %v1874_v28 = vmul.f32 0.03125, %v1869_v44  ;;  %v1868_v13 = vadd.f32 %v1799_v18, %v1775_v37  ;;  %v1817_v61 = vadd.f32 %v7700_v24, %v1640_v43  ;;  %v1634_v6 = vadd.f32 %v1633_v48, %v1407_v40  ;;  %v1822_v41 = vpop.f32.mrf.mxu0  ;;  %v11615_v43 = vld [vmem:[#allocation97_spill] sm:$0xff] }
 0x24d   : > { %v7647_v23 = vpop.f32.mrf.mxu1  ;;  %v1235_v24 = vadd.f32 %v11612_v20, %v1031_v57  ;;  %v1270_v40 = vadd.f32 %v11614_v63, %v11613_v12 }
 0x24e   : > { %v1890_v53 = vsel %vm1885_vm1, %v1874_v28, 0  ;;  %v1873_v14 = vmul.f32 0.03125, %v1868_v13  ;;  %v1871_v32 = vadd.f32 %v1817_v61, %v1793_v9  ;;  %v1811_v47 = vadd.f32 %v1810_v0, %v1634_v6  ;;  %v11616_v13 = vld [vmem:[#allocation110_spill] sm:$0xff]  ;;  %v7706_v55 = vpop.f32.mrf.mxu0 }
 0x24f   : > { %v9739_v45 = vand.u32 4294901760, %v1890_v53  ;;  %v1645_v25 = vpop.f32.mrf.mxu1  ;;  %v1652_v22 = vadd.f32 %v7647_v23, %v1431_v49  ;;  %v1463_v9 = vadd.f32 %v11615_v43, %v1256_v29  ;;  %v1263_v61 = vadd.f32 %v11616_v13, %v1055_v4  ;;  %v11622_v29 = vld [vmem:[#allocation85_spill] sm:$0xff] }
 0x250   : > { %v1887_v5 = vsel %vm1885_vm1, %v1873_v14, 0  ;;  %v1876_v19 = vmul.f32 0.03125, %v1871_v32  ;;  %v1870_v26 = vadd.f32 %v1811_v47, %v1787_v27  ;;  %v1646_v6 = vadd.f32 %v1645_v25, %v1423_v36  ;;  %v11617_v27 = vld [vmem:[#allocation91_spill] sm:$0xff]  ;;  %v11618_v47 = vld [vmem:[#allocation101_spill] sm:$0xff] }
 0x251   : > { %v9743_v35 = vsub.f32 %v1890_v53, %v9739_v45  ;;  %v9745_v58 = vand.u32 4294901760, %v1887_v5  ;;  %v7650_v52 = vpop.f32.mrf.mxu1  ;;  %v1447_v0 = vadd.f32 %v11617_v27, %v1242_v38  ;;  %v11623_v38 = vld [vmem:[#allocation107_spill] sm:$0xff] }
 0x252   : > { %v1896_v8 = vsel %vm1885_vm1, %v1876_v19, 0  ;;  %v1875_v11 = vmul.f32 0.03125, %v1870_v26  ;;  %v11619_v19 = vld [vmem:[#allocation96_spill] sm:$0xff] }
 0x253   : > { %v9751_v51 = vand.u32 4294901760, %v9743_v35  ;;  %v9754_v39 = vsub.f32 %v1887_v5, %v9745_v58  ;;  %v9756_v1 = vand.u32 4294901760, %v1896_v8  ;;  %v9758_v46 = vpop.f32.mrf.mxu1  ;;  %7741 = vmatprep.mubr.f32.mxu0 %v9745_v58  ;;  %v1455_v5 = vadd.f32 %v11618_v47, %v1249_v62 }
 0x254   : > { %v1893_v54 = vsel %vm1885_vm1, %v1875_v11, 0  ;;  %7742 = vmatmul.mubr.f32.vlgmr.msra.gmra.mxu0 %v9739_v45  ;;  %v1664_v23 = vadd.f32 %v7650_v52, %v1447_v0  ;;  %v1439_v26 = vadd.f32 %v11619_v19, %v1235_v24 }
 0x255   : > { %v9767_v17 = vsub.f32 %v1896_v8, %v9756_v1  ;;  %v9769_v56 = vand.u32 4294901760, %v1893_v54  ;;  %v7653_v3 = vpop.f32.mrf.mxu1  ;;  %v9772_v7 = vand.u32 4294901760, %v9754_v39  ;;  %7792 = vmatpush3.msra.mxu0 %v9619_v34  ;;  %v1989_v31 = vsub.f32 %v9743_v35, %v9751_v51 }
 0x256   : > { %7843 = vmatprep.subr.mxu0 %v9619_v34  ;;  %v1676_v32 = vadd.f32 %v7653_v3, %v1463_v9  ;;  %v1479_v8 = vadd.f32 %v11620_v30, %v1270_v40  ;;  %v1658_v52 = vadd.f32 %v9758_v46, %v1439_v26  ;;  %v1841_v49 = vadd.f32 %v7706_v55, %v1664_v23 }
 0x257   : > { %v9787_v60 = vsub.f32 %v1893_v54, %v9769_v56  ;;  %v1669_v15 = vpop.f32.mrf.mxu1  ;;  %7744 = vmatprep.mubr.f32.mxu0 %v9769_v56  ;;  %v1979_v50 = vsub.f32 %v9754_v39, %v9772_v7  ;;  %v9793_v33 = vand.u32 4294901760, %v9767_v17  ;;  %v1990_v48 = vand.u32 4294901760, %v1989_v31 }
 0x258   : > { %7745 = vmatmul.mubr.f32.gmra.mxu0 %v9756_v1  ;;  %v1829_v54 = vadd.f32 %v7703_v21, %v1652_v22  ;;  %v1670_v57 = vadd.f32 %v1669_v15, %v1455_v5  ;;  %v1823_v31 = vadd.f32 %v1822_v41, %v1646_v6  ;;  %v1834_v15 = vpop.f32.mrf.mxu0 }
 0x259   : > { %v7656_v37 = vpop.f32.mrf.mxu1  ;;  %7747 = vmatprep.mubr.f32.mxu0 %v9745_v58  ;;  %v1980_v44 = vand.u32 4294901760, %v1979_v50  ;;  %v9806_v18 = vand.u32 4294901760, %v9787_v60  ;;  %v2009_v28 = vsub.f32 %v9767_v17, %v9793_v33  ;;  %v1471_v50 = vadd.f32 %v11623_v38, %v1263_v61  ;;  %v11640_v38 = vld [vmem:[#allocation62_spill] sm:$0xff] }
 0x25a   : > { %v1688_v42 = vadd.f32 %v7656_v37, %v1479_v8  ;;  %v1835_v12 = vadd.f32 %v1834_v15, %v1658_v52  ;;  %v11639_v52 = vld [vmem:[#allocation23_spill] sm:$0xff]  ;;  %v11648_v15 = vld [vmem:[#allocation42_spill] sm:$0xff] }
 0x25b   : > { %v1681_v53 = vpop.f32.mrf.mxu1  ;;  %7715 = vmatprep.mubr.f32.mxu1 %v1980_v44  ;;  %v1999_v14 = vsub.f32 %v9787_v60, %v9806_v18  ;;  %v2010_v16 = vand.u32 4294901760, %v2009_v28 }
 0x25c   : > { %7716 = vmatmul.mubr.f32.vlgmr.msra.gmra.mxu1 %v1990_v48  ;;  %7748 = vmatmul.mubr.f32.gmra.mxu0 %v9739_v45  ;;  %v1682_v2 = vadd.f32 %v1681_v53, %v1471_v50  ;;  %v11641_v50 = vld [vmem:[#allocation63_spill] sm:$0xff] }
 0x25d   : > { %v7709_v11 = vpop.f32.mrf.mxu1  ;;  %7750 = vmatprep.mubr.f32.mxu0 %v9769_v56  ;;  %v2000_v25 = vand.u32 4294901760, %v1999_v14  ;;  %7766 = vmatpush3.msra.mxu1 %v11621_v10 }
 0x25e   : > { %v1853_v3 = vadd.f32 %v7709_v11, %v1676_v32  ;;  %7817 = vmatprep.subr.mxu1 %v11622_v29 }
 0x25f   : > { %v1846_v4 = vpop.f32.mrf.mxu1  ;;  %7718 = vmatprep.mubr.f32.mxu1 %v2000_v25 }
 0x260   : > { %v1878_v62 = vadd.f32 %v1853_v3, %v1829_v54  ;;  %v1847_v59 = vadd.f32 %v1846_v4, %v1670_v57  ;;  %7719 = vmatmul.mubr.f32.gmra.mxu1 %v2010_v16  ;;  %7751 = vmatmul.mubr.f32.gmra.mxu0 %v9756_v1  ;;  %v11624_v3 = vld [vmem:[#allocation36_spill] sm:$0xff]  ;;  %v11642_v4 = vld [vmem:[#allocation27_spill] sm:$0xff] }
 0x261   : > { %v7712_v21 = vpop.f32.mrf.mxu1  ;;  %7721 = vmatprep.mubr.f32.mxu1 %v1980_v44 }
 0x262   : > { %v1882_v36 = vmul.f32 0.03125, %v1878_v62  ;;  %v1877_v20 = vadd.f32 %v1847_v59, %v1823_v31  ;;  %v1865_v24 = vadd.f32 %v7712_v21, %v1688_v42  ;;  %v11638_v31 = vld [vmem:[#allocation60_spill] sm:$0xff]  ;;  %v11645_v59 = vld [vmem:[#allocation65_spill] sm:$0xff]  ;;  %v11647_v21 = vld [vmem:[#allocation74_spill] sm:$0xff] }
 0x263   : > { %v1858_v46 = vpop.f32.mrf.mxu1  ;;  %v11643_v42 = vld [vmem:[#allocation64_spill] sm:$0xff] }
 0x264   : > { %v1902_v63 = vsel %vm1885_vm1, %v1882_v36, 0  ;;  %v1881_v40 = vmul.f32 0.03125, %v1877_v20  ;;  %v1880_v41 = vadd.f32 %v1865_v24, %v1841_v49  ;;  %v1859_v37 = vadd.f32 %v1858_v46, %v1682_v2  ;;  %7722 = vmatmul.mubr.f32.gmra.mxu1 %v1990_v48  ;;  %v11644_v62 = vld [vmem:[#allocation40_spill] sm:$0xff]  ;;  %v11646_v49 = vld [vmem:[#allocation41_spill] sm:$0xff]  ;;  %v11650_v36 = vld [vmem:[#allocation47_spill] sm:$0xff] }
 0x265   : > { %v9826_v22 = vand.u32 4294901760, %v1902_v63  ;;  %7724 = vmatprep.mubr.f32.mxu1 %v2000_v25  ;;  %v11649_v2 = vld [vmem:[#allocation76_spill] sm:$0xff]  ;;  %v11651_v20 = vld [vmem:[#allocation77_spill] sm:$0xff]  ;;  %v11652_v24 = vld [vmem:[#allocation51_spill] sm:$0xff] }
 0x266   : > { %v1899_v43 = vsel %vm1885_vm1, %v1881_v40, 0  ;;  %v1884_v9 = vmul.f32 0.03125, %v1880_v41  ;;  %v1879_v44 = vadd.f32 %v1859_v37, %v1835_v12  ;;  %v11653_v12 = vld [vmem:[#allocation66_spill] sm:$0xff]  ;;  %v11654_v46 = vld [vmem:[#allocation68_spill] sm:$0xff] }
 0x267   : > { %v9830_v28 = vsub.f32 %v1902_v63, %v9826_v22  ;;  %v9832_v13 = vand.u32 4294901760, %v1899_v43  ;;  %v11655_v63 = vld [vmem:[#allocation71_spill] sm:$0xff]  ;;  %v11656_v40 = vld [vmem:[#allocation20_spill] sm:$0xff] }
 0x268   : > { %v1908_v61 = vsel %vm1885_vm1, %v1884_v9, 0  ;;  %v1883_v6 = vmul.f32 0.03125, %v1879_v44  ;;  %7725 = vmatmul.mubr.f32.gmra.mxu1 %v2010_v16  ;;  %v11625_v16 = vld [vmem:[#allocation14_spill] sm:$0xff] }
 0x269   : > { %v9836_v27 = vsub.f32 %v1899_v43, %v9832_v13  ;;  %v9838_v48 = vand.u32 4294901760, %v1908_v61  ;;  %7753 = vmatprep.mubr.f32.mxu0 %v9832_v13  ;;  %v2068_v0 = vand.u32 4294901760, %v9830_v28 }
 0x26a   : > { %v1905_v53 = vsel %vm1885_vm1, %v1883_v6, 0  ;;  %7754 = vmatmul.mubr.f32.gmra.mxu0 %v9826_v22 }
 0x26b   : > { %v9845_v14 = vsub.f32 %v1908_v61, %v9838_v48  ;;  %v9847_v32 = vand.u32 4294901760, %v1905_v53  ;;  %v2058_v47 = vand.u32 4294901760, %v9836_v27  ;;  %v2069_v5 = vsub.f32 %v9830_v28, %v2068_v0 }
 0x26d   : > { %v2077_v23 = vsub.f32 %v1905_v53, %v9847_v32  ;;  %7756 = vmatprep.mubr.f32.mxu0 %v9847_v32  ;;  %v2059_v19 = vsub.f32 %v9836_v27, %v2058_v47  ;;  %v2088_v26 = vand.u32 4294901760, %v9845_v14  ;;  %v2070_v11 = vand.u32 4294901760, %v2069_v5 }
 0x26e   : > { %7757 = vmatmul.mubr.f32.gmra.mxu0 %v9838_v48 }
 0x26f   : > { %7759 = vmatprep.mubr.f32.mxu0 %v9832_v13  ;;  %v2060_v30 = vand.u32 4294901760, %v2059_v19  ;;  %v2078_v8 = vand.u32 4294901760, %v2077_v23  ;;  %v2089_v25 = vsub.f32 %v9845_v14, %v2088_v26 }
 0x271   : > { %7727 = vmatprep.mubr.f32.mxu1 %v2060_v30  ;;  %v2079_v55 = vsub.f32 %v2077_v23, %v2078_v8  ;;  %v2090_v57 = vand.u32 4294901760, %v2089_v25 }
 0x272   : > { %7728 = vmatmul.mubr.f32.gmra.mxu1 %v2070_v11  ;;  %7760 = vmatmul.mubr.f32.gmra.mxu0 %v9826_v22 }
 0x273   : > { %7762 = vmatprep.mubr.f32.mxu0 %v9847_v32  ;;  %v2080_v54 = vand.u32 4294901760, %v2079_v55 }
 0x275   : > { %7730 = vmatprep.mubr.f32.mxu1 %v2080_v54 }
 0x276   : > { %7731 = vmatmul.mubr.f32.gmra.mxu1 %v2090_v57  ;;  %7763 = vmatmul.mubr.f32.gmra.mxu0 %v9838_v48 }
 0x277   : > { %7733 = vmatprep.mubr.f32.mxu1 %v2060_v30  ;;  %7793 = vmatprep.mubr.f32.mxu0 %v9772_v7 }
 0x27a   : > { %7734 = vmatmul.mubr.f32.gmra.mxu1 %v2070_v11  ;;  %7794 = vmatmul.mubr.f32.vlgmr.msra.gmra.mxu0 %v9751_v51 }
 0x27b   : > { %7736 = vmatprep.mubr.f32.mxu1 %v2080_v54  ;;  %7796 = vmatprep.mubr.f32.mxu0 %v9806_v18 }
 0x27c   : > { %7844 = vmatpush3.msra.mxu0 %v9619_v34 }
 0x27d   : > { %7925 = vmatprep.subr.mxu0 %v11624_v3 }
 0x27e   : > { %7737 = vmatmul.mubr.f32.gmra.mxu1 %v2090_v57  ;;  %7797 = vmatmul.mubr.f32.gmra.mxu0 %v9793_v33 }
 0x27f   : > { %7767 = vmatprep.mubr.f32.mxu1 %v9754_v39  ;;  %7799 = vmatprep.mubr.f32.mxu0 %v9772_v7  ;;  %v11630_v7 = vld [vmem:[#allocation48_spill] sm:$0xff] }
 0x282   : > { %7768 = vmatmul.mubr.f32.vlgmr.msra.gmra.mxu1 %v9743_v35  ;;  %7800 = vmatmul.mubr.f32.gmra.mxu0 %v9751_v51  ;;  %v11627_v51 = vld [vmem:[#allocation39_spill] sm:$0xff] }
 0x283   : > { %7818 = vmatpush3.msra.mxu1 %v11622_v29  ;;  %7770 = vmatprep.mubr.f32.mxu1 %v9787_v60 }
 0x284   : > { %7802 = vmatprep.mubr.f32.mxu0 %v9806_v18  ;;  %7869 = vmatprep.subr.mxu1 %v11625_v16  ;;  %v11637_v18 = vld [vmem:[#allocation19_spill] sm:$0xff] }
 0x286   : > { %7771 = vmatmul.mubr.f32.gmra.mxu1 %v9767_v17  ;;  %7803 = vmatmul.mubr.f32.gmra.mxu0 %v9793_v33  ;;  %v11633_v33 = vld [vmem:[#allocation17_spill] sm:$0xff] }
 0x287   : > { %7773 = vmatprep.mubr.f32.mxu1 %v9754_v39  ;;  %7805 = vmatprep.mubr.f32.mxu0 %v2058_v47  ;;  %v11628_v39 = vld [vmem:[#allocation44_spill] sm:$0xff] }
 0x28a   : > { %7774 = vmatmul.mubr.f32.gmra.mxu1 %v9743_v35  ;;  %7806 = vmatmul.mubr.f32.gmra.mxu0 %v2068_v0  ;;  %v11626_v35 = vld [vmem:[#allocation37_spill] sm:$0xff] }
 0x28b   : > { %7776 = vmatprep.mubr.f32.mxu1 %v9787_v60  ;;  %7808 = vmatprep.mubr.f32.mxu0 %v2078_v8  ;;  %v11631_v60 = vld [vmem:[#allocation16_spill] sm:$0xff] }
 0x28e   : > { %7777 = vmatmul.mubr.f32.gmra.mxu1 %v9767_v17  ;;  %7809 = vmatmul.mubr.f32.gmra.mxu0 %v2088_v26  ;;  %v11629_v17 = vld [vmem:[#allocation15_spill] sm:$0xff] }
 0x28f   : > { %7779 = vmatprep.mubr.f32.mxu1 %v9836_v27  ;;  %7811 = vmatprep.mubr.f32.mxu0 %v2058_v47 }
 0x292   : > { %7780 = vmatmul.mubr.f32.gmra.mxu1 %v9830_v28  ;;  %7812 = vmatmul.mubr.f32.gmra.mxu0 %v2068_v0 }
 0x293   : > { %7782 = vmatprep.mubr.f32.mxu1 %v2077_v23  ;;  %7814 = vmatprep.mubr.f32.mxu0 %v2078_v8 }
 0x296   : > { %7783 = vmatmul.mubr.f32.gmra.mxu1 %v9845_v14  ;;  %7815 = vmatmul.mubr.f32.gmra.mxu0 %v2088_v26 }
 0x297   : > { %7785 = vmatprep.mubr.f32.mxu1 %v9836_v27  ;;  %7845 = vmatprep.mubr.f32.mxu0 %v9745_v58 }
 0x29a   : > { %7786 = vmatmul.mubr.f32.gmra.mxu1 %v9830_v28  ;;  %7846 = vmatmul.mubr.f32.vlgmr.msra.gmra.mxu0 %v9739_v45 }
 0x29b   : > { %7788 = vmatprep.mubr.f32.mxu1 %v2077_v23  ;;  %7848 = vmatprep.mubr.f32.mxu0 %v9769_v56 }
 0x29c   : > { %7926 = vmatpush3.msra.mxu0 %v11624_v3 }
 0x29d   : > { %7927 = vmatprep.subr.mxu0 %v11626_v35 }
 0x29e   : > { %7789 = vmatmul.mubr.f32.gmra.mxu1 %v9845_v14  ;;  %7849 = vmatmul.mubr.f32.gmra.mxu0 %v9756_v1 }
 0x29f   : > { %7819 = vmatprep.mubr.f32.mxu1 %v9745_v58  ;;  %7851 = vmatprep.mubr.f32.mxu0 %v9745_v58 }
 0x2a0   : > { %7928 = vmatpush3.msra.mxu0 %v11626_v35 }
 0x2a1   : > { %7929 = vmatprep.subr.mxu0 %v11627_v51 }
 0x2a2   : > { %7820 = vmatmul.mubr.f32.vlgmr.msra.gmra.mxu1 %v9739_v45  ;;  %7852 = vmatmul.mubr.f32.gmra.mxu0 %v9739_v45 }
 0x2a3   : > { %7822 = vmatprep.mubr.f32.mxu1 %v9769_v56  ;;  %7854 = vmatprep.mubr.f32.mxu0 %v9769_v56 }
 0x2a4   : > { %7930 = vmatpush3.msra.mxu0 %v11627_v51  ;;  %7870 = vmatpush3.msra.mxu1 %v11625_v16 }
 0x2a5   : > { %7931 = vmatprep.subr.mxu0 %v11628_v39  ;;  %7871 = vmatprep.subr.mxu1 %v11629_v17 }
 0x2a6   : > { %7823 = vmatmul.mubr.f32.gmra.mxu1 %v9756_v1  ;;  %7855 = vmatmul.mubr.f32.gmra.mxu0 %v9756_v1 }
 0x2a7   : > { %7825 = vmatprep.mubr.f32.mxu1 %v9745_v58  ;;  %7857 = vmatprep.mubr.f32.mxu0 %v9832_v13  ;;  %v11632_v58 = vld [vmem:[#allocation52_spill] sm:$0xff] }
 0x2a8   : > { %7932 = vmatpush3.msra.mxu0 %v11628_v39  ;;  %7872 = vmatpush3.msra.mxu1 %v11629_v17 }
 0x2a9   : > { %7933 = vmatprep.subr.mxu0 %v11630_v7  ;;  %7873 = vmatprep.subr.mxu1 %v11631_v60 }
 0x2aa   : > { %7826 = vmatmul.mubr.f32.gmra.mxu1 %v9739_v45  ;;  %7858 = vmatmul.mubr.f32.gmra.mxu0 %v9826_v22  ;;  %v11634_v45 = vld [vmem:[#allocation55_spill] sm:$0xff] }
 0x2ab   : > { %7828 = vmatprep.mubr.f32.mxu1 %v9769_v56  ;;  %7860 = vmatprep.mubr.f32.mxu0 %v9847_v32  ;;  %v11635_v56 = vld [vmem:[#allocation18_spill] sm:$0xff] }
 0x2ac   : > { %7934 = vmatpush3.msra.mxu0 %v11630_v7  ;;  %7874 = vmatpush3.msra.mxu1 %v11631_v60 }
 0x2ad   : > { %7935 = vmatprep.subr.mxu0 %v11632_v58  ;;  %7875 = vmatprep.subr.mxu1 %v11633_v33 }
 0x2ae   : > { %7829 = vmatmul.mubr.f32.gmra.mxu1 %v9756_v1  ;;  %7861 = vmatmul.mubr.f32.gmra.mxu0 %v9838_v48  ;;  %v11636_v1 = vld [vmem:[#allocation58_spill] sm:$0xff] }
 0x2af   : > { %7831 = vmatprep.mubr.f32.mxu1 %v9832_v13  ;;  %7863 = vmatprep.mubr.f32.mxu0 %v9832_v13 }
 0x2b0   : > { %7936 = vmatpush3.msra.mxu0 %v11632_v58  ;;  %7876 = vmatpush3.msra.mxu1 %v11633_v33 }
 0x2b1   : > { %7937 = vmatprep.subr.mxu0 %v11634_v45  ;;  %7877 = vmatprep.subr.mxu1 %v11635_v56 }
 0x2b2   : > { %7832 = vmatmul.mubr.f32.gmra.mxu1 %v9826_v22  ;;  %7864 = vmatmul.mubr.f32.gmra.mxu0 %v9826_v22 }
 0x2b3   : > { %7834 = vmatprep.mubr.f32.mxu1 %v9847_v32  ;;  %7866 = vmatprep.mubr.f32.mxu0 %v9847_v32 }
 0x2b4   : > { %7938 = vmatpush3.msra.mxu0 %v11634_v45  ;;  %7878 = vmatpush3.msra.mxu1 %v11635_v56 }
 0x2b5   : > { %7939 = vmatprep.subr.mxu0 %v11636_v1  ;;  %7879 = vmatprep.subr.mxu1 %v11637_v18 }
 0x2b6   : > { %7835 = vmatmul.mubr.f32.gmra.mxu1 %v9838_v48  ;;  %7867 = vmatmul.mubr.f32.gmra.mxu0 %v9838_v48 }
 0x2b7   : > { %7837 = vmatprep.mubr.f32.mxu1 %v9832_v13  ;;  %7940 = vmatpush3.msra.mxu0 %v11636_v1 }
 0x2b8   : > { %7941 = vmatprep.subr.mxu0 %v11638_v31  ;;  %7880 = vmatpush3.msra.mxu1 %v11637_v18 }
 0x2b9   : > { %7942 = vmatpush3.msra.mxu0 %v11638_v31  ;;  %7881 = vmatprep.subr.mxu1 %v11639_v52 }
 0x2ba   : > { %7838 = vmatmul.mubr.f32.gmra.mxu1 %v9826_v22  ;;  %7943 = vmatprep.subr.mxu0 %v11640_v38 }
 0x2bb   : > { %7840 = vmatprep.mubr.f32.mxu1 %v9847_v32  ;;  %7944 = vmatpush3.msra.mxu0 %v11640_v38 }
 0x2bc   : > { %7882 = vmatpush3.msra.mxu1 %v11639_v52  ;;  %7945 = vmatprep.subr.mxu0 %v11641_v50 }
 0x2bd   : > { %7883 = vmatprep.subr.mxu1 %v11642_v4  ;;  %7946 = vmatpush3.msra.mxu0 %v11641_v50 }
 0x2be   : > { %7841 = vmatmul.mubr.f32.gmra.mxu1 %v9838_v48  ;;  %7947 = vmatprep.subr.mxu0 %v11643_v42 }
 0x2bf   : > { %7884 = vmatpush3.msra.mxu1 %v11642_v4  ;;  %7948 = vmatpush3.msra.mxu0 %v11643_v42 }
 0x2c0   : > { %7885 = vmatprep.subr.mxu1 %v11644_v62  ;;  %7949 = vmatprep.subr.mxu0 %v11645_v59 }
 0x2c1   : > { %7886 = vmatpush3.msra.mxu1 %v11644_v62  ;;  %7950 = vmatpush3.msra.mxu0 %v11645_v59 }
 0x2c2   : > { %7887 = vmatprep.subr.mxu1 %v11646_v49  ;;  %7951 = vmatprep.subr.mxu0 %v11647_v21 }
 0x2c3   : > { %7888 = vmatpush3.msra.mxu1 %v11646_v49  ;;  %7952 = vmatpush3.msra.mxu0 %v11647_v21 }
 0x2c4   : > { %7889 = vmatprep.subr.mxu1 %v11648_v15  ;;  %7953 = vmatprep.subr.mxu0 %v11649_v2 }
 0x2c5   : > { %7890 = vmatpush3.msra.mxu1 %v11648_v15  ;;  %7954 = vmatpush3.msra.mxu0 %v11649_v2 }
 0x2c6   : > { %7891 = vmatprep.subr.mxu1 %v11650_v36  ;;  %7955 = vmatprep.subr.mxu0 %v11651_v20 }
 0x2c7   : > { %7892 = vmatpush3.msra.mxu1 %v11650_v36  ;;  %7956 = vmatpush3.msra.mxu0 %v11651_v20 }
 0x2c8   : > { %7893 = vmatprep.subr.mxu1 %v11652_v24  ;;  %8037 = vmatprep.subr.mxu0 %v11625_v16 }
 0x2c9   : > { %7894 = vmatpush3.msra.mxu1 %v11652_v24 }
 0x2ca   : > { %7895 = vmatprep.subr.mxu1 %v11653_v12 }
 0x2cb   : > { %7896 = vmatpush3.msra.mxu1 %v11653_v12 }
 0x2cc   : > { %7897 = vmatprep.subr.mxu1 %v11654_v46 }
 0x2cd   : > { %7898 = vmatpush3.msra.mxu1 %v11654_v46 }
 0x2ce   : > { %7899 = vmatprep.subr.mxu1 %v11655_v63 }
 0x2cf   : > { %7900 = vmatpush3.msra.mxu1 %v11655_v63 }
 0x2d0   : > { %7981 = vmatprep.subr.mxu1 %v11656_v40 }
 0x314   : > { %v9983_v41 = vpop.f32.mrf.mxu0 }
 0x316   : > { %v9985_v37 = vpop.f32.mrf.mxu0 }
 0x318   : > { %v9987_v22 = vpop.f32.mrf.mxu0 }
 0x31a   : > { %v9989_v43 = vpop.f32.mrf.mxu0 }
 0x31c   : > { %v7717_v9 = vpop.f32.mrf.mxu1  ;;  %v9991_v44 = vpop.f32.mrf.mxu0 }
 0x31d   : > { %v2215_v56 = vadd.f32 %v9983_v41, %v7717_v9 }
 0x31e   : > { %v9993_v28 = vpop.f32.mrf.mxu1  ;;  %v9995_v13 = vpop.f32.mrf.mxu0 }
 0x31f   : > { %v2209_v60 = vadd.f32 %v9985_v37, %v9993_v28 }
 0x320   : > { %v9997_v61 = vpop.f32.mrf.mxu1  ;;  %v10001_v27 = vpop.f32.mrf.mxu0 }
 0x322   : > { %v9999_v6 = vpop.f32.mrf.mxu1  ;;  %v10005_v0 = vpop.f32.mrf.mxu0 }
 0x324   : > { %v10003_v48 = vpop.f32.mrf.mxu1 }
 0x325   : > { %v2239_v9 = vadd.f32 %v9991_v44, %v10003_v48 }
 0x326   : > { %v10007_v53 = vpop.f32.mrf.mxu1 }
 0x328   : > { %v10009_v32 = vpop.f32.mrf.mxu1 }
 0x329   : > { %v2251_v37 = vadd.f32 %v10001_v27, %v10009_v32 }
 0x32a   : > { %v7755_v14 = vpop.f32.mrf.mxu0  ;;  %v10013_v23 = vpop.f32.mrf.mxu1 }
 0x32c   : > { %v10011_v47 = vpop.f32.mrf.mxu0 }
 0x32e   : > { %v7758_v5 = vpop.f32.mrf.mxu0 }
 0x330   : > { %v10015_v19 = vpop.f32.mrf.mxu0 }
 0x332   : > { %v7729_v26 = vpop.f32.mrf.mxu1  ;;  %v7761_v30 = vpop.f32.mrf.mxu0 }
 0x333   : > { %v10017_v8 = vadd.f32 %v7755_v14, %v7729_v26 }
 0x334   : > { %v10019_v11 = vpop.f32.mrf.mxu1  ;;  %v10021_v25 = vpop.f32.mrf.mxu0 }
 0x336   : > { %v7732_v55 = vpop.f32.mrf.mxu1  ;;  %v7764_v54 = vpop.f32.mrf.mxu0 }
 0x337   : > { %v10023_v57 = vadd.f32 %v7758_v5, %v7732_v55 }
 0x338   : > { %v10025_v3 = vpop.f32.mrf.mxu1  ;;  %v10027_v35 = vpop.f32.mrf.mxu0 }
 0x33a   : > { %v7735_v51 = vpop.f32.mrf.mxu1  ;;  %v7795_v39 = vpop.f32.mrf.mxu0 }
 0x33b   : > { %v10029_v7 = vadd.f32 %v7761_v30, %v7735_v51 }
 0x33c   : > { %v2102_v58 = vpop.f32.mrf.mxu1  ;;  %v2551_v45 = vpop.f32.mrf.mxu0 }
 0x33e   : > { %v7738_v1 = vpop.f32.mrf.mxu1  ;;  %v10031_v31 = vpop.f32.mrf.mxu0 }
 0x33f   : > { %v10033_v38 = vadd.f32 %v7764_v54, %v7738_v1 }
 0x340   : > { %v2122_v50 = vpop.f32.mrf.mxu1  ;;  %v10035_v42 = vpop.f32.mrf.mxu0 }
 0x341   : > { %11657 = vst [vmem:[#allocation108_spill] sm:$0xff] %v10033_v38 }
 0x342   : > { %v7769_v59 = vpop.f32.mrf.mxu1  ;;  %v10037_v21 = vpop.f32.mrf.mxu0 }
 0x343   : > { %v2380_v17 = vadd.f32 %v7769_v59, %v2215_v56  ;;  %v2233_v56 = vadd.f32 %v9995_v13, %v10007_v53 }
 0x344   : > { %v2372_v2 = vpop.f32.mrf.mxu1  ;;  %v10039_v20 = vpop.f32.mrf.mxu0 }
 0x346   : > { %v7772_v14 = vpop.f32.mrf.mxu1  ;;  %v10041_v5 = vpop.f32.mrf.mxu0 }
 0x348   : > { %v2386_v26 = vpop.f32.mrf.mxu1  ;;  %v10043_v30 = vpop.f32.mrf.mxu0 }
 0x34a   : > { %v7775_v55 = vpop.f32.mrf.mxu1  ;;  %v10045_v51 = vpop.f32.mrf.mxu0 }
 0x34c   : > { %v2400_v54 = vpop.f32.mrf.mxu1  ;;  %v10047_v1 = vpop.f32.mrf.mxu0 }
 0x34d   : > { %v2401_v13 = vadd.f32 %v2400_v54, %v2233_v56 }
 0x34e   : > { %v7778_v29 = vpop.f32.mrf.mxu1  ;;  %v10049_v10 = vpop.f32.mrf.mxu0 }
 0x34f   : > { %11658 = vst [vmem:[#allocation87_spill] sm:$0xff] %v10049_v10  ;;  %v2560_v10 = vadd.f32 %v7795_v39, %v2380_v17  ;;  %v2269_v17 = vadd.f32 %v10015_v19, %v10025_v3  ;;  %v2422_v48 = vadd.f32 %v7778_v29, %v2251_v37 }
 0x350   : > { %v2414_v34 = vpop.f32.mrf.mxu1  ;;  %v10051_v63 = vpop.f32.mrf.mxu0 }
 0x351   : > { %11659 = vst [vmem:[#allocation93_spill] sm:$0xff] %v10051_v63 }
 0x352   : > { %v7781_v46 = vpop.f32.mrf.mxu1  ;;  %v10053_v12 = vpop.f32.mrf.mxu0 }
 0x353   : > { %11660 = vst [vmem:[#allocation106_spill] sm:$0xff] %v10053_v12  ;;  %v2373_v12 = vadd.f32 %v2372_v2, %v2209_v60  ;;  %v2245_v60 = vadd.f32 %v10005_v0, %v10013_v23  ;;  %v10088_v0 = vadd.f32 %v10027_v35, %v2122_v50 }
 0x354   : > { %v2428_v24 = vpop.f32.mrf.mxu1  ;;  %v10055_v36 = vpop.f32.mrf.mxu0 }
 0x355   : > { %11661 = vst [vmem:[#allocation89_spill] sm:$0xff] %v10055_v36  ;;  %v2552_v44 = vadd.f32 %v2551_v45, %v2373_v12 }
 0x356   : > { %v7784_v15 = vpop.f32.mrf.mxu1  ;;  %v10057_v49 = vpop.f32.mrf.mxu0  ;;  %v11670_v56 = vld [vmem:[#allocation87_spill] sm:$0xff] }
 0x357   : > { %11662 = vst [vmem:[#allocation109_spill] sm:$0xff] %v10057_v49  ;;  %v2227_v49 = vadd.f32 %v9987_v22, %v9997_v61  ;;  %v2257_v61 = vadd.f32 %v10011_v47, %v10019_v11  ;;  %v2415_v47 = vadd.f32 %v2414_v34, %v2245_v60  ;;  %v2584_v34 = vadd.f32 %v10039_v20, %v2401_v13 }
 0x358   : > { %v2442_v62 = vpop.f32.mrf.mxu1  ;;  %v10059_v4 = vpop.f32.mrf.mxu0  ;;  %v11671_v37 = vld [vmem:[#allocation93_spill] sm:$0xff] }
 0x359   : > { %11663 = vst [vmem:[#allocation97_spill] sm:$0xff] %v10059_v4  ;;  %v2221_v4 = vadd.f32 %v9989_v43, %v9999_v6  ;;  %v2394_v63 = vadd.f32 %v7772_v14, %v2227_v49  ;;  %v2408_v6 = vadd.f32 %v7775_v55, %v2239_v9  ;;  %v2281_v49 = vadd.f32 %v10021_v25, %v2102_v58  ;;  %v11664_v25 = vld [vmem:[#allocation78_spill] sm:$0xff] }
 0x35a   : > { %v7787_v52 = vpop.f32.mrf.mxu1  ;;  %v7847_v18 = vpop.f32.mrf.mxu0  ;;  %v2429_v12 = vadd.f32 %v2428_v24, %v2257_v61  ;;  %v2443_v45 = vadd.f32 %v2442_v62, %v2269_v17  ;;  %v2608_v24 = vadd.f32 %v10041_v5, %v2422_v48  ;;  %v2600_v62 = vadd.f32 %v10043_v30, %v2415_v47  ;;  %v11674_v61 = vld [vmem:[#allocation108_spill] sm:$0xff]  ;;  %v11675_v17 = vld [vmem:[#allocation106_spill] sm:$0xff] }
 0x35b   : > { %v2387_v22 = vadd.f32 %v2386_v26, %v2221_v4  ;;  %v2576_v23 = vadd.f32 %v10031_v31, %v2394_v63  ;;  %v2592_v35 = vadd.f32 %v10037_v21, %v2408_v6  ;;  %v2464_v2 = vadd.f32 %v7787_v52, %v10029_v7  ;;  %v11668_v26 = vld [vmem:[#allocation82_spill] sm:$0xff] }
 0x35c   : > { %v10062_v40 = vpop.f32.mrf.mxu1  ;;  %v2907_v33 = vpop.f32.mrf.mxu0 }
 0x35d   : > { %v2568_v19 = vadd.f32 %v10035_v42, %v2387_v22  ;;  %v2457_v54 = vadd.f32 %v10062_v40, %v2281_v49  ;;  %v11672_v22 = vld [vmem:[#allocation84_spill] sm:$0xff]  ;;  %v10136_v49 = vadd.f32 %v11675_v17, %v2464_v2 }
 0x35e   : > { %v10066_v16 = vpop.f32.mrf.mxu1  ;;  %v7850_v36 = vpop.f32.mrf.mxu0 }
 0x35f   : > { %v10131_v40 = vadd.f32 %v10066_v16, %v11674_v61 }
 0x360   : > { %v10072_v38 = vpop.f32.mrf.mxu1  ;;  %v2919_v41 = vpop.f32.mrf.mxu0 }
 0x362   : > { %v7821_v28 = vpop.f32.mrf.mxu1  ;;  %v7853_v43 = vpop.f32.mrf.mxu0 }
 0x363   : > { %v2752_v59 = vadd.f32 %v7821_v28, %v2560_v10  ;;  %v2436_v10 = vadd.f32 %v7781_v46, %v10017_v8  ;;  %v11666_v8 = vld [vmem:[#allocation80_spill] sm:$0xff] }
 0x364   : > { %v2745_v27 = vpop.f32.mrf.mxu1  ;;  %v2931_v53 = vpop.f32.mrf.mxu0 }
 0x365   : > { %v2914_v4 = vadd.f32 %v7847_v18, %v2752_v59  ;;  %v2746_v32 = vadd.f32 %v2745_v27, %v2552_v44  ;;  %v2450_v18 = vadd.f32 %v7784_v15, %v10023_v57  ;;  %v2624_v15 = vadd.f32 %v10045_v51, %v2436_v10 }
 0x366   : > { %v7824_v11 = vpop.f32.mrf.mxu1  ;;  %v7856_v39 = vpop.f32.mrf.mxu0  ;;  %v2616_v57 = vadd.f32 %v10047_v1, %v2429_v12  ;;  %v10119_v51 = vadd.f32 %v11671_v37, %v2443_v45  ;;  %v11678_v12 = vld [vmem:[#allocation89_spill] sm:$0xff] }
 0x367   : > { %v10094_v3 = vsub.f32 %v11664_v25, %v2914_v4  ;;  %v2908_v29 = vadd.f32 %v2907_v33, %v2746_v32  ;;  %v2764_v58 = vadd.f32 %v7824_v11, %v2576_v23  ;;  %v2640_v30 = vadd.f32 %v11670_v56, %v2450_v18  ;;  %v11676_v23 = vld [vmem:[#allocation86_spill] sm:$0xff] }
 0x368   : > { %v2757_v50 = vpop.f32.mrf.mxu1  ;;  %v2943_v63 = vpop.f32.mrf.mxu0  ;;  %v10151_v11 = vadd.f32 %v11678_v12, %v2457_v54  ;;  %v11681_v18 = vld [vmem:[#allocation14_spill] sm:$0xff] }
 0x369   : > { %11665 = vst [vmem:[#allocation110_spill] sm:$0xff] %v10094_v3  ;;  %v3018_v46 = vmul.f32 %v10094_v3, %v10094_v3  ;;  %v10103_v31 = vsub.f32 %v11666_v8, %v2908_v29  ;;  %v2926_v42 = vadd.f32 %v7850_v36, %v2764_v58  ;;  %v2758_v33 = vadd.f32 %v2757_v50, %v2568_v19  ;;  %v11679_v19 = vld [vmem:[#allocation88_spill] sm:$0xff] }
 0x36a   : > { %v7827_v21 = vpop.f32.mrf.mxu1  ;;  %v7859_v14 = vpop.f32.mrf.mxu0 }
 0x36b   : > { %11667 = vst [vmem:[#allocation91_spill] sm:$0xff] %v10103_v31  ;;  %v10109_v20 = vand.u32 4294901760, %v3018_v46  ;;  %v3017_v5 = vmul.f32 %v10103_v31, %v10103_v31  ;;  %v10114_v55 = vsub.f32 %v11668_v26, %v2926_v42  ;;  %v2920_v36 = vadd.f32 %v2919_v41, %v2758_v33  ;;  %v11684_v33 = vld [vmem:[#allocation15_spill] sm:$0xff] }
 0x36c   : > { %v2776_v52 = vadd.f32 %v7827_v21, %v2592_v35  ;;  %v2769_v7 = vpop.f32.mrf.mxu1  ;;  %v2955_v9 = vpop.f32.mrf.mxu0  ;;  %v10161_v35 = vadd.f32 %v10072_v38, %v10088_v0 }
 0x36d   : > { %11669 = vst [vmem:[#allocation101_spill] sm:$0xff] %v10114_v55  ;;  %v10122_v1 = vsub.f32 %v3018_v46, %v10109_v20  ;;  %v3020_v60 = vmul.f32 %v10114_v55, %v10114_v55  ;;  %v10127_v28 = vsub.f32 %v11672_v22, %v2920_v36  ;;  %v2770_v41 = vadd.f32 %v2769_v7, %v2584_v34  ;;  %v11682_v46 = vld [vmem:[#allocation90_spill] sm:$0xff]  ;;  %v11687_v7 = vld [vmem:[#allocation16_spill] sm:$0xff]  ;;  %v11735_v55 = vld [vmem:[#allocation57_spill] sm:$0xff] }
 0x36e   : > { %v2938_v6 = vadd.f32 %v7853_v43, %v2776_v52  ;;  %v7830_v59 = vpop.f32.mrf.mxu1  ;;  %v10133_v44 = vand.u32 4294901760, %v3017_v5  ;;  %v7862_v32 = vpop.f32.mrf.mxu0 }
 0x36f   : > { %11673 = vst [vmem:[#allocation96_spill] sm:$0xff] %v10127_v28  ;;  %v11429_v13 = vand.u32 4294901760, %v10122_v1  ;;  %v3019_v48 = vmul.f32 %v10127_v28, %v10127_v28  ;;  %v2932_v27 = vadd.f32 %v2931_v53, %v2770_v41  ;;  %v2788_v4 = vadd.f32 %v7830_v59, %v2608_v24 }
 0x370   : > { %v10142_v47 = vsub.f32 %v11676_v23, %v2938_v6  ;;  %7957 = vmatprep.mubr.f32.mxu0 %v10133_v44  ;;  %v2781_v16 = vpop.f32.mrf.mxu1  ;;  %v10145_v43 = vand.u32 4294901760, %v3020_v60  ;;  %v10148_v10 = vsub.f32 %v3017_v5, %v10133_v44  ;;  %v2967_v0 = vpop.f32.mrf.mxu0  ;;  %v11688_v6 = vld [vmem:[#allocation94_spill] sm:$0xff]  ;;  %v11736_v28 = vand.u32 4294901760, %v10122_v1 }
 0x371   : > { %v10154_v25 = vsub.f32 %v11679_v19, %v2932_v27  ;;  %v2950_v53 = vadd.f32 %v7856_v39, %v2788_v4  ;;  %v2782_v29 = vadd.f32 %v2781_v16, %v2600_v62  ;;  %7958 = vmatmul.mubr.f32.vlgmr.msra.gmra.mxu0 %v10109_v20  ;;  %v10157_v58 = vand.u32 4294901760, %v3019_v48 }
 0x372   : > { %11677 = vst [vmem:[#allocation105_spill] sm:$0xff] %v10142_v47  ;;  %8038 = vmatpush3.msra.mxu0 %v11681_v18  ;;  %v7833_v45 = vpop.f32.mrf.mxu1  ;;  %v11432_v50 = vand.u32 4294901760, %v10148_v10  ;;  %v3127_v34 = vsub.f32 %v10122_v1, %v11429_v13  ;;  %v10169_v39 = vsub.f32 %v3020_v60, %v10145_v43  ;;  %v3022_v2 = vmul.f32 %v10142_v47, %v10142_v47 }
 0x373   : > { %11680 = vst [vmem:[#allocation107_spill] sm:$0xff] %v10154_v25  ;;  %v3021_v24 = vmul.f32 %v10154_v25, %v10154_v25  ;;  %v10174_v8 = vsub.f32 %v11682_v46, %v2950_v53  ;;  %v2944_v38 = vadd.f32 %v2943_v63, %v2782_v29  ;;  %v2800_v42 = vadd.f32 %v7833_v45, %v2624_v15  ;;  %v11685_v15 = vld [vmem:[#allocation92_spill] sm:$0xff] }
 0x374   : > { %8039 = vmatprep.subr.mxu0 %v11684_v33  ;;  %7960 = vmatprep.mubr.f32.mxu0 %v10157_v58  ;;  %v2793_v21 = vpop.f32.mrf.mxu1  ;;  %v3117_v62 = vsub.f32 %v10148_v10, %v11432_v50  ;;  %v3128_v5 = vand.u32 4294901760, %v3127_v34  ;;  %v10185_v26 = vsub.f32 %v3019_v48, %v10157_v58  ;;  %v11426_v41 = vand.u32 4294901760, %v10169_v39  ;;  %v11690_v48 = vld [vmem:[#allocation17_spill] sm:$0xff] }
 0x375   : > { %11683 = vst [vmem:[#allocation36_spill] sm:$0xff] %v10174_v8  ;;  %8040 = vmatpush3.msra.mxu0 %v11684_v33  ;;  %v10189_v63 = vmul.f32 %v10174_v8, %v10174_v8  ;;  %v10192_v36 = vsub.f32 %v11685_v15, %v2944_v38  ;;  %v2962_v54 = vadd.f32 %v7859_v14, %v2800_v42  ;;  %v10196_v60 = vand.u32 4294901760, %v3021_v24  ;;  %v7865_v14 = vpop.f32.mrf.mxu0 }
 0x376   : > { %v2794_v52 = vadd.f32 %v2793_v21, %v2616_v57  ;;  %7961 = vmatmul.mubr.f32.gmra.mxu0 %v10145_v43  ;;  %8041 = vmatprep.subr.mxu0 %v11687_v7  ;;  %v7836_v56 = vpop.f32.mrf.mxu1  ;;  %v3118_v37 = vand.u32 4294901760, %v3117_v62  ;;  %v11428_v22 = vand.u32 4294901760, %v10185_v26  ;;  %v10207_v4 = vand.u32 4294901760, %v3022_v2  ;;  %v11694_v21 = vld [vmem:[#allocation18_spill] sm:$0xff] }
 0x377   : > { %11686 = vst [vmem:[#allocation37_spill] sm:$0xff] %v10192_v36  ;;  %v3023_v61 = vmul.f32 %v10192_v36, %v10192_v36  ;;  %v10203_v59 = vsub.f32 %v11688_v6, %v2962_v54  ;;  %8042 = vmatpush3.msra.mxu0 %v11687_v7  ;;  %v2812_v17 = vadd.f32 %v7836_v56, %v2640_v30  ;;  %v11691_v30 = vld [vmem:[#allocation95_spill] sm:$0xff]  ;;  %v2979_v42 = vpop.f32.mrf.mxu0  ;;  %v11696_v54 = vld [vmem:[#allocation21_spill] sm:$0xff]  ;;  %v10242_v56 = vand.u32 4294901760, %v10189_v63 }
 0x378   : > { %v2956_v57 = vadd.f32 %v2955_v9, %v2794_v52  ;;  %8043 = vmatprep.subr.mxu0 %v11690_v48  ;;  %7901 = vmatprep.mubr.f32.mxu1 %v3118_v37  ;;  %v2805_v27 = vpop.f32.mrf.mxu1  ;;  %v3137_v23 = vsub.f32 %v10185_v26, %v11428_v22  ;;  %v3147_v16 = vsub.f32 %v10169_v39, %v11426_v41  ;;  %v11708_v41 = vld [vmem:[#allocation100_spill] sm:$0xff] }
 0x379   : > { %11689 = vst [vmem:[#allocation39_spill] sm:$0xff] %v10203_v59  ;;  %v10216_v12 = vsub.f32 %v3021_v24, %v10196_v60  ;;  %v10220_v9 = vmul.f32 %v10203_v59, %v10203_v59  ;;  %v2974_v53 = vadd.f32 %v7862_v32, %v2812_v17  ;;  %7963 = vmatprep.mubr.f32.mxu0 %v10196_v60  ;;  %v10229_v24 = vand.u32 4294901760, %v3023_v61  ;;  %v11693_v32 = vld [vmem:[#allocation20_spill] sm:$0xff] }
 0x37a   : > { %v10223_v19 = vsub.f32 %v11691_v30, %v2956_v57  ;;  %8044 = vmatpush3.msra.mxu0 %v11690_v48  ;;  %v2806_v29 = vadd.f32 %v2805_v27, %v10119_v51  ;;  %7902 = vmatmul.mubr.f32.vlgmr.msra.gmra.mxu1 %v3128_v5  ;;  %v7839_v45 = vpop.f32.mrf.mxu1  ;;  %v3138_v34 = vand.u32 4294901760, %v3137_v23  ;;  %v11695_v51 = vld [vmem:[#allocation109_spill] sm:$0xff]  ;;  %v10248_v6 = vsub.f32 %v3022_v2, %v10207_v4  ;;  %v11701_v30 = vld [vmem:[#allocation99_spill] sm:$0xff]  ;;  %v11712_v22 = vld [vmem:[#allocation104_spill] sm:$0xff] }
 0x37b   : > { %7964 = vmatmul.mubr.f32.gmra.mxu0 %v10207_v4  ;;  %v11425_v46 = vand.u32 4294901760, %v10216_v12  ;;  %7982 = vmatpush3.msra.mxu1 %v11693_v32  ;;  %v2824_v62 = vadd.f32 %v7839_v45, %v10136_v49  ;;  %v2672_v5 = vadd.f32 %v11695_v51, %v10131_v40  ;;  %v11697_v49 = vld [vmem:[#allocation98_spill] sm:$0xff]  ;;  %v11699_v40 = vld [vmem:[#allocation19_spill] sm:$0xff]  ;;  %v3148_v17 = vand.u32 4294901760, %v3147_v16  ;;  %v11700_v27 = vld [vmem:[#allocation97_spill] sm:$0xff] }
 0x37c   : > { %11692 = vst [vmem:[#allocation44_spill] sm:$0xff] %v10223_v19  ;;  %v3025_v38 = vmul.f32 %v10223_v19, %v10223_v19  ;;  %8045 = vmatprep.subr.mxu0 %v11694_v21  ;;  %v2968_v15 = vadd.f32 %v2967_v0, %v2806_v29  ;;  %7983 = vmatprep.subr.mxu1 %v11696_v54  ;;  %v2817_v52 = vpop.f32.mrf.mxu1  ;;  %v10264_v45 = vand.u32 4294901760, %v10220_v9  ;;  %v11703_v51 = vld [vmem:[#allocation22_spill] sm:$0xff] }
 0x37d   : > { %8046 = vmatpush3.msra.mxu0 %v11694_v21  ;;  %v3157_v37 = vsub.f32 %v10216_v12, %v11425_v46  ;;  %v10251_v57 = vsub.f32 %v11697_v49, %v2974_v53  ;;  %7984 = vmatpush3.msra.mxu1 %v11696_v54  ;;  %v2818_v0 = vadd.f32 %v2817_v52, %v10151_v11  ;;  %v11424_v53 = vand.u32 4294901760, %v10248_v6  ;;  %v7868_v11 = vpop.f32.mrf.mxu0  ;;  %v11730_v19 = vld [vmem:[#allocation50_spill] sm:$0xff] }
 0x37e   : > { %8047 = vmatprep.subr.mxu0 %v11699_v40  ;;  %v2664_v23 = vadd.f32 %v11700_v27, %v10161_v35  ;;  %v10259_v29 = vsub.f32 %v11701_v30, %v2968_v15  ;;  %7904 = vmatprep.mubr.f32.mxu1 %v3138_v34  ;;  %v7842_v2 = vpop.f32.mrf.mxu1  ;;  %v10267_v32 = vsub.f32 %v3023_v61, %v10229_v24  ;;  %v10271_v34 = vand.u32 4294901760, %v3025_v38  ;;  %v11707_v27 = vld [vmem:[#allocation24_spill] sm:$0xff] }
 0x37f   : > { %11698 = vst [vmem:[#allocation48_spill] sm:$0xff] %v10251_v57  ;;  %7966 = vmatprep.mubr.f32.mxu0 %v10229_v24  ;;  %v2986_v16 = vadd.f32 %v7865_v14, %v2824_v62  ;;  %7985 = vmatprep.subr.mxu1 %v11703_v51  ;;  %v2980_v35 = vadd.f32 %v2979_v42, %v2818_v0  ;;  %v3158_v15 = vand.u32 4294901760, %v3157_v37  ;;  %v11704_v37 = vld [vmem:[#allocation102_spill] sm:$0xff]  ;;  %v11706_v0 = vld [vmem:[#allocation23_spill] sm:$0xff]  ;;  %v2991_v46 = vpop.f32.mrf.mxu0 }
 0x380   : > { %11702 = vst [vmem:[#allocation52_spill] sm:$0xff] %v10259_v29  ;;  %8048 = vmatpush3.msra.mxu0 %v11699_v40  ;;  %v3027_v54 = vmul.f32 %v10259_v29, %v10259_v29  ;;  %7905 = vmatmul.mubr.f32.gmra.mxu1 %v3148_v17  ;;  %v2829_v52 = vpop.f32.mrf.mxu1  ;;  %v3167_v61 = vsub.f32 %v10248_v6, %v11424_v53  ;;  %v11427_v14 = vand.u32 4294901760, %v10267_v32 }
 0x381   : > { %7967 = vmatmul.mubr.f32.gmra.mxu0 %v10242_v56  ;;  %v10282_v62 = vsub.f32 %v10189_v63, %v10242_v56  ;;  %v3028_v42 = vmul.f32 %v10251_v57, %v10251_v57  ;;  %v10287_v49 = vsub.f32 %v11704_v37, %v2980_v35  ;;  %7986 = vmatpush3.msra.mxu1 %v11703_v51  ;;  %v11710_v51 = vld [vmem:[#allocation27_spill] sm:$0xff]  ;;  %v11725_v57 = vld [vmem:[#allocation45_spill] sm:$0xff] }
 0x382   : > { %8049 = vmatprep.subr.mxu0 %v11706_v0  ;;  %v2836_v17 = vadd.f32 %v7842_v2, %v2672_v5  ;;  %7987 = vmatprep.subr.mxu1 %v11707_v27  ;;  %v2830_v30 = vadd.f32 %v2829_v52, %v2664_v23  ;;  %v3177_v63 = vsub.f32 %v10267_v32, %v11427_v14  ;;  %v10296_v53 = vand.u32 4294901760, %v3027_v54 }
 0x383   : > { %11705 = vst [vmem:[#allocation55_spill] sm:$0xff] %v10287_v49  ;;  %8050 = vmatpush3.msra.mxu0 %v11706_v0  ;;  %v10299_v35 = vsub.f32 %v11708_v41, %v2986_v16  ;;  %7988 = vmatpush3.msra.mxu1 %v11707_v27  ;;  %v11430_v5 = vand.u32 4294901760, %v10282_v62  ;;  %v10305_v2 = vsub.f32 %v3025_v38, %v10271_v34  ;;  %v3168_v37 = vand.u32 4294901760, %v3167_v61  ;;  %v11711_v27 = vld [vmem:[#allocation25_spill] sm:$0xff] }
 0x384   : > { %8051 = vmatprep.subr.mxu0 %v11710_v51  ;;  %v3029_v23 = vmul.f32 %v10287_v49, %v10287_v49  ;;  %7907 = vmatprep.mubr.f32.mxu1 %v3158_v15  ;;  %v2992_v52 = vadd.f32 %v2991_v46, %v2830_v30  ;;  %v10312_v41 = vsub.f32 %v10220_v9, %v10264_v45  ;;  %v10316_v14 = vand.u32 4294901760, %v3028_v42  ;;  %v11714_v15 = vld [vmem:[#allocation40_spill] sm:$0xff] }
 0x385   : > { %11709 = vst [vmem:[#allocation58_spill] sm:$0xff] %v10299_v35  ;;  %7969 = vmatprep.mubr.f32.mxu0 %v10271_v34  ;;  %v2998_v16 = vadd.f32 %v7868_v11, %v2836_v17  ;;  %7989 = vmatprep.subr.mxu1 %v11711_v27  ;;  %v11431_v38 = vand.u32 4294901760, %v10305_v2  ;;  %v3178_v46 = vand.u32 4294901760, %v3177_v63  ;;  %v3187_v9 = vsub.f32 %v10282_v62, %v11430_v5  ;;  %v11716_v63 = vld [vmem:[#allocation103_spill] sm:$0xff] }
 0x386   : > { %8052 = vmatpush3.msra.mxu0 %v11710_v51  ;;  %v10320_v13 = vsub.f32 %v11712_v22, %v2992_v52  ;;  %7908 = vmatmul.mubr.f32.gmra.mxu1 %v3168_v37  ;;  %v10327_v11 = vsub.f32 %v3027_v54, %v10296_v53  ;;  %v3030_v61 = vmul.f32 %v10299_v35, %v10299_v35  ;;  %v11715_v22 = vld [vmem:[#allocation26_spill] sm:$0xff]  ;;  %v10338_v30 = vand.u32 4294901760, %v3029_v23  ;;  %v11718_v37 = vld [vmem:[#allocation41_spill] sm:$0xff] }
 0x387   : > { %7970 = vmatmul.mubr.f32.gmra.mxu0 %v10264_v45  ;;  %7990 = vmatpush3.msra.mxu1 %v11711_v27  ;;  %v3197_v17 = vsub.f32 %v10305_v2, %v11431_v38  ;;  %v10342_v52 = vsub.f32 %v11716_v63, %v2998_v16  ;;  %v3188_v5 = vand.u32 4294901760, %v3187_v9  ;;  %v10351_v50 = vsub.f32 %v3028_v42, %v10316_v14  ;;  %v11719_v54 = vld [vmem:[#allocation33_spill] sm:$0xff]  ;;  %v11721_v42 = vld [vmem:[#allocation42_spill] sm:$0xff] }
 0x388   : > { %11713 = vst [vmem:[#allocation60_spill] sm:$0xff] %v10320_v13  ;;  %8053 = vmatprep.subr.mxu0 %v11714_v15  ;;  %7991 = vmatprep.subr.mxu1 %v11715_v22  ;;  %v3031_v27 = vmul.f32 %v10320_v13, %v10320_v13  ;;  %v10359_v63 = vand.u32 4294901760, %v3030_v61  ;;  %v10362_v9 = vsub.f32 %v3029_v23, %v10338_v30  ;;  %v11727_v35 = vld [vmem:[#allocation46_spill] sm:$0xff] }
 0x389   : > { %8054 = vmatpush3.msra.mxu0 %v11714_v15  ;;  %11717 = vst [vmem:[#allocation62_spill] sm:$0xff] %v10342_v52  ;;  %7992 = vmatpush3.msra.mxu1 %v11715_v22  ;;  %v3198_v16 = vand.u32 4294901760, %v3197_v17  ;;  %v11720_v22 = vand.u32 4294901760, %v10312_v41  ;;  %v3032_v38 = vmul.f32 %v10342_v52, %v10342_v52  ;;  %v11723_v17 = vand.u32 4294901760, %v10327_v11 }
 0x38a   : > { %8055 = vmatprep.subr.mxu0 %v11718_v37  ;;  %7910 = vmatprep.mubr.f32.mxu1 %v3178_v46  ;;  %v10373_v13 = vand.u32 4294901760, %v3031_v27  ;;  %v11439_v23 = vand.u32 4294901760, %v10351_v50  ;;  %v10381_v49 = vsub.f32 %v3030_v61, %v10359_v63  ;;  %v11726_v61 = vld [vmem:[#allocation51_spill] sm:$0xff] }
 0x38b   : > { %7972 = vmatprep.mubr.f32.mxu0 %v10296_v53  ;;  %7993 = vmatprep.subr.mxu1 %v11719_v54  ;;  %v3207_v46 = vsub.f32 %v10312_v41, %v11720_v22  ;;  %v3217_v22 = vsub.f32 %v10327_v11, %v11723_v17 }
 0x38c   : > { %8056 = vmatpush3.msra.mxu0 %v11718_v37  ;;  %7911 = vmatmul.mubr.f32.gmra.mxu1 %v3188_v5  ;;  %v11722_v5 = vld [vmem:[#allocation35_spill] sm:$0xff]  ;;  %v11442_v29 = vand.u32 4294901760, %v10381_v49 }
 0x38d   : > { %7973 = vmatmul.mubr.f32.gmra.mxu0 %v10316_v14  ;;  %7994 = vmatpush3.msra.mxu1 %v11719_v54  ;;  %v11724_v54 = vld [vmem:[#allocation47_spill] sm:$0xff]  ;;  %v3208_v52 = vand.u32 4294901760, %v3207_v46  ;;  %v3218_v17 = vand.u32 4294901760, %v3217_v22  ;;  %v10392_v46 = vsub.f32 %v3031_v27, %v10373_v13 }
 0x38e   : > { %8057 = vmatprep.subr.mxu0 %v11721_v42  ;;  %7995 = vmatprep.subr.mxu1 %v11722_v5 }
 0x38f   : > { %8058 = vmatpush3.msra.mxu0 %v11721_v42  ;;  %7996 = vmatpush3.msra.mxu1 %v11722_v5  ;;  %v10389_v5 = vand.u32 4294901760, %v3032_v38  ;;  %v11445_v27 = vand.u32 4294901760, %v10392_v46 }
 0x390   : > { %8059 = vmatprep.subr.mxu0 %v11724_v54  ;;  %7913 = vmatprep.mubr.f32.mxu1 %v3198_v16  ;;  %v3227_v16 = vsub.f32 %v10351_v50, %v11439_v23  ;;  %v11729_v23 = vld [vmem:[#allocation66_spill] sm:$0xff] }
 0x391   : > { %7975 = vmatprep.mubr.f32.mxu0 %v10338_v30  ;;  %7997 = vmatprep.subr.mxu1 %v11725_v57  ;;  %v10407_v59 = vsub.f32 %v3032_v38, %v10389_v5  ;;  %v3257_v38 = vsub.f32 %v10392_v46, %v11445_v27 }
 0x392   : > { %8060 = vmatpush3.msra.mxu0 %v11724_v54  ;;  %7914 = vmatmul.mubr.f32.gmra.mxu1 %v3208_v52  ;;  %v11728_v52 = vand.u32 4294901760, %v10362_v9 }
 0x393   : > { %7976 = vmatmul.mubr.f32.gmra.mxu0 %v10359_v63  ;;  %7998 = vmatpush3.msra.mxu1 %v11725_v57  ;;  %v3228_v57 = vand.u32 4294901760, %v3227_v16  ;;  %v11732_v16 = vld [vmem:[#allocation54_spill] sm:$0xff]  ;;  %v3258_v27 = vand.u32 4294901760, %v3257_v38  ;;  %v11741_v38 = vld [vmem:[#allocation73_spill] sm:$0xff] }
 0x394   : > { %8061 = vmatprep.subr.mxu0 %v11726_v61  ;;  %7999 = vmatprep.subr.mxu1 %v11727_v35  ;;  %v3237_v22 = vsub.f32 %v10362_v9, %v11728_v52 }
 0x395   : > { %8062 = vmatpush3.msra.mxu0 %v11726_v61  ;;  %8000 = vmatpush3.msra.mxu1 %v11727_v35  ;;  %v3247_v35 = vsub.f32 %v10381_v49, %v11442_v29  ;;  %v11734_v29 = vld [vmem:[#allocation71_spill] sm:$0xff] }
 0x396   : > { %8063 = vmatprep.subr.mxu0 %v11729_v23  ;;  %7916 = vmatprep.mubr.f32.mxu1 %v3218_v17  ;;  %v3238_v52 = vand.u32 4294901760, %v3237_v22  ;;  %v11731_v17 = vld [vmem:[#allocation68_spill] sm:$0xff]  ;;  %v11733_v22 = vand.u32 4294901760, %v10148_v10 }
 0x397   : > { %7978 = vmatprep.mubr.f32.mxu0 %v10373_v13  ;;  %8001 = vmatprep.subr.mxu1 %v11730_v19 }
 0x398   : > { %8064 = vmatpush3.msra.mxu0 %v11729_v23  ;;  %7917 = vmatmul.mubr.f32.gmra.mxu1 %v3228_v57  ;;  %v3266_v57 = vand.u32 4294901760, %v10407_v59 }
 0x399   : > { %7979 = vmatmul.mubr.f32.gmra.mxu0 %v10389_v5  ;;  %8002 = vmatpush3.msra.mxu1 %v11730_v19  ;;  %v3248_v19 = vand.u32 4294901760, %v3247_v35  ;;  %v11739_v35 = vld [vmem:[#allocation70_spill] sm:$0xff] }
 0x39a   : > { %8065 = vmatprep.subr.mxu0 %v11731_v17  ;;  %8003 = vmatprep.subr.mxu1 %v11732_v16  ;;  %v3267_v3 = vsub.f32 %v10407_v59, %v3266_v57 }
 0x39b   : > { %8066 = vmatpush3.msra.mxu0 %v11731_v17  ;;  %8069 = vmatprep.mubr.f32.mxu0 %v11733_v22 }
 0x39c   : > { %8004 = vmatpush3.msra.mxu1 %v11732_v16  ;;  %8067 = vmatprep.subr.mxu0 %v11734_v29  ;;  %v11737_v16 = vld [vmem:[#allocation67_spill] sm:$0xff] }
 0x39d   : > { %7919 = vmatprep.mubr.f32.mxu1 %v3238_v52  ;;  %8005 = vmatprep.subr.mxu1 %v11735_v55  ;;  %v11738_v52 = vand.u32 4294901760, %v10185_v26 }
 0x39e   : > { %8068 = vmatpush3.msra.mxu0 %v11734_v29  ;;  %7920 = vmatmul.mubr.f32.gmra.mxu1 %v3248_v19 }
 0x39f   : > { %8070 = vmatmul.mubr.f32.vlgmr.msra.gmra.mxu0 %v11736_v28  ;;  %8006 = vmatpush3.msra.mxu1 %v11735_v55  ;;  %v3268_v28 = vand.u32 4294901760, %v3267_v3  ;;  %v11740_v55 = vand.u32 4294901760, %v10169_v39  ;;  %v11743_v3 = vld [vmem:[#allocation28_spill] sm:$0xff] }
 0x3a0   : > { %8149 = vmatprep.subr.mxu0 %v11681_v18  ;;  %8007 = vmatprep.subr.mxu1 %v11737_v16 }
 0x3a1   : > { %8072 = vmatprep.mubr.f32.mxu0 %v11738_v52  ;;  %8150 = vmatpush3.msra.mxu0 %v11681_v18  ;;  %v11742_v18 = vand.u32 4294901760, %v10216_v12 }
 0x3a2   : > { %8008 = vmatpush3.msra.mxu1 %v11737_v16  ;;  %8151 = vmatprep.subr.mxu0 %v11684_v33 }
 0x3a3   : > { %7922 = vmatprep.mubr.f32.mxu1 %v3258_v27  ;;  %8009 = vmatprep.subr.mxu1 %v11739_v35 }
 0x3a4   : > { %8152 = vmatpush3.msra.mxu0 %v11684_v33  ;;  %7923 = vmatmul.mubr.f32.gmra.mxu1 %v3268_v28  ;;  %v11744_v33 = vand.u32 4294901760, %v10248_v6 }
 0x3a5   : > { %8073 = vmatmul.mubr.f32.gmra.mxu0 %v11740_v55  ;;  %8010 = vmatpush3.msra.mxu1 %v11739_v35 }
 0x3a6   : > { %8153 = vmatprep.subr.mxu0 %v11687_v7  ;;  %8011 = vmatprep.subr.mxu1 %v11741_v38 }
 0x3a7   : > { %8013 = vmatprep.mubr.f32.mxu1 %v10148_v10  ;;  %8075 = vmatprep.mubr.f32.mxu0 %v11742_v18  ;;  %v11745_v10 = vand.u32 4294901760, %v10267_v32 }
 0x3a8   : > { %8154 = vmatpush3.msra.mxu0 %v11687_v7  ;;  %8012 = vmatpush3.msra.mxu1 %v11741_v38  ;;  %v11746_v7 = vld [vmem:[#allocation29_spill] sm:$0xff] }
 0x3a9   : > { %8155 = vmatprep.subr.mxu0 %v11690_v48  ;;  %8093 = vmatprep.subr.mxu1 %v11743_v3 }
 0x3aa   : > { %8156 = vmatpush3.msra.mxu0 %v11690_v48  ;;  %8014 = vmatmul.mubr.f32.vlgmr.msra.gmra.mxu1 %v10122_v1  ;;  %v11747_v1 = vld [vmem:[#allocation30_spill] sm:$0xff]  ;;  %v11748_v48 = vand.u32 4294901760, %v10282_v62 }
 0x3ab   : > { %8076 = vmatmul.mubr.f32.gmra.mxu0 %v11744_v33  ;;  %8094 = vmatpush3.msra.mxu1 %v11743_v3 }
 0x3ac   : > { %8157 = vmatprep.subr.mxu0 %v11694_v21  ;;  %8016 = vmatprep.mubr.f32.mxu1 %v10185_v26  ;;  %v11749_v26 = vand.u32 4294901760, %v10305_v2 }
 0x3ad   : > { %8078 = vmatprep.mubr.f32.mxu0 %v11745_v10  ;;  %8095 = vmatprep.subr.mxu1 %v11746_v7 }
 0x3ae   : > { %8158 = vmatpush3.msra.mxu0 %v11694_v21  ;;  %8096 = vmatpush3.msra.mxu1 %v11746_v7  ;;  %v11750_v21 = vld [vmem:[#allocation31_spill] sm:$0xff] }
 0x3af   : > { %8159 = vmatprep.subr.mxu0 %v11699_v40  ;;  %8097 = vmatprep.subr.mxu1 %v11747_v1 }
 0x3b0   : > { %8160 = vmatpush3.msra.mxu0 %v11699_v40  ;;  %8017 = vmatmul.mubr.f32.gmra.mxu1 %v10169_v39  ;;  %v11751_v39 = vld [vmem:[#allocation32_spill] sm:$0xff]  ;;  %v11752_v40 = vand.u32 4294901760, %v10312_v41 }
 0x3b1   : > { %8079 = vmatmul.mubr.f32.gmra.mxu0 %v11748_v48  ;;  %8098 = vmatpush3.msra.mxu1 %v11747_v1 }
 0x3b2   : > { %8161 = vmatprep.subr.mxu0 %v11706_v0  ;;  %8019 = vmatprep.mubr.f32.mxu1 %v10216_v12  ;;  %v11753_v12 = vand.u32 4294901760, %v10327_v11 }
 0x3b3   : > { %8081 = vmatprep.mubr.f32.mxu0 %v11749_v26  ;;  %8099 = vmatprep.subr.mxu1 %v11750_v21 }
 0x3b4   : > { %8162 = vmatpush3.msra.mxu0 %v11706_v0  ;;  %8100 = vmatpush3.msra.mxu1 %v11750_v21  ;;  %v11754_v0 = vld [vmem:[#allocation34_spill] sm:$0xff] }
 0x3b5   : > { %8163 = vmatprep.subr.mxu0 %v11710_v51  ;;  %8101 = vmatprep.subr.mxu1 %v11751_v39 }
 0x3b6   : > { %8164 = vmatpush3.msra.mxu0 %v11710_v51  ;;  %8020 = vmatmul.mubr.f32.gmra.mxu1 %v10248_v6  ;;  %v11755_v6 = vld [vmem:[#allocation38_spill] sm:$0xff]  ;;  %v11756_v51 = vand.u32 4294901760, %v10351_v50 }
 0x3b7   : > { %8082 = vmatmul.mubr.f32.gmra.mxu0 %v11752_v40  ;;  %8102 = vmatpush3.msra.mxu1 %v11751_v39 }
 0x3b8   : > { %8165 = vmatprep.subr.mxu0 %v11714_v15  ;;  %8022 = vmatprep.mubr.f32.mxu1 %v10267_v32  ;;  %v11757_v32 = vand.u32 4294901760, %v10362_v9 }
 0x3b9   : > { %8084 = vmatprep.mubr.f32.mxu0 %v11753_v12  ;;  %8103 = vmatprep.subr.mxu1 %v11754_v0 }
 0x3ba   : > { %8166 = vmatpush3.msra.mxu0 %v11714_v15  ;;  %8104 = vmatpush3.msra.mxu1 %v11754_v0  ;;  %v11758_v15 = vld [vmem:[#allocation43_spill] sm:$0xff] }
 0x3bb   : > { %8167 = vmatprep.subr.mxu0 %v11718_v37  ;;  %8105 = vmatprep.subr.mxu1 %v11755_v6 }
 0x3bc   : > { %8168 = vmatpush3.msra.mxu0 %v11718_v37  ;;  %8023 = vmatmul.mubr.f32.gmra.mxu1 %v10282_v62  ;;  %v11759_v62 = vld [vmem:[#allocation49_spill] sm:$0xff]  ;;  %v11760_v37 = vand.u32 4294901760, %v10381_v49 }
 0x3bd   : > { %8085 = vmatmul.mubr.f32.gmra.mxu0 %v11756_v51  ;;  %8106 = vmatpush3.msra.mxu1 %v11755_v6 }
 0x3be   : > { %8169 = vmatprep.subr.mxu0 %v11721_v42  ;;  %8025 = vmatprep.mubr.f32.mxu1 %v10305_v2  ;;  %v11761_v2 = vand.u32 4294901760, %v10392_v46 }
 0x3bf   : > { %8087 = vmatprep.mubr.f32.mxu0 %v11757_v32  ;;  %8107 = vmatprep.subr.mxu1 %v11758_v15 }
 0x3c0   : > { %8170 = vmatpush3.msra.mxu0 %v11721_v42  ;;  %8108 = vmatpush3.msra.mxu1 %v11758_v15  ;;  %v11762_v42 = vld [vmem:[#allocation53_spill] sm:$0xff] }
 0x3c1   : > { %8171 = vmatprep.subr.mxu0 %v11724_v54  ;;  %8109 = vmatprep.subr.mxu1 %v11759_v62 }
 0x3c2   : > { %8172 = vmatpush3.msra.mxu0 %v11724_v54  ;;  %8026 = vmatmul.mubr.f32.gmra.mxu1 %v10312_v41  ;;  %v11763_v41 = vld [vmem:[#allocation56_spill] sm:$0xff] }
 0x3c3   : > { %8088 = vmatmul.mubr.f32.gmra.mxu0 %v11760_v37  ;;  %8110 = vmatpush3.msra.mxu1 %v11759_v62  ;;  %v11768_v54 = vld [vmem:[#allocation72_spill] sm:$0xff] }
 0x3c4   : > { %8173 = vmatprep.subr.mxu0 %v11726_v61  ;;  %8028 = vmatprep.mubr.f32.mxu1 %v10327_v11  ;;  %v11764_v11 = vld [vmem:[#allocation59_spill] sm:$0xff] }
 0x3c5   : > { %8090 = vmatprep.mubr.f32.mxu0 %v11761_v2  ;;  %8111 = vmatprep.subr.mxu1 %v11762_v42 }
 0x3c6   : > { %8174 = vmatpush3.msra.mxu0 %v11726_v61  ;;  %8112 = vmatpush3.msra.mxu1 %v11762_v42 }
 0x3c7   : > { %8175 = vmatprep.subr.mxu0 %v11729_v23  ;;  %8113 = vmatprep.subr.mxu1 %v11763_v41 }
 0x3c8   : > { %8176 = vmatpush3.msra.mxu0 %v11729_v23  ;;  %8029 = vmatmul.mubr.f32.gmra.mxu1 %v10351_v50  ;;  %v11765_v50 = vld [vmem:[#allocation61_spill] sm:$0xff]  ;;  %v11767_v23 = vld [vmem:[#allocation83_spill] sm:$0xff] }
 0x3c9   : > { %8091 = vmatmul.mubr.f32.gmra.mxu0 %v3266_v57  ;;  %8114 = vmatpush3.msra.mxu1 %v11763_v41 }
 0x3ca   : > { %8177 = vmatprep.subr.mxu0 %v11731_v17  ;;  %8031 = vmatprep.mubr.f32.mxu1 %v10362_v9  ;;  %v11766_v9 = vld [vmem:[#allocation69_spill] sm:$0xff] }
 0x3cb   : > { %8115 = vmatprep.subr.mxu1 %v11764_v11  ;;  %8178 = vmatpush3.msra.mxu0 %v11731_v17 }
 0x3cc   : > { %8181 = vmatprep.mubr.f32.mxu0 %v10133_v44  ;;  %8116 = vmatpush3.msra.mxu1 %v11764_v11 }
 0x3cd   : > { %8179 = vmatprep.subr.mxu0 %v11734_v29  ;;  %8117 = vmatprep.subr.mxu1 %v11765_v50 }
 0x3ce   : > { %8180 = vmatpush3.msra.mxu0 %v11734_v29  ;;  %8032 = vmatmul.mubr.f32.gmra.mxu1 %v10381_v49  ;;  %v11769_v29 = vld [vmem:[#allocation75_spill] sm:$0xff]  ;;  %v11770_v49 = vld [vmem:[#allocation81_spill] sm:$0xff] }
 0x3cf   : > { %8182 = vmatmul.mubr.f32.vlgmr.msra.gmra.mxu0 %v10109_v20  ;;  %8118 = vmatpush3.msra.mxu1 %v11765_v50 }
 0x3d0   : > { %8034 = vmatprep.mubr.f32.mxu1 %v10392_v46  ;;  %8119 = vmatprep.subr.mxu1 %v11766_v9 }
 0x3d1   : > { %8184 = vmatprep.mubr.f32.mxu0 %v10157_v58  ;;  %8120 = vmatpush3.msra.mxu1 %v11766_v9 }
 0x3d2   : > { %8231 = vmatprep.subr.mxu0 %v11767_v23  ;;  %8121 = vmatprep.subr.mxu1 %v11768_v54 }
 0x3d3   : > { %8035 = vmatmul.mubr.f32.gmra.mxu1 %v10407_v59  ;;  %8185 = vmatmul.mubr.f32.gmra.mxu0 %v10145_v43  ;;  %v11771_v59 = vld [vmem:[#allocation79_spill] sm:$0xff] }
 0x3d4   : > { %8122 = vmatpush3.msra.mxu1 %v11768_v54  ;;  %8125 = vmatprep.mubr.f32.mxu1 %v10133_v44 }
 0x3d5   : > { %8123 = vmatprep.subr.mxu1 %v11769_v29  ;;  %8187 = vmatprep.mubr.f32.mxu0 %v10196_v60 }
 0x3d6   : > { %8124 = vmatpush3.msra.mxu1 %v11769_v29  ;;  %8232 = vmatpush3.msra.mxu0 %v11767_v23 }
 0x3d7   : > { %8126 = vmatmul.mubr.f32.vlgmr.msra.gmra.mxu1 %v10109_v20  ;;  %8205 = vmatprep.subr.mxu1 %v11770_v49 }
 0x3d8   : > { %8188 = vmatmul.mubr.f32.gmra.mxu0 %v10207_v4  ;;  %8128 = vmatprep.mubr.f32.mxu1 %v10157_v58 }
 0x3d9   : > { %8190 = vmatprep.mubr.f32.mxu0 %v10229_v24  ;;  %8206 = vmatpush3.msra.mxu1 %v11770_v49 }
 0x3da   : > { %8257 = vmatprep.subr.mxu1 %v11771_v59  ;;  %8283 = vmatprep.subr.mxu0 %v11770_v49 }
 0x3db   : > { %8129 = vmatmul.mubr.f32.gmra.mxu1 %v10145_v43 }
 0x3dc   : > { %8191 = vmatmul.mubr.f32.gmra.mxu0 %v10242_v56  ;;  %8131 = vmatprep.mubr.f32.mxu1 %v10196_v60 }
 0x3dd   : > { %8193 = vmatprep.mubr.f32.mxu0 %v10271_v34 }
 0x3df   : > { %8132 = vmatmul.mubr.f32.gmra.mxu1 %v10207_v4 }
 0x3e0   : > { %8194 = vmatmul.mubr.f32.gmra.mxu0 %v10264_v45  ;;  %8134 = vmatprep.mubr.f32.mxu1 %v10229_v24 }
 0x3e1   : > { %8196 = vmatprep.mubr.f32.mxu0 %v10296_v53 }
 0x3e3   : > { %8135 = vmatmul.mubr.f32.gmra.mxu1 %v10242_v56 }
 0x3e4   : > { %8197 = vmatmul.mubr.f32.gmra.mxu0 %v10316_v14  ;;  %8137 = vmatprep.mubr.f32.mxu1 %v10271_v34 }
 0x3e5   : > { %8199 = vmatprep.mubr.f32.mxu0 %v10338_v30 }
 0x3e7   : > { %8138 = vmatmul.mubr.f32.gmra.mxu1 %v10264_v45 }
 0x3e8   : > { %8200 = vmatmul.mubr.f32.gmra.mxu0 %v10359_v63  ;;  %8140 = vmatprep.mubr.f32.mxu1 %v10296_v53 }
 0x3e9   : > { %8202 = vmatprep.mubr.f32.mxu0 %v10373_v13 }
 0x3eb   : > { %8141 = vmatmul.mubr.f32.gmra.mxu1 %v10316_v14 }
 0x3ec   : > { %8203 = vmatmul.mubr.f32.gmra.mxu0 %v10389_v5  ;;  %8143 = vmatprep.mubr.f32.mxu1 %v10338_v30 }
 0x3ef   : > { %8144 = vmatmul.mubr.f32.gmra.mxu1 %v10359_v63 }
 0x3f0   : > { %8146 = vmatprep.mubr.f32.mxu1 %v10373_v13 }
 0x3f3   : > { %8147 = vmatmul.mubr.f32.gmra.mxu1 %v10389_v5 }
 0x431   : > { %v7959_v20 = vpop.f32.mrf.mxu0 }
 0x433   : > { %v10587_v44 = vpop.f32.mrf.mxu0 }
 0x436   : > { %v7962_v43 = vpop.f32.mrf.mxu0 }
 0x438   : > { %v10589_v58 = vpop.f32.mrf.mxu0 }
 0x43a   : > { %v7903_v60 = vpop.f32.mrf.mxu1 }
 0x43b   : > { %v10591_v4 = vpop.f32.mrf.mxu0  ;;  %v10593_v24 = vadd.f32 %v7959_v20, %v7903_v60 }
 0x43c   : > { %v10595_v56 = vpop.f32.mrf.mxu1 }
 0x43d   : > { %v10597_v53 = vpop.f32.mrf.mxu0 }
 0x440   : > { %v7906_v45 = vpop.f32.mrf.mxu1 }
 0x441   : > { %v10599_v34 = vpop.f32.mrf.mxu0  ;;  %v10601_v13 = vadd.f32 %v7962_v43, %v7906_v45 }
 0x442   : > { %v10603_v14 = vpop.f32.mrf.mxu1 }
 0x443   : > { %v10605_v30 = vpop.f32.mrf.mxu0 }
 0x446   : > { %v7909_v63 = vpop.f32.mrf.mxu1 }
 0x447   : > { %v7971_v5 = vpop.f32.mrf.mxu0 }
 0x448   : > { %v3160_v46 = vpop.f32.mrf.mxu1 }
 0x449   : > { %v10607_v61 = vpop.f32.mrf.mxu0 }
 0x44c   : > { %v10609_v27 = vpop.f32.mrf.mxu1 }
 0x44d   : > { %v7974_v17 = vpop.f32.mrf.mxu0 }
 0x44e   : > { %v10611_v57 = vpop.f32.mrf.mxu1 }
 0x44f   : > { %v10613_v22 = vpop.f32.mrf.mxu0 }
 0x450   : > { %11772 = vst [vmem:[#allocation63_spill] sm:$0xff] %v10613_v22 }
 0x452   : > { %v7915_v19 = vpop.f32.mrf.mxu1 }
 0x453   : > { %v10615_v16 = vpop.f32.mrf.mxu0  ;;  %v10617_v52 = vadd.f32 %v7971_v5, %v7915_v19 }
 0x454   : > { %v10619_v28 = vpop.f32.mrf.mxu1 }
 0x455   : > { %v10621_v35 = vpop.f32.mrf.mxu0 }
 0x458   : > { %v7918_v55 = vpop.f32.mrf.mxu1 }
 0x459   : > { %v10623_v38 = vpop.f32.mrf.mxu0  ;;  %v10625_v18 = vadd.f32 %v7974_v17, %v7918_v55 }
 0x45a   : > { %v10627_v3 = vpop.f32.mrf.mxu1 }
 0x45b   : > { %11773 = vst [vmem:[#allocation64_spill] sm:$0xff] %v10627_v3  ;;  %v10629_v33 = vpop.f32.mrf.mxu0 }
 0x45c   : > { %11774 = vst [vmem:[#allocation65_spill] sm:$0xff] %v10629_v33 }
 0x45e   : > { %v10631_v10 = vpop.f32.mrf.mxu1 }
 0x45f   : > { %v8071_v7 = vpop.f32.mrf.mxu0 }
 0x460   : > { %v10633_v1 = vpop.f32.mrf.mxu1 }
 0x461   : > { %v3809_v48 = vpop.f32.mrf.mxu0 }
 0x464   : > { %v10635_v26 = vpop.f32.mrf.mxu1 }
 0x465   : > { %v8074_v21 = vpop.f32.mrf.mxu0 }
 0x466   : > { %v10637_v39 = vpop.f32.mrf.mxu1 }
 0x467   : > { %11775 = vst [vmem:[#allocation74_spill] sm:$0xff] %v10637_v39  ;;  %v10639_v40 = vpop.f32.mrf.mxu0 }
 0x46a   : > { %v8015_v12 = vpop.f32.mrf.mxu1 }
 0x46b   : > { %v8077_v0 = vpop.f32.mrf.mxu0 }
 0x46c   : > { %v3615_v6 = vpop.f32.mrf.mxu1 }
 0x46d   : > { %v3841_v51 = vpop.f32.mrf.mxu0 }
 0x470   : > { %v8018_v32 = vpop.f32.mrf.mxu1 }
 0x471   : > { %v10641_v15 = vpop.f32.mrf.mxu0 }
 0x472   : > { %v3629_v62 = vpop.f32.mrf.mxu1 }
 0x473   : > { %v10643_v37 = vpop.f32.mrf.mxu0 }
 0x476   : > { %v8021_v2 = vpop.f32.mrf.mxu1 }
 0x477   : > { %v10645_v42 = vpop.f32.mrf.mxu0 }
 0x478   : > { %v3643_v41 = vpop.f32.mrf.mxu1 }
 0x479   : > { %v10647_v11 = vpop.f32.mrf.mxu0 }
 0x47a   : > { %11776 = vst [vmem:[#allocation76_spill] sm:$0xff] %v10647_v11 }
 0x47c   : > { %v8024_v50 = vpop.f32.mrf.mxu1 }
 0x47d   : > { %v10649_v9 = vpop.f32.mrf.mxu0 }
 0x47e   : > { %11777 = vst [vmem:[#allocation77_spill] sm:$0xff] %v10649_v9  ;;  %v3657_v23 = vpop.f32.mrf.mxu1 }
 0x47f   : > { %v10651_v54 = vpop.f32.mrf.mxu0 }
 0x480   : > { %11778 = vst [vmem:[#allocation78_spill] sm:$0xff] %v10651_v54 }
 0x482   : > { %v10653_v29 = vpop.f32.mrf.mxu1 }
 0x483   : > { %v10655_v20 = vpop.f32.mrf.mxu0 }
 0x484   : > { %11779 = vst [vmem:[#allocation80_spill] sm:$0xff] %v10655_v20  ;;  %v10657_v43 = vpop.f32.mrf.mxu1  ;;  %v3446_v20 = vadd.f32 %v10597_v53, %v3160_v46 }
 0x485   : > { %v10659_v60 = vpop.f32.mrf.mxu0 }
 0x486   : > { %11780 = vst [vmem:[#allocation82_spill] sm:$0xff] %v10659_v60  ;;  %v3452_v60 = vadd.f32 %v10591_v4, %v7909_v63 }
 0x488   : > { %v10661_v45 = vpop.f32.mrf.mxu1  ;;  %v3651_v33 = vadd.f32 %v8021_v2, %v3452_v60 }
 0x489   : > { %v10663_v5 = vpop.f32.mrf.mxu0 }
 0x48a   : > { %11781 = vst [vmem:[#allocation87_spill] sm:$0xff] %v10663_v5  ;;  %v10665_v17 = vpop.f32.mrf.mxu1  ;;  %v3422_v5 = vadd.f32 %v10587_v44, %v10595_v56  ;;  %v3464_v44 = vadd.f32 %v10599_v34, %v10609_v27  ;;  %v3644_v56 = vadd.f32 %v3643_v41, %v3446_v20  ;;  %v3470_v20 = vadd.f32 %v10607_v61, %v10619_v28 }
 0x48b   : > { %11782 = vst [vmem:[#allocation93_spill] sm:$0xff] %v10665_v17  ;;  %v10667_v19 = vpop.f32.mrf.mxu0 }
 0x48c   : > { %11783 = vst [vmem:[#allocation84_spill] sm:$0xff] %v10667_v19  ;;  %v3623_v19 = vadd.f32 %v8015_v12, %v10593_v24  ;;  %v3616_v11 = vadd.f32 %v3615_v6, %v3422_v5  ;;  %v3458_v24 = vadd.f32 %v10605_v30, %v10611_v57  ;;  %v3665_v46 = vadd.f32 %v8024_v50, %v3464_v44 }
 0x48d   : > { %v3850_v5 = vadd.f32 %v8077_v0, %v3651_v33  ;;  %v3842_v34 = vadd.f32 %v3841_v51, %v3644_v56 }
 0x48e   : > { %v10669_v55 = vpop.f32.mrf.mxu1  ;;  %v3818_v4 = vadd.f32 %v8071_v7, %v3623_v19  ;;  %v3810_v2 = vadd.f32 %v3809_v48, %v3616_v11  ;;  %v3866_v48 = vadd.f32 %v10641_v15, %v3665_v46  ;;  %v3500_v15 = vadd.f32 %v10615_v16, %v10631_v10  ;;  %v11788_v46 = vld [vmem:[#allocation64_spill] sm:$0xff] }
 0x48f   : > { %v8183_v31 = vpop.f32.mrf.mxu0 }
 0x490   : > { %v10671_v8 = vpop.f32.mrf.mxu1  ;;  %v3707_v61 = vadd.f32 %v10669_v55, %v3500_v15 }
 0x491   : > { %11784 = vst [vmem:[#allocation108_spill] sm:$0xff] %v10671_v8  ;;  %v4225_v36 = vpop.f32.mrf.mxu0 }
 0x493   : > { %v10673_v47 = vpop.f32.mrf.mxu1  ;;  %v8186_v25 = vpop.f32.mrf.mxu0 }
 0x494   : > { %11785 = vst [vmem:[#allocation106_spill] sm:$0xff] %v10673_v47  ;;  %v3434_v47 = vadd.f32 %v10589_v58, %v10603_v14  ;;  %v3658_v58 = vadd.f32 %v3657_v23, %v3458_v24 }
 0x495   : > { %v10675_v59 = vpop.f32.mrf.mxu1  ;;  %v4237_v49 = vpop.f32.mrf.mxu0 }
 0x496   : > { %11786 = vst [vmem:[#allocation86_spill] sm:$0xff] %v10675_v59  ;;  %v3637_v59 = vadd.f32 %v8018_v32, %v10601_v13  ;;  %v3630_v12 = vadd.f32 %v3629_v62, %v3434_v47 }
 0x497   : > { %v8127_v54 = vpop.f32.mrf.mxu1 }
 0x498   : > { %v8189_v9 = vpop.f32.mrf.mxu0  ;;  %v4055_v6 = vadd.f32 %v8127_v54, %v3818_v4  ;;  %v3834_v14 = vadd.f32 %v8074_v21, %v3637_v59  ;;  %v3826_v7 = vadd.f32 %v10639_v40, %v3630_v12  ;;  %v3858_v59 = vadd.f32 %v10643_v37, %v3658_v58 }
 0x499   : > { %v4048_v17 = vpop.f32.mrf.mxu1  ;;  %v3494_v4 = vadd.f32 %v10621_v35, %v10633_v1 }
 0x49a   : > { %v4249_v39 = vpop.f32.mrf.mxu0  ;;  %v4049_v32 = vadd.f32 %v4048_v17, %v3810_v2  ;;  %v4232_v30 = vadd.f32 %v8183_v31, %v4055_v6  ;;  %v11789_v6 = vld [vmem:[#allocation63_spill] sm:$0xff] }
 0x49b   : > { %v8130_v22 = vpop.f32.mrf.mxu1  ;;  %v3482_v2 = vadd.f32 %v11789_v6, %v11788_v46 }
 0x49c   : > { %v8192_v63 = vpop.f32.mrf.mxu0  ;;  %v4067_v27 = vadd.f32 %v8130_v22, %v3834_v14  ;;  %v4226_v21 = vadd.f32 %v4225_v36, %v4049_v32  ;;  %v3679_v36 = vadd.f32 %v10653_v29, %v10617_v52  ;;  %v3693_v29 = vadd.f32 %v10661_v45, %v10625_v18  ;;  %v11792_v14 = vld [vmem:[#allocation76_spill] sm:$0xff]  ;;  %v11794_v45 = vld [vmem:[#allocation106_spill] sm:$0xff] }
 0x49d   : > { %v4060_v53 = vpop.f32.mrf.mxu1 }
 0x49e   : > { %v4261_v60 = vpop.f32.mrf.mxu0  ;;  %v4061_v33 = vadd.f32 %v4060_v53, %v3826_v7  ;;  %v4244_v22 = vadd.f32 %v8186_v25, %v4067_v27  ;;  %v3882_v24 = vadd.f32 %v10645_v42, %v3679_v36  ;;  %v11787_v53 = vld [vmem:[#allocation108_spill] sm:$0xff]  ;;  %v11795_v27 = vld [vmem:[#allocation93_spill] sm:$0xff] }
 0x49f   : > { %v8133_v13 = vpop.f32.mrf.mxu1  ;;  %v3700_v35 = vadd.f32 %v11787_v53, %v3494_v4  ;;  %v3686_v7 = vadd.f32 %v11795_v27, %v3482_v2  ;;  %v11801_v36 = vld [vmem:[#allocation84_spill] sm:$0xff]  ;;  %v11802_v27 = vld [vmem:[#allocation81_spill] sm:$0xff] }
 0x4a0   : > { %v4079_v3 = vadd.f32 %v8133_v13, %v3850_v5  ;;  %v10689_v8 = vpop.f32.mrf.mxu0  ;;  %v4238_v37 = vadd.f32 %v4237_v49, %v4061_v33  ;;  %v3512_v49 = vadd.f32 %v10623_v38, %v10635_v26  ;;  %v11791_v5 = vld [vmem:[#allocation65_spill] sm:$0xff]  ;;  %v11793_v13 = vld [vmem:[#allocation80_spill] sm:$0xff] }
 0x4a1   : > { %v4072_v41 = vpop.f32.mrf.mxu1  ;;  %v3914_v18 = vadd.f32 %v11793_v13, %v3707_v61 }
 0x4a2   : > { %v4256_v47 = vadd.f32 %v8189_v9, %v4079_v3  ;;  %v4073_v57 = vadd.f32 %v4072_v41, %v3842_v34  ;;  %v10692_v62 = vpop.f32.mrf.mxu0  ;;  %v3721_v42 = vadd.f32 %v11794_v45, %v3512_v49  ;;  %v11796_v41 = vld [vmem:[#allocation86_spill] sm:$0xff] }
 0x4a3   : > { %v8136_v0 = vpop.f32.mrf.mxu1 }
 0x4a4   : > { %v4320_v11 = vadd.f32 %v4256_v47, %v4232_v30  ;;  %v4250_v50 = vadd.f32 %v4249_v39, %v4073_v57  ;;  %v4091_v23 = vadd.f32 %v8136_v0, %v3866_v48  ;;  %v10696_v51 = vpop.f32.mrf.mxu0  ;;  %v11797_v47 = vld [vmem:[#allocation77_spill] sm:$0xff] }
 0x4a5   : > { %v4084_v40 = vpop.f32.mrf.mxu1  ;;  %v3898_v57 = vadd.f32 %v11797_v47, %v3693_v29 }
 0x4a6   : > { %v4324_v54 = vmul.f32 0.03125, %v4320_v11  ;;  %v4319_v31 = vadd.f32 %v4250_v50, %v4226_v21  ;;  %v4268_v3 = vadd.f32 %v8192_v63, %v4091_v23  ;;  %v4085_v9 = vadd.f32 %v4084_v40, %v3858_v59  ;;  %v10704_v56 = vpop.f32.mrf.mxu0  ;;  %v11798_v21 = vld [vmem:[#allocation82_spill] sm:$0xff] }
 0x4a7   : > { %v8139_v39 = vpop.f32.mrf.mxu1  ;;  %v3672_v63 = vadd.f32 %v10657_v43, %v3470_v20  ;;  %v3906_v11 = vadd.f32 %v11798_v21, %v3700_v35 }
 0x4a8   : > { %v4336_v17 = vadd.f32 1e-05, %v4324_v54  ;;  %v4323_v19 = vmul.f32 0.03125, %v4319_v31  ;;  %v4322_v44 = vadd.f32 %v4268_v3, %v4244_v22  ;;  %v4262_v25 = vadd.f32 %v4261_v60, %v4085_v9  ;;  %v8201_v55 = vpop.f32.mrf.mxu0  ;;  %v11790_v60 = vld [vmem:[#allocation74_spill] sm:$0xff]  ;;  %v11799_v31 = vld [vmem:[#allocation87_spill] sm:$0xff] }
 0x4a9   : > { %v4096_v28 = vpop.f32.mrf.mxu1  ;;  %v3506_v58 = vadd.f32 %v11791_v5, %v11790_v60  ;;  %v3874_v38 = vadd.f32 %v11792_v14, %v3672_v63  ;;  %v4103_v34 = vadd.f32 %v8139_v39, %v3882_v24  ;;  %v3930_v3 = vadd.f32 %v11799_v31, %v3721_v42  ;;  %v11800_v9 = vld [vmem:[#allocation78_spill] sm:$0xff] }
 0x4aa   : > { %8481 = vrsqrt.f32 %v4336_v17  ;;  %v4335_v16 = vadd.f32 1e-05, %v4323_v19  ;;  %v4326_v10 = vmul.f32 0.03125, %v4322_v44  ;;  %v4321_v52 = vadd.f32 %v4262_v25, %v4238_v37  ;;  %v4297_v0 = vpop.f32.mrf.mxu0 }
 0x4ab   : > { %v8142_v12 = vpop.f32.mrf.mxu1  ;;  %v3714_v30 = vadd.f32 %v11796_v41, %v3506_v58  ;;  %v4097_v33 = vadd.f32 %v4096_v28, %v3874_v38  ;;  %v4280_v22 = vadd.f32 %v10689_v8, %v4103_v34  ;;  %v3890_v20 = vadd.f32 %v11800_v9, %v3686_v7 }
 0x4ac   : > { %8483 = vrsqrt.f32 %v4335_v16  ;;  %v4338_v1 = vadd.f32 1e-05, %v4326_v10  ;;  %v4325_v43 = vmul.f32 0.03125, %v4321_v52  ;;  %v4115_v50 = vadd.f32 %v8142_v12, %v3898_v57  ;;  %v8204_v17 = vpop.f32.mrf.mxu0 }
 0x4ad   : > { %v4108_v26 = vpop.f32.mrf.mxu1  ;;  %v3922_v37 = vadd.f32 %v11801_v36, %v3714_v30  ;;  %v4274_v39 = vadd.f32 %v10692_v62, %v4097_v33 }
 0x4ae   : > { %8485 = vrsqrt.f32 %v4338_v1  ;;  %v4337_v32 = vadd.f32 1e-05, %v4325_v43  ;;  %v4292_v4 = vadd.f32 %v10696_v51, %v4115_v50  ;;  %v4109_v63 = vadd.f32 %v4108_v26, %v3890_v20  ;;  %v4309_v29 = vpop.f32.mrf.mxu0  ;;  %v11803_v50 = vld [vmem:[#allocation79_spill] sm:$0xff] }
 0x4af   : > { %v8145_v48 = vpop.f32.mrf.mxu1 }
 0x4b0   : > { %8487 = vrsqrt.f32 %v4337_v32  ;;  %v4127_v59 = vadd.f32 %v8145_v48, %v3914_v18  ;;  %v4286_v1 = vadd.f32 %v10704_v56, %v4109_v63 }
 0x4b1   : > { %v4120_v23 = vpop.f32.mrf.mxu1 }
 0x4b2   : > { %v4304_v40 = vadd.f32 %v8201_v55, %v4127_v59  ;;  %v4121_v54 = vadd.f32 %v4120_v23, %v3906_v11 }
 0x4b3   : > { %v8148_v15 = vpop.f32.mrf.mxu1 }
 0x4b4   : > { %v4328_v19 = vadd.f32 %v4304_v40, %v4280_v22  ;;  %v4298_v44 = vadd.f32 %v4297_v0, %v4121_v54  ;;  %v4139_v25 = vadd.f32 %v8148_v15, %v3930_v3  ;;  %v11804_v54 = vld [vmem:[#allocation85_spill] sm:$0xff] }
 0x4b5   : > { %v4132_v61 = vpop.f32.mrf.mxu1 }
 0x4b6   : > { %v4332_v8 = vmul.f32 0.03125, %v4328_v19  ;;  %v4327_v28 = vadd.f32 %v4298_v44, %v4274_v39  ;;  %v4316_v16 = vadd.f32 %v8204_v17, %v4139_v25  ;;  %v4133_v10 = vadd.f32 %v4132_v61, %v3922_v37 }
 0x4b7   : > { %v8482_v52 = vpop.eup %8481 }
 0x4b8   : > { %v4355_v49 = vsel %vm1885_vm1, %v8482_v52, 0  ;;  %v4344_v24 = vadd.f32 1e-05, %v4332_v8  ;;  %v4331_v12 = vmul.f32 0.03125, %v4327_v28  ;;  %v4330_v53 = vadd.f32 %v4316_v16, %v4292_v4 }
 0x4b9   : > { %v8484_v62 = vpop.eup %8483  ;;  %v10734_v35 = vand.u32 4294901760, %v4355_v49  ;;  %v4310_v43 = vadd.f32 %v4309_v29, %v4133_v10 }
 0x4ba   : > { %v4352_v51 = vsel %vm1885_vm1, %v8484_v62, 0  ;;  %8489 = vrsqrt.f32 %v4344_v24  ;;  %v4343_v55 = vadd.f32 1e-05, %v4331_v12  ;;  %v4334_v46 = vmul.f32 0.03125, %v4330_v53 }
 0x4bb   : > { %v8486_v6 = vpop.eup %8485  ;;  %v10739_v2 = vsub.f32 %v4355_v49, %v10734_v35  ;;  %v10741_v60 = vand.u32 4294901760, %v4352_v51  ;;  %v4329_v5 = vadd.f32 %v4310_v43, %v4286_v1  ;;  %v5610_v1 = vld [vmem:[#allocation3 + $0x3f8] sm:$0xff]  ;;  %v5607_v43 = vld [vmem:[#allocation3 + $0x3e0] sm:$0xff] }
 0x4bc   : > { %v4361_v58 = vsel %vm1885_vm1, %v8486_v6, 0  ;;  %8491 = vrsqrt.f32 %v4343_v55  ;;  %v4346_v14 = vadd.f32 1e-05, %v4334_v46  ;;  %v5604_v55 = vld [vmem:[#allocation3 + $0x3c8] sm:$0xff]  ;;  %v5606_v46 = vld [vmem:[#allocation3 + $0x3d8] sm:$0xff]  ;;  %v5603_v6 = vld [vmem:[#allocation3 + $0x3c0] sm:$0xff] }
 0x4bd   : > { %v8488_v38 = vpop.eup %8487  ;;  %v10744_v26 = vand.u32 4294901760, %v4361_v58  ;;  %v4333_v56 = vmul.f32 0.03125, %v4329_v5  ;;  %8233 = vmatprep.mubr.f32.mxu0 %v10741_v60  ;;  %v10748_v13 = vsub.f32 %v4352_v51, %v10741_v60  ;;  %v10751_v18 = vand.u32 4294901760, %v10739_v2  ;;  %v5609_v51 = vld [vmem:[#allocation3 + $0x3f0] sm:$0xff]  ;;  %v5602_v5 = vld [vmem:[#allocation3 + $0x3b8] sm:$0xff] }
 0x4be   : > { %v4358_v45 = vsel %vm1885_vm1, %v8488_v38, 0  ;;  %8493 = vrsqrt.f32 %v4346_v14  ;;  %8234 = vmatmul.mubr.f32.vlgmr.msra.gmra.mxu0 %v10734_v35  ;;  %v5601_v14 = vld [vmem:[#allocation3 + $0x3b0] sm:$0xff]  ;;  %v5596_v38 = vld [vmem:[#allocation3 + $0x388] sm:$0xff] }
 0x4bf   : > { %v10755_v42 = vand.u32 4294901760, %v4358_v45  ;;  %v4345_v32 = vadd.f32 1e-05, %v4333_v56  ;;  %v10758_v34 = vand.u32 4294901760, %v10748_v13  ;;  %8284 = vmatpush3.msra.mxu0 %v11802_v27  ;;  %v4454_v7 = vsub.f32 %v10739_v2, %v10751_v18  ;;  %v5595_v56 = vld [vmem:[#allocation3 + $0x380] sm:$0xff] }
 0x4c0   : > { %v10764_v41 = vsub.f32 %v4361_v58, %v10744_v26  ;;  %8335 = vmatprep.subr.mxu0 %v11802_v27  ;;  %v5599_v58 = vld [vmem:[#allocation3 + $0x3a0] sm:$0xff] }
 0x4c1   : > { %8495 = vrsqrt.f32 %v4345_v32  ;;  %8236 = vmatprep.mubr.f32.mxu0 %v10755_v42  ;;  %v4444_v30 = vsub.f32 %v10748_v13, %v10758_v34  ;;  %v10771_v47 = vsub.f32 %v4358_v45, %v10755_v42  ;;  %v4455_v0 = vand.u32 4294901760, %v4454_v7  ;;  %v5594_v45 = vld [vmem:[#allocation3 + $0x378] sm:$0xff]  ;;  %v5593_v32 = vld [vmem:[#allocation3 + $0x370] sm:$0xff]  ;;  %v5587_v7 = vld [vmem:[#allocation3 + $0x340] sm:$0xff] }
 0x4c2   : > { %8237 = vmatmul.mubr.f32.gmra.mxu0 %v10744_v26  ;;  %v10775_v57 = vand.u32 4294901760, %v10764_v41 }
 0x4c3   : > { %8239 = vmatprep.mubr.f32.mxu0 %v10741_v60  ;;  %v4445_v48 = vand.u32 4294901760, %v4444_v30  ;;  %v10779_v33 = vand.u32 4294901760, %v10771_v47  ;;  %v5584_v30 = vld [vmem:[#allocation3 + $0x328] sm:$0xff] }
 0x4c4   : > { %v4474_v59 = vsub.f32 %v10764_v41, %v10775_v57 }
 0x4c5   : > { %8207 = vmatprep.mubr.f32.mxu1 %v4445_v48  ;;  %v4464_v21 = vsub.f32 %v10771_v47, %v10779_v33 }
 0x4c6   : > { %8208 = vmatmul.mubr.f32.vlgmr.msra.gmra.mxu1 %v4455_v0  ;;  %8240 = vmatmul.mubr.f32.gmra.mxu0 %v10734_v35  ;;  %v4475_v40 = vand.u32 4294901760, %v4474_v59  ;;  %v5579_v59 = vld [vmem:[#allocation3 + $0x300] sm:$0xff] }
 0x4c7   : > { %v8490_v11 = vpop.eup %8489  ;;  %8258 = vmatpush3.msra.mxu1 %v11803_v50  ;;  %8242 = vmatprep.mubr.f32.mxu0 %v10755_v42  ;;  %v4465_v23 = vand.u32 4294901760, %v4464_v21  ;;  %v5581_v21 = vld [vmem:[#allocation3 + $0x310] sm:$0xff]  ;;  %v5578_v50 = vld [vmem:[#allocation3 + $0x2f8] sm:$0xff] }
 0x4c8   : > { %v4367_v22 = vsel %vm1885_vm1, %v8490_v11, 0  ;;  %8309 = vmatprep.subr.mxu1 %v11804_v54  ;;  %v5576_v11 = vld [vmem:[#allocation3 + $0x2e8] sm:$0xff] }
 0x4c9   : > { %v8492_v31 = vpop.eup %8491  ;;  %v10790_v3 = vand.u32 4294901760, %v4367_v22  ;;  %8210 = vmatprep.mubr.f32.mxu1 %v4465_v23 }
 0x4ca   : > { %v4364_v9 = vsel %vm1885_vm1, %v8492_v31, 0  ;;  %8211 = vmatmul.mubr.f32.gmra.mxu1 %v4475_v40  ;;  %8243 = vmatmul.mubr.f32.gmra.mxu0 %v10744_v26  ;;  %v5571_v31 = vld [vmem:[#allocation3 + $0x2c0] sm:$0xff] }
 0x4cb   : > { %v8494_v20 = vpop.eup %8493  ;;  %v10794_v15 = vand.u32 4294901760, %v4364_v9  ;;  %8213 = vmatprep.mubr.f32.mxu1 %v4445_v48  ;;  %v10797_v36 = vsub.f32 %v4367_v22, %v10790_v3  ;;  %v5585_v48 = vld [vmem:[#allocation3 + $0x330] sm:$0xff] }
 0x4cc   : > { %v4373_v37 = vsel %vm1885_vm1, %v8494_v20, 0  ;;  %v5577_v22 = vld [vmem:[#allocation3 + $0x2f0] sm:$0xff]  ;;  %v5570_v20 = vld [vmem:[#allocation3 + $0x2b8] sm:$0xff] }
 0x4cd   : > { %v10800_v39 = vand.u32 4294901760, %v4373_v37  ;;  %8245 = vmatprep.mubr.f32.mxu0 %v10794_v15  ;;  %v10804_v17 = vsub.f32 %v4364_v9, %v10794_v15  ;;  %v4533_v19 = vand.u32 4294901760, %v10797_v36  ;;  %v5568_v9 = vld [vmem:[#allocation3 + $0x2a8] sm:$0xff] }
 0x4ce   : > { %v8496_v44 = vpop.eup %8495  ;;  %8214 = vmatmul.mubr.f32.gmra.mxu1 %v4455_v0  ;;  %8246 = vmatmul.mubr.f32.gmra.mxu0 %v10790_v3  ;;  %v5582_v0 = vld [vmem:[#allocation3 + $0x318] sm:$0xff] }
 0x4cf   : > { %v4370_v25 = vsel %vm1885_vm1, %v8496_v44, 0  ;;  %8216 = vmatprep.mubr.f32.mxu1 %v4465_v23  ;;  %v4523_v4 = vand.u32 4294901760, %v10804_v17  ;;  %v10811_v63 = vsub.f32 %v4373_v37, %v10800_v39  ;;  %v4534_v8 = vsub.f32 %v10797_v36, %v4533_v19  ;;  %v5575_v23 = vld [vmem:[#allocation3 + $0x2e0] sm:$0xff]  ;;  %v5564_v37 = vld [vmem:[#allocation3 + $0x288] sm:$0xff] }
 0x4d0   : > { %v10813_v61 = vand.u32 4294901760, %v4370_v25  ;;  %v5560_v44 = vld [vmem:[#allocation3 + $0x268] sm:$0xff] }
 0x4d1   : > { %v4524_v28 = vsub.f32 %v10804_v17, %v4523_v4  ;;  %v4553_v16 = vand.u32 4294901760, %v10811_v63  ;;  %v4535_v49 = vand.u32 4294901760, %v4534_v8  ;;  %v5558_v8 = vld [vmem:[#allocation3 + $0x258] sm:$0xff] }
 0x4d2   : > { %8248 = vmatprep.mubr.f32.mxu0 %v10813_v61  ;;  %8217 = vmatmul.mubr.f32.gmra.mxu1 %v4475_v40  ;;  %v4542_v10 = vsub.f32 %v4370_v25, %v10813_v61  ;;  %v5572_v40 = vld [vmem:[#allocation3 + $0x2c8] sm:$0xff]  ;;  %v5562_v25 = vld [vmem:[#allocation3 + $0x278] sm:$0xff] }
 0x4d3   : > { %8249 = vmatmul.mubr.f32.gmra.mxu0 %v10800_v39  ;;  %v4525_v52 = vand.u32 4294901760, %v4524_v28  ;;  %v4554_v24 = vsub.f32 %v10811_v63, %v4553_v16  ;;  %v5555_v28 = vld [vmem:[#allocation3 + $0x240] sm:$0xff] }
 0x4d4   : > { %8251 = vmatprep.mubr.f32.mxu0 %v10794_v15  ;;  %v4543_v29 = vand.u32 4294901760, %v4542_v10 }
 0x4d5   : > { %8219 = vmatprep.mubr.f32.mxu1 %v4525_v52  ;;  %v4555_v62 = vand.u32 4294901760, %v4554_v24  ;;  %v5548_v24 = vld [vmem:[#allocation3 + $0x208] sm:$0xff] }
 0x4d6   : > { %8220 = vmatmul.mubr.f32.gmra.mxu1 %v4535_v49  ;;  %v4544_v12 = vsub.f32 %v4542_v10, %v4543_v29 }
 0x4d7   : > { %8252 = vmatmul.mubr.f32.gmra.mxu0 %v10790_v3 }
 0x4d8   : > { %8254 = vmatprep.mubr.f32.mxu0 %v10813_v61  ;;  %v4545_v53 = vand.u32 4294901760, %v4544_v12  ;;  %v5550_v12 = vld [vmem:[#allocation3 + $0x218] sm:$0xff] }
 0x4da   : > { %8222 = vmatprep.mubr.f32.mxu1 %v4545_v53 }
 0x4db   : > { %8223 = vmatmul.mubr.f32.gmra.mxu1 %v4555_v62  ;;  %8255 = vmatmul.mubr.f32.gmra.mxu0 %v10800_v39 }
 0x4dc   : > { %8225 = vmatprep.mubr.f32.mxu1 %v4525_v52  ;;  %8285 = vmatprep.mubr.f32.mxu0 %v10758_v34  ;;  %v5554_v52 = vld [vmem:[#allocation3 + $0x238] sm:$0xff] }
 0x4df   : > { %8226 = vmatmul.mubr.f32.gmra.mxu1 %v4535_v49  ;;  %8286 = vmatmul.mubr.f32.vlgmr.msra.gmra.mxu0 %v10751_v18  ;;  %v5551_v49 = vld [vmem:[#allocation3 + $0x220] sm:$0xff] }
 0x4e0   : > { %8228 = vmatprep.mubr.f32.mxu1 %v4545_v53  ;;  %8288 = vmatprep.mubr.f32.mxu0 %v10779_v33  ;;  %v5547_v53 = vld [vmem:[#allocation3 + $0x200] sm:$0xff] }
 0x4e1   : > { %8336 = vmatpush3.msra.mxu0 %v11802_v27  ;;  %v5590_v27 = vld [vmem:[#allocation3 + $0x358] sm:$0xff] }
 0x4e2   : > { %5700 = vmatprep.subr.mxu0 %v5610_v1  ;;  %v5545_v1 = vld [vmem:[#allocation3 + $0x1f8] sm:$0xff] }
 0x4e3   : > { %8229 = vmatmul.mubr.f32.gmra.mxu1 %v4555_v62  ;;  %8289 = vmatmul.mubr.f32.gmra.mxu0 %v10775_v57  ;;  %v5549_v62 = vld [vmem:[#allocation3 + $0x210] sm:$0xff] }
 0x4e4   : > { %8259 = vmatprep.mubr.f32.mxu1 %v10748_v13  ;;  %8291 = vmatprep.mubr.f32.mxu0 %v10758_v34  ;;  %v5588_v34 = vld [vmem:[#allocation3 + $0x348] sm:$0xff] }
 0x4e7   : > { %8260 = vmatmul.mubr.f32.vlgmr.msra.gmra.mxu1 %v10739_v2  ;;  %8292 = vmatmul.mubr.f32.gmra.mxu0 %v10751_v18  ;;  %v5592_v18 = vld [vmem:[#allocation3 + $0x368] sm:$0xff] }
 0x4e8   : > { %8310 = vmatpush3.msra.mxu1 %v11804_v54  ;;  %8262 = vmatprep.mubr.f32.mxu1 %v10771_v47  ;;  %v5574_v54 = vld [vmem:[#allocation3 + $0x2d8] sm:$0xff] }
 0x4e9   : > { %8294 = vmatprep.mubr.f32.mxu0 %v10779_v33  ;;  %v5580_v33 = vld [vmem:[#allocation3 + $0x308] sm:$0xff] }
 0x4eb   : > { %8263 = vmatmul.mubr.f32.gmra.mxu1 %v10764_v41  ;;  %8295 = vmatmul.mubr.f32.gmra.mxu0 %v10775_v57  ;;  %v5583_v57 = vld [vmem:[#allocation3 + $0x320] sm:$0xff] }
 0x4ec   : > { %8265 = vmatprep.mubr.f32.mxu1 %v10748_v13  ;;  %8297 = vmatprep.mubr.f32.mxu0 %v4523_v4  ;;  %v5597_v13 = vld [vmem:[#allocation3 + $0x390] sm:$0xff] }
 0x4ef   : > { %8266 = vmatmul.mubr.f32.gmra.mxu1 %v10739_v2  ;;  %8298 = vmatmul.mubr.f32.gmra.mxu0 %v4533_v19  ;;  %v5605_v2 = vld [vmem:[#allocation3 + $0x3d0] sm:$0xff] }
 0x4f0   : > { %8268 = vmatprep.mubr.f32.mxu1 %v10771_v47  ;;  %8300 = vmatprep.mubr.f32.mxu0 %v4543_v29  ;;  %v5586_v47 = vld [vmem:[#allocation3 + $0x338] sm:$0xff] }
 0x4f3   : > { %8269 = vmatmul.mubr.f32.gmra.mxu1 %v10764_v41  ;;  %8301 = vmatmul.mubr.f32.gmra.mxu0 %v4553_v16  ;;  %v5589_v41 = vld [vmem:[#allocation3 + $0x350] sm:$0xff] }
 0x4f4   : > { %8271 = vmatprep.mubr.f32.mxu1 %v10804_v17  ;;  %8303 = vmatprep.mubr.f32.mxu0 %v4523_v4  ;;  %v5559_v4 = vld [vmem:[#allocation3 + $0x260] sm:$0xff] }
 0x4f7   : > { %8272 = vmatmul.mubr.f32.gmra.mxu1 %v10797_v36  ;;  %8304 = vmatmul.mubr.f32.gmra.mxu0 %v4533_v19  ;;  %v5565_v19 = vld [vmem:[#allocation3 + $0x290] sm:$0xff] }
 0x4f8   : > { %8274 = vmatprep.mubr.f32.mxu1 %v4542_v10  ;;  %8306 = vmatprep.mubr.f32.mxu0 %v4543_v29  ;;  %v5553_v29 = vld [vmem:[#allocation3 + $0x230] sm:$0xff] }
 0x4fb   : > { %8275 = vmatmul.mubr.f32.gmra.mxu1 %v10811_v63  ;;  %8307 = vmatmul.mubr.f32.gmra.mxu0 %v4553_v16  ;;  %v5557_v16 = vld [vmem:[#allocation3 + $0x250] sm:$0xff] }
 0x4fc   : > { %8277 = vmatprep.mubr.f32.mxu1 %v10804_v17  ;;  %8337 = vmatprep.mubr.f32.mxu0 %v10741_v60  ;;  %v5563_v17 = vld [vmem:[#allocation3 + $0x280] sm:$0xff] }
 0x4ff   : > { %8278 = vmatmul.mubr.f32.gmra.mxu1 %v10797_v36  ;;  %8338 = vmatmul.mubr.f32.vlgmr.msra.gmra.mxu0 %v10734_v35  ;;  %v5569_v36 = vld [vmem:[#allocation3 + $0x2b0] sm:$0xff] }
 0x500   : > { %8280 = vmatprep.mubr.f32.mxu1 %v4542_v10  ;;  %8340 = vmatprep.mubr.f32.mxu0 %v10755_v42  ;;  %v5552_v10 = vld [vmem:[#allocation3 + $0x228] sm:$0xff] }
 0x501   : > { %5701 = vmatpush1.msra.mxu0 %v5609_v51 }
 0x502   : > { %5702 = vmatprep.subr.mxu0 %v5606_v46 }
 0x503   : > { %8281 = vmatmul.mubr.f32.gmra.mxu1 %v10811_v63  ;;  %8341 = vmatmul.mubr.f32.gmra.mxu0 %v10744_v26  ;;  %v5561_v63 = vld [vmem:[#allocation3 + $0x270] sm:$0xff] }
 0x504   : > { %8311 = vmatprep.mubr.f32.mxu1 %v10741_v60  ;;  %8343 = vmatprep.mubr.f32.mxu0 %v10741_v60 }
 0x505   : > { %5703 = vmatpush1.msra.mxu0 %v5605_v2 }
 0x506   : > { %5704 = vmatprep.subr.mxu0 %v5602_v5 }
 0x507   : > { %8312 = vmatmul.mubr.f32.vlgmr.msra.gmra.mxu1 %v10734_v35  ;;  %8344 = vmatmul.mubr.f32.gmra.mxu0 %v10734_v35 }
 0x508   : > { %8314 = vmatprep.mubr.f32.mxu1 %v10755_v42  ;;  %8346 = vmatprep.mubr.f32.mxu0 %v10755_v42 }
 0x509   : > { %5705 = vmatpush1.msra.mxu0 %v5601_v14 }
 0x50b   : > { %8315 = vmatmul.mubr.f32.gmra.mxu1 %v10744_v26  ;;  %8347 = vmatmul.mubr.f32.gmra.mxu0 %v10744_v26 }
 0x50c   : > { %8317 = vmatprep.mubr.f32.mxu1 %v10741_v60  ;;  %8349 = vmatprep.mubr.f32.mxu0 %v10794_v15  ;;  %v5600_v60 = vld [vmem:[#allocation3 + $0x3a8] sm:$0xff] }
 0x50f   : > { %8318 = vmatmul.mubr.f32.gmra.mxu1 %v10734_v35  ;;  %8350 = vmatmul.mubr.f32.gmra.mxu0 %v10790_v3  ;;  %v5608_v35 = vld [vmem:[#allocation3 + $0x3e8] sm:$0xff] }
 0x510   : > { %8320 = vmatprep.mubr.f32.mxu1 %v10755_v42  ;;  %8352 = vmatprep.mubr.f32.mxu0 %v10813_v61  ;;  %v5591_v42 = vld [vmem:[#allocation3 + $0x360] sm:$0xff] }
 0x511   : > { %5611 = vmatprep.subr.mxu1 %v5608_v35  ;;  %v5543_v35 = vld [vmem:[#allocation3 + $0x1e8] sm:$0xff] }
 0x512   : > { %5612 = vmatpush1.msra.mxu1 %v5607_v43  ;;  %v8624_v43 = vmov 0.0  }
 0x513   : > { %8321 = vmatmul.mubr.f32.gmra.mxu1 %v10744_v26  ;;  %8353 = vmatmul.mubr.f32.gmra.mxu0 %v10800_v39  ;;  %v5598_v26 = vld [vmem:[#allocation3 + $0x398] sm:$0xff] }
 0x514   : > { %8323 = vmatprep.mubr.f32.mxu1 %v10794_v15  ;;  %8355 = vmatprep.mubr.f32.mxu0 %v10794_v15 }
 0x515   : > { %5613 = vmatprep.subr.mxu1 %v5604_v55  ;;  %5706 = vmatprep.subr.mxu0 %v5598_v26 }
 0x516   : > { %5614 = vmatpush1.msra.mxu1 %v5603_v6  ;;  %5707 = vmatpush1.msra.mxu0 %v5597_v13 }
 0x517   : > { %8324 = vmatmul.mubr.f32.gmra.mxu1 %v10790_v3  ;;  %8356 = vmatmul.mubr.f32.gmra.mxu0 %v10790_v3 }
 0x518   : > { %8326 = vmatprep.mubr.f32.mxu1 %v10813_v61  ;;  %8358 = vmatprep.mubr.f32.mxu0 %v10813_v61 }
 0x519   : > { %5615 = vmatprep.subr.mxu1 %v5600_v60  ;;  %5708 = vmatprep.subr.mxu0 %v5594_v45 }
 0x51a   : > { %5616 = vmatpush1.msra.mxu1 %v5599_v58  ;;  %5709 = vmatpush1.msra.mxu0 %v5593_v32 }
 0x51b   : > { %8327 = vmatmul.mubr.f32.gmra.mxu1 %v10800_v39  ;;  %8359 = vmatmul.mubr.f32.gmra.mxu0 %v10800_v39 }
 0x51c   : > { %8329 = vmatprep.mubr.f32.mxu1 %v10794_v15  ;;  %5617 = vmatprep.subr.mxu1 %v5596_v38  ;;  %v5567_v15 = vld [vmem:[#allocation3 + $0x2a0] sm:$0xff] }
 0x51d   : > { %5618 = vmatpush1.msra.mxu1 %v5595_v56  ;;  %5710 = vmatprep.subr.mxu0 %v5590_v27 }
 0x51e   : > { %5619 = vmatprep.subr.mxu1 %v5592_v18  ;;  %5711 = vmatpush1.msra.mxu0 %v5589_v41 }
 0x51f   : > { %8330 = vmatmul.mubr.f32.gmra.mxu1 %v10790_v3  ;;  %5712 = vmatprep.subr.mxu0 %v5586_v47  ;;  %v5573_v3 = vld [vmem:[#allocation3 + $0x2d0] sm:$0xff] }
 0x520   : > { %8332 = vmatprep.mubr.f32.mxu1 %v10813_v61  ;;  %5620 = vmatpush1.msra.mxu1 %v5591_v42  ;;  %v5556_v61 = vld [vmem:[#allocation3 + $0x248] sm:$0xff] }
 0x521   : > { %5621 = vmatprep.subr.mxu1 %v5588_v34  ;;  %5713 = vmatpush1.msra.mxu0 %v5585_v48 }
 0x522   : > { %5622 = vmatpush1.msra.mxu1 %v5587_v7  ;;  %5714 = vmatprep.subr.mxu0 %v5582_v0 }
 0x523   : > { %8333 = vmatmul.mubr.f32.gmra.mxu1 %v10800_v39  ;;  %5623 = vmatprep.subr.mxu1 %v5584_v30  ;;  %v5566_v39 = vld [vmem:[#allocation3 + $0x298] sm:$0xff] }
 0x524   : > { %5624 = vmatpush1.msra.mxu1 %v5583_v57  ;;  %5715 = vmatpush1.msra.mxu0 %v5581_v21 }
 0x525   : > { %5625 = vmatprep.subr.mxu1 %v5580_v33  ;;  %5716 = vmatprep.subr.mxu0 %v5578_v50 }
 0x526   : > { %5626 = vmatpush1.msra.mxu1 %v5579_v59  ;;  %5717 = vmatpush1.msra.mxu0 %v5577_v22 }
 0x527   : > { %5627 = vmatprep.subr.mxu1 %v5576_v11  ;;  %5718 = vmatprep.subr.mxu0 %v5574_v54 }
 0x528   : > { %5628 = vmatpush1.msra.mxu1 %v5575_v23  ;;  %5719 = vmatpush1.msra.mxu0 %v5573_v3 }
 0x529   : > { %5629 = vmatprep.subr.mxu1 %v5572_v40  ;;  %5720 = vmatprep.subr.mxu0 %v5570_v20 }
 0x52a   : > { %5630 = vmatpush1.msra.mxu1 %v5571_v31  ;;  %5721 = vmatpush1.msra.mxu0 %v5569_v36 }
 0x52b   : > { %5631 = vmatprep.subr.mxu1 %v5568_v9  ;;  %5722 = vmatprep.subr.mxu0 %v5566_v39 }
 0x52c   : > { %5632 = vmatpush1.msra.mxu1 %v5567_v15  ;;  %5723 = vmatpush1.msra.mxu0 %v5565_v19 }
 0x52d   : > { %5633 = vmatprep.subr.mxu1 %v5564_v37  ;;  %5724 = vmatprep.subr.mxu0 %v5562_v25 }
 0x52e   : > { %5634 = vmatpush1.msra.mxu1 %v5563_v17  ;;  %5725 = vmatpush1.msra.mxu0 %v5561_v63 }
 0x52f   : > { %5635 = vmatprep.subr.mxu1 %v5560_v44  ;;  %5726 = vmatprep.subr.mxu0 %v5558_v8 }
 0x530   : > { %5636 = vmatpush1.msra.mxu1 %v5559_v4  ;;  %5727 = vmatpush1.msra.mxu0 %v5557_v16 }
 0x531   : > { %5637 = vmatprep.subr.mxu1 %v5556_v61  ;;  %5728 = vmatprep.subr.mxu0 %v5554_v52 }
 0x532   : > { %5638 = vmatpush1.msra.mxu1 %v5555_v28  ;;  %5729 = vmatpush1.msra.mxu0 %v5553_v29 }
 0x533   : > { %5639 = vmatprep.subr.mxu1 %v5552_v10  ;;  %5730 = vmatprep.subr.mxu0 %v5550_v12 }
 0x534   : > { %5640 = vmatpush1.msra.mxu1 %v5551_v49  ;;  %5731 = vmatpush1.msra.mxu0 %v5549_v62 }
 0x535   : > { %5641 = vmatprep.subr.mxu1 %v5548_v24  ;;  %5675 = vmatprep.mubr.f32.mxu1 %v8624_v43 }
 0x536   : > { %5642 = vmatpush1.msra.mxu1 %v5547_v53  ;;  %5764 = vmatprep.mubr.f32.mxu0 %v8624_v43 }
 0x537   : > { %5789 = vmatprep.subr.mxu1 %v5543_v35  ;;  %5878 = vmatprep.subr.mxu0 %v5545_v1 }
 0x57e   : > { %v8235_v51 = vpop.f32.mrf.mxu0 }
 0x580   : > { %v4673_v55 = vpop.f32.mrf.mxu0 }
 0x582   : > { %v8238_v46 = vpop.f32.mrf.mxu0 }
 0x584   : > { %v4685_v6 = vpop.f32.mrf.mxu0 }
 0x586   : > { %v8209_v2 = vpop.f32.mrf.mxu1  ;;  %v8241_v60 = vpop.f32.mrf.mxu0 }
 0x587   : > { %v4680_v5 = vadd.f32 %v8235_v51, %v8209_v2 }
 0x588   : > { %v4447_v58 = vpop.f32.mrf.mxu1  ;;  %v10884_v14 = vpop.f32.mrf.mxu0 }
 0x589   : > { %v4674_v38 = vadd.f32 %v4673_v55, %v4447_v58 }
 0x58a   : > { %v8212_v26 = vpop.f32.mrf.mxu1  ;;  %v8244_v56 = vpop.f32.mrf.mxu0 }
 0x58b   : > { %v4692_v13 = vadd.f32 %v8238_v46, %v8212_v26 }
 0x58c   : > { %v4467_v18 = vpop.f32.mrf.mxu1  ;;  %v4709_v45 = vpop.f32.mrf.mxu0 }
 0x58d   : > { %v4686_v42 = vadd.f32 %v4685_v6, %v4467_v18 }
 0x58e   : > { %v8215_v32 = vpop.f32.mrf.mxu1  ;;  %v8247_v34 = vpop.f32.mrf.mxu0 }
 0x58f   : > { %v10886_v27 = vadd.f32 %v8241_v60, %v8215_v32 }
 0x590   : > { %v10888_v7 = vpop.f32.mrf.mxu1  ;;  %v4721_v41 = vpop.f32.mrf.mxu0 }
 0x592   : > { %v8218_v30 = vpop.f32.mrf.mxu1 }
 0x593   : > { %v10890_v47 = vadd.f32 %v8244_v56, %v8218_v30  ;;  %v8250_v57 = vpop.f32.mrf.mxu0 }
 0x594   : > { %v4507_v48 = vpop.f32.mrf.mxu1 }
 0x595   : > { %v10892_v33 = vadd.f32 %v4709_v45, %v4507_v48  ;;  %v4733_v0 = vpop.f32.mrf.mxu0 }
 0x596   : > { %v8221_v59 = vpop.f32.mrf.mxu1 }
 0x597   : > { %v4728_v21 = vadd.f32 %v8247_v34, %v8221_v59  ;;  %v8253_v11 = vpop.f32.mrf.mxu0 }
 0x598   : > { %v4527_v50 = vpop.f32.mrf.mxu1 }
 0x599   : > { %v4722_v23 = vadd.f32 %v4721_v41, %v4527_v50  ;;  %v4745_v22 = vpop.f32.mrf.mxu0 }
 0x59b   : > { %v8224_v40 = vpop.f32.mrf.mxu1  ;;  %v8256_v54 = vpop.f32.mrf.mxu0 }
 0x59c   : > { %v4740_v31 = vadd.f32 %v8250_v57, %v8224_v40 }
 0x59d   : > { %v4547_v3 = vpop.f32.mrf.mxu1  ;;  %v4757_v9 = vpop.f32.mrf.mxu0 }
 0x59e   : > { %v4734_v20 = vadd.f32 %v4733_v0, %v4547_v3 }
 0x59f   : > { %v8227_v15 = vpop.f32.mrf.mxu1  ;;  %v8287_v36 = vpop.f32.mrf.mxu0 }
 0x5a0   : > { %v4752_v37 = vadd.f32 %v8253_v11, %v8227_v15 }
 0x5a1   : > { %v4567_v39 = vpop.f32.mrf.mxu1  ;;  %v5016_v17 = vpop.f32.mrf.mxu0 }
 0x5a2   : > { %v4746_v19 = vadd.f32 %v4745_v22, %v4567_v39 }
 0x5a3   : > { %v8230_v44 = vpop.f32.mrf.mxu1  ;;  %v8290_v25 = vpop.f32.mrf.mxu0 }
 0x5a4   : > { %v4764_v4 = vadd.f32 %v8256_v54, %v8230_v44 }
 0x5a5   : > { %v4587_v63 = vpop.f32.mrf.mxu1  ;;  %v5032_v61 = vpop.f32.mrf.mxu0 }
 0x5a6   : > { %v4758_v8 = vadd.f32 %v4757_v9, %v4587_v63 }
 0x5a7   : > { %v8261_v28 = vpop.f32.mrf.mxu1  ;;  %v10894_v16 = vpop.f32.mrf.mxu0 }
 0x5a8   : > { %v4845_v10 = vadd.f32 %v8261_v28, %v4680_v5 }
 0x5a9   : > { %v4837_v52 = vpop.f32.mrf.mxu1  ;;  %v5048_v49 = vpop.f32.mrf.mxu0 }
 0x5aa   : > { %v4838_v29 = vadd.f32 %v4837_v52, %v4674_v38  ;;  %v10896_v24 = vadd.f32 %v8287_v36, %v4845_v10 }
 0x5ab   : > { %v8264_v12 = vpop.f32.mrf.mxu1  ;;  %v10898_v53 = vpop.f32.mrf.mxu0 }
 0x5ac   : > { %v4859_v62 = vadd.f32 %v8264_v12, %v4692_v13  ;;  %v10900_v35 = vadd.f32 %v5016_v17, %v4838_v29 }
 0x5ad   : > { %v4851_v1 = vpop.f32.mrf.mxu1  ;;  %v10902_v51 = vpop.f32.mrf.mxu0 }
 0x5ae   : > { %v4852_v55 = vadd.f32 %v4851_v1, %v4686_v42  ;;  %v10904_v46 = vadd.f32 %v8290_v25, %v4859_v62 }
 0x5af   : > { %v8267_v6 = vpop.f32.mrf.mxu1  ;;  %v8299_v2 = vpop.f32.mrf.mxu0 }
 0x5b0   : > { %v10906_v60 = vadd.f32 %v5032_v61, %v4852_v55 }
 0x5b1   : > { %v4865_v5 = vpop.f32.mrf.mxu1  ;;  %v5080_v58 = vpop.f32.mrf.mxu0 }
 0x5b3   : > { %v10908_v38 = vpop.f32.mrf.mxu1  ;;  %v8302_v26 = vpop.f32.mrf.mxu0 }
 0x5b5   : > { %v4879_v56 = vpop.f32.mrf.mxu1  ;;  %v5096_v18 = vpop.f32.mrf.mxu0 }
 0x5b7   : > { %v8273_v13 = vpop.f32.mrf.mxu1  ;;  %v8305_v45 = vpop.f32.mrf.mxu0 }
 0x5b8   : > { %v4901_v32 = vadd.f32 %v8273_v13, %v4728_v21 }
 0x5b9   : > { %v4893_v34 = vpop.f32.mrf.mxu1  ;;  %v5112_v41 = vpop.f32.mrf.mxu0 }
 0x5ba   : > { %v4894_v30 = vadd.f32 %v4893_v34, %v4722_v23  ;;  %v10910_v42 = vadd.f32 %v8299_v2, %v4901_v32  ;;  %v11805_v32 = vld [vmem:[#allocation107_spill] sm:$0xff] }
 0x5bb   : > { %v8276_v57 = vpop.f32.mrf.mxu1  ;;  %v8308_v48 = vpop.f32.mrf.mxu0 }
 0x5bc   : > { %v4915_v0 = vadd.f32 %v8276_v57, %v4740_v31  ;;  %v10912_v59 = vadd.f32 %v5080_v58, %v4894_v30  ;;  %v5539_v57 = vld [vmem:[#allocation3 + $0x1c8] sm:$0xff] }
 0x5bd   : > { %v4907_v11 = vpop.f32.mrf.mxu1  ;;  %v5128_v50 = vpop.f32.mrf.mxu0 }
 0x5be   : > { %v4908_v22 = vadd.f32 %v4907_v11, %v4734_v20  ;;  %v10914_v40 = vadd.f32 %v8302_v26, %v4915_v0  ;;  %v5535_v11 = vld [vmem:[#allocation3 + $0x1a8] sm:$0xff] }
 0x5bf   : > { %v8279_v54 = vpop.f32.mrf.mxu1  ;;  %v10916_v3 = vpop.f32.mrf.mxu0 }
 0x5c0   : > { %v4929_v9 = vadd.f32 %v8279_v54, %v4752_v37  ;;  %v10918_v21 = vadd.f32 %v5096_v18, %v4908_v22  ;;  %v11806_v22 = vld [vmem:[#allocation105_spill] sm:$0xff] }
 0x5c1   : > { %v4921_v15 = vpop.f32.mrf.mxu1  ;;  %v10922_v39 = vpop.f32.mrf.mxu0 }
 0x5c2   : > { %v4922_v23 = vadd.f32 %v4921_v15, %v4746_v19  ;;  %v10920_v36 = vadd.f32 %v8305_v45, %v4929_v9  ;;  %v4698_v19 = vadd.f32 %v10884_v14, %v10888_v7  ;;  %v4880_v14 = vadd.f32 %v4879_v56, %v10892_v33  ;;  %v5536_v9 = vld [vmem:[#allocation3 + $0x1b0] sm:$0xff] }
 0x5c3   : > { %v8282_v31 = vpop.f32.mrf.mxu1  ;;  %v10928_v61 = vpop.f32.mrf.mxu0  ;;  %v4887_v33 = vadd.f32 %v10908_v38, %v10890_v47  ;;  %v5533_v47 = vld [vmem:[#allocation3 + $0x198] sm:$0xff] }
 0x5c4   : > { %v4943_v17 = vadd.f32 %v8282_v31, %v4764_v4  ;;  %v10924_v44 = vadd.f32 %v5112_v41, %v4922_v23  ;;  %v4866_v29 = vadd.f32 %v4865_v5, %v4698_v19  ;;  %v5542_v5 = vld [vmem:[#allocation3 + $0x1e0] sm:$0xff]  ;;  %v5544_v41 = vld [vmem:[#allocation3 + $0x1f0] sm:$0xff]  ;;  %v5531_v23 = vld [vmem:[#allocation3 + $0x188] sm:$0xff] }
 0x5c5   : > { %v4935_v25 = vpop.f32.mrf.mxu1  ;;  %v10938_v52 = vpop.f32.mrf.mxu0  ;;  %v5073_v38 = vadd.f32 %v10898_v53, %v4887_v33  ;;  %v5527_v19 = vld [vmem:[#allocation3 + $0x168] sm:$0xff]  ;;  %v5526_v53 = vld [vmem:[#allocation3 + $0x160] sm:$0xff] }
 0x5c6   : > { %v4936_v20 = vadd.f32 %v4935_v25, %v4758_v8  ;;  %v10926_v63 = vadd.f32 %v8308_v48, %v4943_v17  ;;  %v4873_v8 = vadd.f32 %v8267_v6, %v10886_v27  ;;  %v5049_v55 = vadd.f32 %v5048_v49, %v4866_v29  ;;  %v5541_v27 = vld [vmem:[#allocation3 + $0x1d8] sm:$0xff]  ;;  %v5540_v48 = vld [vmem:[#allocation3 + $0x1d0] sm:$0xff]  ;;  %v5530_v17 = vld [vmem:[#allocation3 + $0x180] sm:$0xff] }
 0x5c7   : > { %v10930_v28 = vpop.f32.mrf.mxu1  ;;  %v8345_v62 = vpop.f32.mrf.mxu0  ;;  %v5065_v49 = vadd.f32 %v10902_v51, %v4880_v14  ;;  %v5534_v51 = vld [vmem:[#allocation3 + $0x1a0] sm:$0xff]  ;;  %v5532_v25 = vld [vmem:[#allocation3 + $0x190] sm:$0xff]  ;;  %v5529_v29 = vld [vmem:[#allocation3 + $0x178] sm:$0xff] }
 0x5c8   : > { %v10932_v37 = vadd.f32 %v5128_v50, %v4936_v20  ;;  %v5057_v58 = vadd.f32 %v10894_v16, %v4873_v8  ;;  %v5538_v16 = vld [vmem:[#allocation3 + $0x1c0] sm:$0xff]  ;;  %v5537_v50 = vld [vmem:[#allocation3 + $0x1b8] sm:$0xff] }
 0x5c9   : > { %v10934_v10 = vpop.f32.mrf.mxu1  ;;  %v5396_v18 = vpop.f32.mrf.mxu0  ;;  %v11807_v8 = vld [vmem:[#allocation37_spill] sm:$0xff]  ;;  %v5506_v33 = vld [vmem:[#allocation3 + $0xc0] sm:$0xff] }
 0x5ca   : > { %v5521_v14 = vld [vmem:[#allocation3 + $0x138] sm:$0xff] }
 0x5cb   : > { %v10940_v4 = vpop.f32.mrf.mxu1  ;;  %v8348_v0 = vpop.f32.mrf.mxu0 }
 0x5cd   : > { %v10942_v12 = vpop.f32.mrf.mxu1  ;;  %v5408_v15 = vpop.f32.mrf.mxu0 }
 0x5cf   : > { %v8319_v1 = vpop.f32.mrf.mxu1 }
 0x5d0   : > { %v5241_v7 = vadd.f32 %v8319_v1, %v5057_v58  ;;  %v5528_v1 = vld [vmem:[#allocation3 + $0x170] sm:$0xff] }
 0x5d1   : > { %v5234_v2 = vpop.f32.mrf.mxu1 }
 0x5d2   : > { %v5235_v26 = vadd.f32 %v5234_v2, %v5049_v55  ;;  %v5403_v6 = vadd.f32 %v8345_v62, %v5241_v7  ;;  %v5523_v55 = vld [vmem:[#allocation3 + $0x148] sm:$0xff]  ;;  %v5525_v2 = vld [vmem:[#allocation3 + $0x158] sm:$0xff]  ;;  %v11808_v7 = vld [vmem:[#allocation36_spill] sm:$0xff] }
 0x5d3   : > { %v8322_v13 = vpop.f32.mrf.mxu1 }
 0x5d4   : > { %v5397_v45 = vadd.f32 %v5396_v18, %v5235_v26  ;;  %v5471_v54 = vmul.f32 %v5403_v6, %v11806_v22  ;;  %v5253_v20 = vadd.f32 %v8322_v13, %v5073_v38  ;;  %v5522_v26 = vld [vmem:[#allocation3 + $0x140] sm:$0xff]  ;;  %v5524_v18 = vld [vmem:[#allocation3 + $0x150] sm:$0xff]  ;;  %v5519_v13 = vld [vmem:[#allocation3 + $0x128] sm:$0xff] }
 0x5d5   : > { %v5246_v30 = vpop.f32.mrf.mxu1  ;;  %v5513_v6 = vld [vmem:[#allocation3 + $0xf8] sm:$0xff]  ;;  %v5502_v22 = vld [vmem:[#allocation3 + $0xa0] sm:$0xff] }
 0x5d6   : > { %v5470_v34 = vmul.f32 %v5397_v45, %v11805_v32  ;;  %v5247_v56 = vadd.f32 %v5246_v30, %v5065_v49  ;;  %v5415_v58 = vadd.f32 %v8348_v0, %v5253_v20  ;;  %v5518_v32 = vld [vmem:[#allocation3 + $0x120] sm:$0xff]  ;;  %v5509_v0 = vld [vmem:[#allocation3 + $0xd8] sm:$0xff]  ;;  %v5491_v20 = vld [vmem:[#allocation3 + $0x48] sm:$0xff] }
 0x5d7   : > { %v5514_v30 = vld [vmem:[#allocation3 + $0x100] sm:$0xff]  ;;  %v5497_v38 = vld [vmem:[#allocation3 + $0x78] sm:$0xff] }
 0x5d8   : > { %5676 = vmatmul.mubr.f32.vlgmr.msra.gmra.mxu1 %v5470_v34  ;;  %5765 = vmatmul.mubr.f32.vlgmr.msra.gmra.mxu0 %v5470_v34  ;;  %v5409_v31 = vadd.f32 %v5408_v15, %v5247_v56  ;;  %v5473_v45 = vmul.f32 %v5415_v58, %v11808_v7  ;;  %v5520_v34 = vld [vmem:[#allocation3 + $0x130] sm:$0xff]  ;;  %v5510_v49 = vld [vmem:[#allocation3 + $0xe0] sm:$0xff]  ;;  %v6031_v7 = vld [vmem:[#allocation3 + $0x5f8] sm:$0xff] }
 0x5d9   : > { %5790 = vmatpush1.msra.mxu1 %v5542_v5  ;;  %5879 = vmatpush1.msra.mxu0 %v5544_v41  ;;  %v5515_v5 = vld [vmem:[#allocation3 + $0x108] sm:$0xff]  ;;  %v5517_v41 = vld [vmem:[#allocation3 + $0x118] sm:$0xff]  ;;  %v5508_v56 = vld [vmem:[#allocation3 + $0xd0] sm:$0xff] }
 0x5da   : > { %5791 = vmatprep.subr.mxu1 %v5539_v57  ;;  %5880 = vmatprep.subr.mxu0 %v5541_v27  ;;  %v5472_v62 = vmul.f32 %v5409_v31, %v11807_v8  ;;  %v5516_v57 = vld [vmem:[#allocation3 + $0x110] sm:$0xff]  ;;  %v5511_v27 = vld [vmem:[#allocation3 + $0xe8] sm:$0xff]  ;;  %v5498_v15 = vld [vmem:[#allocation3 + $0x80] sm:$0xff] }
 0x5db   : > { %5792 = vmatpush1.msra.mxu1 %v5538_v16  ;;  %5881 = vmatpush1.msra.mxu0 %v5540_v48  ;;  %v5512_v16 = vld [vmem:[#allocation3 + $0xf0] sm:$0xff]  ;;  %v5507_v48 = vld [vmem:[#allocation3 + $0xc8] sm:$0xff]  ;;  %v5494_v31 = vld [vmem:[#allocation3 + $0x60] sm:$0xff] }
 0x5dc   : > { %5681 = vmatprep.mubr.f32.mxu1 %v8624_v43  ;;  %5770 = vmatprep.mubr.f32.mxu0 %v8624_v43  ;;  %v5492_v8 = vld [vmem:[#allocation3 + $0x50] sm:$0xff]  ;;  %v5482_v58 = vld [vmem:[#allocation3] sm:$0xff] }
 0x5dd   : > { %5793 = vmatprep.subr.mxu1 %v5535_v11  ;;  %5882 = vmatprep.subr.mxu0 %v5537_v50  ;;  %v5503_v11 = vld [vmem:[#allocation3 + $0xa8] sm:$0xff]  ;;  %v5505_v50 = vld [vmem:[#allocation3 + $0xb8] sm:$0xff] }
 0x5de   : > { %5682 = vmatmul.mubr.f32.gmra.mxu1 %v5471_v54  ;;  %5771 = vmatmul.mubr.f32.gmra.mxu0 %v5471_v54  ;;  %v5504_v54 = vld [vmem:[#allocation3 + $0xb0] sm:$0xff] }
 0x5df   : > { %5794 = vmatpush1.msra.mxu1 %v5534_v51  ;;  %5883 = vmatpush1.msra.mxu0 %v5536_v9  ;;  %v5499_v51 = vld [vmem:[#allocation3 + $0x88] sm:$0xff]  ;;  %v5501_v9 = vld [vmem:[#allocation3 + $0x98] sm:$0xff] }
 0x5e0   : > { %5795 = vmatprep.subr.mxu1 %v5531_v23  ;;  %5884 = vmatprep.subr.mxu0 %v5533_v47  ;;  %v5500_v23 = vld [vmem:[#allocation3 + $0x90] sm:$0xff]  ;;  %v5495_v47 = vld [vmem:[#allocation3 + $0x68] sm:$0xff] }
 0x5e1   : > { %5796 = vmatpush1.msra.mxu1 %v5530_v17  ;;  %5885 = vmatpush1.msra.mxu0 %v5532_v25  ;;  %v5496_v17 = vld [vmem:[#allocation3 + $0x70] sm:$0xff]  ;;  %v5211_v25 = vadd.f32 %v10934_v10, %v10900_v35  ;;  %v5483_v35 = vld [vmem:[#allocation3 + $0x8] sm:$0xff]  ;;  %v5485_v10 = vld [vmem:[#allocation3 + $0x18] sm:$0xff] }
 0x5e2   : > { %5687 = vmatprep.mubr.f32.mxu1 %v8624_v43  ;;  %5776 = vmatprep.mubr.f32.mxu0 %v8624_v43 }
 0x5e3   : > { %5797 = vmatprep.subr.mxu1 %v5527_v19  ;;  %5886 = vmatprep.subr.mxu0 %v5529_v29  ;;  %v5493_v19 = vld [vmem:[#allocation3 + $0x58] sm:$0xff]  ;;  %v5490_v29 = vld [vmem:[#allocation3 + $0x40] sm:$0xff] }
 0x5e4   : > { %5688 = vmatmul.mubr.f32.gmra.mxu1 %v5472_v62  ;;  %5777 = vmatmul.mubr.f32.gmra.mxu0 %v5472_v62  ;;  %v5487_v62 = vld [vmem:[#allocation3 + $0x28] sm:$0xff] }
 0x5e5   : > { %5798 = vmatpush1.msra.mxu1 %v5526_v53  ;;  %5887 = vmatpush1.msra.mxu0 %v5528_v1  ;;  %v5489_v53 = vld [vmem:[#allocation3 + $0x38] sm:$0xff]  ;;  %v5486_v1 = vld [vmem:[#allocation3 + $0x20] sm:$0xff] }
 0x5e6   : > { %5799 = vmatprep.subr.mxu1 %v5523_v55  ;;  %5888 = vmatprep.subr.mxu0 %v5525_v2  ;;  %v5488_v55 = vld [vmem:[#allocation3 + $0x30] sm:$0xff]  ;;  %v5373_v2 = vadd.f32 %v10922_v39, %v5211_v25  ;;  %v6029_v39 = vld [vmem:[#allocation3 + $0x5e8] sm:$0xff] }
 0x5e7   : > { %5800 = vmatpush1.msra.mxu1 %v5522_v26  ;;  %5889 = vmatpush1.msra.mxu0 %v5524_v18  ;;  %v5217_v26 = vadd.f32 %v10930_v28, %v10896_v24  ;;  %v5484_v18 = vld [vmem:[#allocation3 + $0x10] sm:$0xff]  ;;  %v6025_v24 = vld [vmem:[#allocation3 + $0x5c8] sm:$0xff]  ;;  %v6027_v28 = vld [vmem:[#allocation3 + $0x5d8] sm:$0xff] }
 0x5e8   : > { %5693 = vmatprep.mubr.f32.mxu1 %v8624_v43  ;;  %5782 = vmatprep.mubr.f32.mxu0 %v8624_v43  ;;  %v6006_v25 = vld [vmem:[#allocation3 + $0x530] sm:$0xff] }
 0x5e9   : > { %5801 = vmatprep.subr.mxu1 %v5519_v13  ;;  %5890 = vmatprep.subr.mxu0 %v5521_v14  ;;  %v11809_v13 = vld [vmem:[#allocation91_spill] sm:$0xff] }
 0x5ea   : > { %5694 = vmatmul.mubr.f32.gmra.mxu1 %v5473_v45  ;;  %5783 = vmatmul.mubr.f32.gmra.mxu0 %v5473_v45  ;;  %v5466_v14 = vmul.f32 %v5373_v2, %v11809_v13  ;;  %v6028_v45 = vld [vmem:[#allocation3 + $0x5e0] sm:$0xff]  ;;  %v5993_v2 = vld [vmem:[#allocation3 + $0x4c8] sm:$0xff]  ;;  %v5991_v13 = vld [vmem:[#allocation3 + $0x4b8] sm:$0xff] }
 0x5eb   : > { %5802 = vmatpush1.msra.mxu1 %v5518_v32  ;;  %5891 = vmatpush1.msra.mxu0 %v5520_v34  ;;  %v6030_v32 = vld [vmem:[#allocation3 + $0x5f0] sm:$0xff]  ;;  %v5379_v34 = vadd.f32 %v10916_v3, %v5217_v26  ;;  %v6021_v3 = vld [vmem:[#allocation3 + $0x5a8] sm:$0xff] }
 0x5ec   : > { %5803 = vmatprep.subr.mxu1 %v5515_v5  ;;  %5892 = vmatprep.subr.mxu0 %v5517_v41  ;;  %v5223_v5 = vadd.f32 %v10942_v12, %v10906_v60  ;;  %v6024_v41 = vld [vmem:[#allocation3 + $0x5c0] sm:$0xff]  ;;  %v6017_v12 = vld [vmem:[#allocation3 + $0x588] sm:$0xff]  ;;  %v5994_v26 = vld [vmem:[#allocation3 + $0x4d0] sm:$0xff] }
 0x5ed   : > { %5804 = vmatpush1.msra.mxu1 %v5514_v30  ;;  %5893 = vmatpush1.msra.mxu0 %v5516_v57  ;;  %v6026_v30 = vld [vmem:[#allocation3 + $0x5d0] sm:$0xff]  ;;  %v11810_v57 = vld [vmem:[#allocation110_spill] sm:$0xff] }
 0x5ee   : > { %5805 = vmatprep.subr.mxu1 %v5511_v27  ;;  %5894 = vmatprep.subr.mxu0 %v5513_v6  ;;  %v5467_v27 = vmul.f32 %v5379_v34, %v11810_v57  ;;  %v6023_v6 = vld [vmem:[#allocation3 + $0x5b8] sm:$0xff]  ;;  %v5385_v60 = vadd.f32 %v10938_v52, %v5223_v5  ;;  %v6013_v52 = vld [vmem:[#allocation3 + $0x568] sm:$0xff]  ;;  %v5984_v34 = vld [vmem:[#allocation3 + $0x480] sm:$0xff] }
 0x5ef   : > { %5806 = vmatpush1.msra.mxu1 %v5510_v49  ;;  %5895 = vmatpush1.msra.mxu0 %v5512_v16  ;;  %v6020_v49 = vld [vmem:[#allocation3 + $0x5a0] sm:$0xff]  ;;  %v6022_v16 = vld [vmem:[#allocation3 + $0x5b0] sm:$0xff]  ;;  %v5983_v5 = vld [vmem:[#allocation3 + $0x478] sm:$0xff] }
 0x5f0   : > { %5807 = vmatprep.subr.mxu1 %v5507_v48  ;;  %5896 = vmatprep.subr.mxu0 %v5509_v0  ;;  %v6019_v48 = vld [vmem:[#allocation3 + $0x598] sm:$0xff]  ;;  %v5229_v0 = vadd.f32 %v10940_v4, %v10904_v46  ;;  %v6009_v4 = vld [vmem:[#allocation3 + $0x548] sm:$0xff]  ;;  %v5982_v57 = vld [vmem:[#allocation3 + $0x470] sm:$0xff] }
 0x5f1   : > { %5808 = vmatpush1.msra.mxu1 %v5506_v33  ;;  %5897 = vmatpush1.msra.mxu0 %v5508_v56  ;;  %v6016_v33 = vld [vmem:[#allocation3 + $0x580] sm:$0xff]  ;;  %v6018_v56 = vld [vmem:[#allocation3 + $0x590] sm:$0xff] }
 0x5f2   : > { %5809 = vmatprep.subr.mxu1 %v5503_v11  ;;  %5898 = vmatprep.subr.mxu0 %v5505_v50  ;;  %v11811_v11 = vld [vmem:[#allocation96_spill] sm:$0xff]  ;;  %v5391_v46 = vadd.f32 %v10928_v61, %v5229_v0  ;;  %v6007_v61 = vld [vmem:[#allocation3 + $0x538] sm:$0xff]  ;;  %v5972_v0 = vld [vmem:[#allocation3 + $0x420] sm:$0xff] }
 0x5f3   : > { %5810 = vmatpush1.msra.mxu1 %v5502_v22  ;;  %5899 = vmatpush1.msra.mxu0 %v5504_v54  ;;  %v5468_v50 = vmul.f32 %v5385_v60, %v11811_v11  ;;  %v6015_v22 = vld [vmem:[#allocation3 + $0x578] sm:$0xff]  ;;  %v6012_v54 = vld [vmem:[#allocation3 + $0x560] sm:$0xff]  ;;  %v5973_v60 = vld [vmem:[#allocation3 + $0x428] sm:$0xff] }
 0x5f4   : > { %5811 = vmatprep.subr.mxu1 %v5499_v51  ;;  %5900 = vmatprep.subr.mxu0 %v5501_v9  ;;  %v6014_v51 = vld [vmem:[#allocation3 + $0x570] sm:$0xff]  ;;  %v6011_v9 = vld [vmem:[#allocation3 + $0x558] sm:$0xff] }
 0x5f5   : > { %5812 = vmatpush1.msra.mxu1 %v5498_v15  ;;  %5901 = vmatpush1.msra.mxu0 %v5500_v23  ;;  %v6008_v15 = vld [vmem:[#allocation3 + $0x540] sm:$0xff]  ;;  %v6010_v23 = vld [vmem:[#allocation3 + $0x550] sm:$0xff]  ;;  %v5971_v11 = vld [vmem:[#allocation3 + $0x418] sm:$0xff] }
 0x5f6   : > { %5813 = vmatprep.subr.mxu1 %v5495_v47  ;;  %5902 = vmatprep.subr.mxu0 %v5497_v38  ;;  %v11812_v47 = vld [vmem:[#allocation101_spill] sm:$0xff] }
 0x5f7   : > { %5814 = vmatpush1.msra.mxu1 %v5494_v31  ;;  %5903 = vmatpush1.msra.mxu0 %v5496_v17  ;;  %v5469_v38 = vmul.f32 %v5391_v46, %v11812_v47  ;;  %v6005_v31 = vld [vmem:[#allocation3 + $0x528] sm:$0xff]  ;;  %v6004_v17 = vld [vmem:[#allocation3 + $0x520] sm:$0xff]  ;;  %v6289_v47 = vld [vmem:[#allocation3 + $0x7f0] sm:$0xff] }
 0x5f8   : > { %5815 = vmatprep.subr.mxu1 %v5491_v20  ;;  %5904 = vmatprep.subr.mxu0 %v5493_v19  ;;  %v6001_v20 = vld [vmem:[#allocation3 + $0x508] sm:$0xff]  ;;  %v6003_v19 = vld [vmem:[#allocation3 + $0x518] sm:$0xff] }
 0x5f9   : > { %5816 = vmatpush1.msra.mxu1 %v5490_v29  ;;  %5905 = vmatpush1.msra.mxu0 %v5492_v8  ;;  %v6000_v29 = vld [vmem:[#allocation3 + $0x500] sm:$0xff]  ;;  %v6002_v8 = vld [vmem:[#allocation3 + $0x510] sm:$0xff] }
 0x5fa   : > { %5817 = vmatprep.subr.mxu1 %v5487_v62  ;;  %5906 = vmatprep.subr.mxu0 %v5489_v53  ;;  %v5997_v62 = vld [vmem:[#allocation3 + $0x4e8] sm:$0xff]  ;;  %v5999_v53 = vld [vmem:[#allocation3 + $0x4f8] sm:$0xff] }
 0x5fb   : > { %5818 = vmatpush1.msra.mxu1 %v5486_v1  ;;  %5907 = vmatpush1.msra.mxu0 %v5488_v55  ;;  %v5996_v1 = vld [vmem:[#allocation3 + $0x4e0] sm:$0xff]  ;;  %v5998_v55 = vld [vmem:[#allocation3 + $0x4f0] sm:$0xff] }
 0x5fc   : > { %5819 = vmatprep.subr.mxu1 %v5483_v35  ;;  %5908 = vmatprep.subr.mxu0 %v5485_v10  ;;  %v5995_v35 = vld [vmem:[#allocation3 + $0x4d8] sm:$0xff]  ;;  %v8325_v10 = vpop.f32.mrf.mxu1 }
 0x5fd   : > { %5820 = vmatpush1.msra.mxu1 %v5482_v58  ;;  %5853 = vmatprep.mubr.f32.mxu1 %v8624_v43  ;;  %v5992_v58 = vld [vmem:[#allocation3 + $0x4c0] sm:$0xff] }
 0x5fe   : > { %5909 = vmatpush1.msra.mxu0 %v5484_v18  ;;  %5942 = vmatprep.mubr.f32.mxu0 %v8624_v43  ;;  %v5989_v18 = vld [vmem:[#allocation3 + $0x4a8] sm:$0xff] }
 0x5ff   : > { %5854 = vmatmul.mubr.f32.vlgmr.msra.gmra.mxu1 %v5466_v14  ;;  %5943 = vmatmul.mubr.f32.vlgmr.msra.gmra.mxu0 %v5466_v14  ;;  %v5988_v14 = vld [vmem:[#allocation3 + $0x4a0] sm:$0xff] }
 0x600   : > { %6032 = vmatprep.subr.mxu1 %v6029_v39  ;;  %6121 = vmatprep.subr.mxu0 %v6031_v7  ;;  %v5990_v39 = vld [vmem:[#allocation3 + $0x4b0] sm:$0xff]  ;;  %v5985_v7 = vld [vmem:[#allocation3 + $0x488] sm:$0xff] }
 0x601   : > { %6033 = vmatpush1.msra.mxu1 %v6028_v45  ;;  %6122 = vmatpush1.msra.mxu0 %v6030_v32  ;;  %v5987_v45 = vld [vmem:[#allocation3 + $0x498] sm:$0xff]  ;;  %v5258_v32 = vpop.f32.mrf.mxu1 }
 0x602   : > { %6034 = vmatprep.subr.mxu1 %v6025_v24  ;;  %6123 = vmatprep.subr.mxu0 %v6027_v28  ;;  %v5986_v24 = vld [vmem:[#allocation3 + $0x490] sm:$0xff]  ;;  %v5981_v28 = vld [vmem:[#allocation3 + $0x468] sm:$0xff] }
 0x603   : > { %5859 = vmatprep.mubr.f32.mxu1 %v8624_v43  ;;  %5948 = vmatprep.mubr.f32.mxu0 %v8624_v43 }
 0x604   : > { %6035 = vmatpush1.msra.mxu1 %v6024_v41  ;;  %6124 = vmatpush1.msra.mxu0 %v6026_v30  ;;  %v8351_v41 = vpop.f32.mrf.mxu0  ;;  %v5980_v30 = vld [vmem:[#allocation3 + $0x460] sm:$0xff] }
 0x605   : > { %5860 = vmatmul.mubr.f32.gmra.mxu1 %v5467_v27  ;;  %5949 = vmatmul.mubr.f32.gmra.mxu0 %v5467_v27  ;;  %v5259_v27 = vadd.f32 %v5258_v32, %v10912_v59  ;;  %v5969_v59 = vld [vmem:[#allocation3 + $0x408] sm:$0xff] }
 0x606   : > { %6036 = vmatprep.subr.mxu1 %v6021_v3  ;;  %6125 = vmatprep.subr.mxu0 %v6023_v6  ;;  %v5977_v3 = vld [vmem:[#allocation3 + $0x448] sm:$0xff]  ;;  %v5979_v6 = vld [vmem:[#allocation3 + $0x458] sm:$0xff] }
 0x607   : > { %6037 = vmatpush1.msra.mxu1 %v6020_v49  ;;  %6126 = vmatpush1.msra.mxu0 %v6022_v16  ;;  %v5976_v49 = vld [vmem:[#allocation3 + $0x440] sm:$0xff]  ;;  %v5978_v16 = vld [vmem:[#allocation3 + $0x450] sm:$0xff] }
 0x608   : > { %6038 = vmatprep.subr.mxu1 %v6017_v12  ;;  %6127 = vmatprep.subr.mxu0 %v6019_v48  ;;  %v5975_v12 = vld [vmem:[#allocation3 + $0x438] sm:$0xff]  ;;  %v5420_v48 = vpop.f32.mrf.mxu0 }
 0x609   : > { %5865 = vmatprep.mubr.f32.mxu1 %v8624_v43  ;;  %5954 = vmatprep.mubr.f32.mxu0 %v8624_v43 }
 0x60a   : > { %6039 = vmatpush1.msra.mxu1 %v6016_v33  ;;  %6128 = vmatpush1.msra.mxu0 %v6018_v56  ;;  %v5974_v33 = vld [vmem:[#allocation3 + $0x430] sm:$0xff]  ;;  %v5421_v56 = vadd.f32 %v5420_v48, %v5259_v27  ;;  %v6263_v27 = vld [vmem:[#allocation3 + $0x720] sm:$0xff]  ;;  %v6258_v48 = vld [vmem:[#allocation3 + $0x6f8] sm:$0xff] }
 0x60b   : > { %5866 = vmatmul.mubr.f32.gmra.mxu1 %v5468_v50  ;;  %5955 = vmatmul.mubr.f32.gmra.mxu0 %v5468_v50  ;;  %v8328_v50 = vpop.f32.mrf.mxu1 }
 0x60c   : > { %6040 = vmatprep.subr.mxu1 %v6013_v52  ;;  %6129 = vmatprep.subr.mxu0 %v6015_v22  ;;  %v5968_v52 = vld [vmem:[#allocation3 + $0x400] sm:$0xff]  ;;  %v5265_v22 = vadd.f32 %v8325_v10, %v10910_v42  ;;  %v6284_v42 = vld [vmem:[#allocation3 + $0x7c8] sm:$0xff]  ;;  %v5277_v10 = vadd.f32 %v8328_v50, %v10914_v40 }
 0x60d   : > { %6041 = vmatpush1.msra.mxu1 %v6012_v54  ;;  %6130 = vmatpush1.msra.mxu0 %v6014_v51  ;;  %v5970_v54 = vld [vmem:[#allocation3 + $0x410] sm:$0xff]  ;;  %v6268_v40 = vld [vmem:[#allocation3 + $0x748] sm:$0xff]  ;;  %v6251_v50 = vld [vmem:[#allocation3 + $0x6c0] sm:$0xff] }
 0x60e   : > { %6042 = vmatprep.subr.mxu1 %v6009_v4  ;;  %6131 = vmatprep.subr.mxu0 %v6011_v9  ;;  %v11813_v51 = vld [vmem:[#allocation44_spill] sm:$0xff]  ;;  %v6288_v4 = vld [vmem:[#allocation3 + $0x7e8] sm:$0xff]  ;;  %v6290_v9 = vld [vmem:[#allocation3 + $0x7f8] sm:$0xff] }
 0x60f   : > { %5871 = vmatprep.mubr.f32.mxu1 %v8624_v43  ;;  %5960 = vmatprep.mubr.f32.mxu0 %v8624_v43  ;;  %v5474_v46 = vmul.f32 %v5421_v56, %v11813_v51  ;;  %v6252_v56 = vld [vmem:[#allocation3 + $0x6c8] sm:$0xff]  ;;  %v6247_v51 = vld [vmem:[#allocation3 + $0x6a0] sm:$0xff] }
 0x610   : > { %6043 = vmatpush1.msra.mxu1 %v6008_v15  ;;  %6132 = vmatpush1.msra.mxu0 %v6010_v23  ;;  %v5270_v15 = vpop.f32.mrf.mxu1  ;;  %v6287_v23 = vld [vmem:[#allocation3 + $0x7e0] sm:$0xff] }
 0x611   : > { %5872 = vmatmul.mubr.f32.gmra.mxu1 %v5469_v38  ;;  %5961 = vmatmul.mubr.f32.gmra.mxu0 %v5469_v38  ;;  %v5427_v38 = vadd.f32 %v8351_v41, %v5265_v22  ;;  %v6248_v22 = vld [vmem:[#allocation3 + $0x6a8] sm:$0xff] }
 0x612   : > { %6044 = vmatprep.subr.mxu1 %v6005_v31  ;;  %6133 = vmatprep.subr.mxu0 %v6007_v61  ;;  %v6286_v31 = vld [vmem:[#allocation3 + $0x7d8] sm:$0xff]  ;;  %v8354_v61 = vpop.f32.mrf.mxu0 }
 0x613   : > { %6045 = vmatpush1.msra.mxu1 %v6004_v17  ;;  %6134 = vmatpush1.msra.mxu0 %v6006_v25  ;;  %v5271_v17 = vadd.f32 %v5270_v15, %v10918_v21  ;;  %v6283_v25 = vld [vmem:[#allocation3 + $0x7c0] sm:$0xff]  ;;  %v5439_v32 = vadd.f32 %v8354_v61, %v5277_v10  ;;  %v6228_v10 = vld [vmem:[#allocation3 + $0x608] sm:$0xff] }
 0x614   : > { %6046 = vmatprep.subr.mxu1 %v6001_v20  ;;  %6135 = vmatprep.subr.mxu0 %v6003_v19  ;;  %v6285_v20 = vld [vmem:[#allocation3 + $0x7d0] sm:$0xff]  ;;  %v11814_v19 = vld [vmem:[#allocation39_spill] sm:$0xff]  ;;  %v6239_v61 = vld [vmem:[#allocation3 + $0x660] sm:$0xff] }
 0x615   : > { %6047 = vmatpush1.msra.mxu1 %v6000_v29  ;;  %6136 = vmatpush1.msra.mxu0 %v6002_v8  ;;  %v5475_v29 = vmul.f32 %v5427_v38, %v11814_v19  ;;  %v6280_v8 = vld [vmem:[#allocation3 + $0x7a8] sm:$0xff]  ;;  %v6238_v19 = vld [vmem:[#allocation3 + $0x658] sm:$0xff] }
 0x616   : > { %6048 = vmatprep.subr.mxu1 %v5997_v62  ;;  %6137 = vmatprep.subr.mxu0 %v5999_v53  ;;  %v6282_v62 = vld [vmem:[#allocation3 + $0x7b8] sm:$0xff]  ;;  %v5432_v53 = vpop.f32.mrf.mxu0  ;;  %v6240_v38 = vld [vmem:[#allocation3 + $0x668] sm:$0xff] }
 0x617   : > { %6049 = vmatpush1.msra.mxu1 %v5996_v1  ;;  %6138 = vmatpush1.msra.mxu0 %v5998_v55  ;;  %v6279_v1 = vld [vmem:[#allocation3 + $0x7a0] sm:$0xff]  ;;  %v6281_v55 = vld [vmem:[#allocation3 + $0x7b0] sm:$0xff]  ;;  %v5433_v21 = vadd.f32 %v5432_v53, %v5271_v17  ;;  %v6232_v53 = vld [vmem:[#allocation3 + $0x628] sm:$0xff] }
 0x618   : > { %6050 = vmatprep.subr.mxu1 %v5993_v2  ;;  %6139 = vmatprep.subr.mxu0 %v5995_v35  ;;  %v6276_v2 = vld [vmem:[#allocation3 + $0x788] sm:$0xff]  ;;  %v6278_v35 = vld [vmem:[#allocation3 + $0x798] sm:$0xff]  ;;  %v6241_v17 = vld [vmem:[#allocation3 + $0x670] sm:$0xff] }
 0x619   : > { %6051 = vmatpush1.msra.mxu1 %v5992_v58  ;;  %6140 = vmatpush1.msra.mxu0 %v5994_v26  ;;  %v6275_v58 = vld [vmem:[#allocation3 + $0x780] sm:$0xff]  ;;  %v6277_v26 = vld [vmem:[#allocation3 + $0x790] sm:$0xff] }
 0x61a   : > { %6052 = vmatprep.subr.mxu1 %v5989_v18  ;;  %6141 = vmatprep.subr.mxu0 %v5991_v13  ;;  %v11815_v18 = vld [vmem:[#allocation52_spill] sm:$0xff] }
 0x61b   : > { %6053 = vmatpush1.msra.mxu1 %v5988_v14  ;;  %6142 = vmatpush1.msra.mxu0 %v5990_v39  ;;  %v5476_v13 = vmul.f32 %v5433_v21, %v11815_v18  ;;  %v6272_v14 = vld [vmem:[#allocation3 + $0x768] sm:$0xff]  ;;  %v6274_v39 = vld [vmem:[#allocation3 + $0x778] sm:$0xff]  ;;  %v6231_v21 = vld [vmem:[#allocation3 + $0x620] sm:$0xff] }
 0x61c   : > { %6054 = vmatprep.subr.mxu1 %v5985_v7  ;;  %6143 = vmatprep.subr.mxu0 %v5987_v45  ;;  %v6271_v7 = vld [vmem:[#allocation3 + $0x760] sm:$0xff]  ;;  %v6273_v45 = vld [vmem:[#allocation3 + $0x770] sm:$0xff] }
 0x61d   : > { %6055 = vmatpush1.msra.mxu1 %v5984_v34  ;;  %6144 = vmatpush1.msra.mxu0 %v5986_v24  ;;  %v6270_v34 = vld [vmem:[#allocation3 + $0x758] sm:$0xff]  ;;  %v6267_v24 = vld [vmem:[#allocation3 + $0x740] sm:$0xff] }
 0x61e   : > { %6056 = vmatprep.subr.mxu1 %v5981_v28  ;;  %6145 = vmatprep.subr.mxu0 %v5983_v5  ;;  %v6269_v28 = vld [vmem:[#allocation3 + $0x750] sm:$0xff]  ;;  %v6227_v18 = vld [vmem:[#allocation3 + $0x600] sm:$0xff] }
 0x61f   : > { %6057 = vmatpush1.msra.mxu1 %v5980_v30  ;;  %6146 = vmatpush1.msra.mxu0 %v5982_v57  ;;  %v11816_v5 = vld [vmem:[#allocation48_spill] sm:$0xff]  ;;  %v6264_v30 = vld [vmem:[#allocation3 + $0x728] sm:$0xff]  ;;  %v6266_v57 = vld [vmem:[#allocation3 + $0x738] sm:$0xff] }
 0x620   : > { %6058 = vmatprep.subr.mxu1 %v5977_v3  ;;  %6147 = vmatprep.subr.mxu0 %v5979_v6  ;;  %v5477_v41 = vmul.f32 %v5439_v32, %v11816_v5  ;;  %v6265_v3 = vld [vmem:[#allocation3 + $0x730] sm:$0xff]  ;;  %v6260_v6 = vld [vmem:[#allocation3 + $0x708] sm:$0xff] }
 0x621   : > { %6059 = vmatpush1.msra.mxu1 %v5976_v49  ;;  %6148 = vmatpush1.msra.mxu0 %v5978_v16  ;;  %v6262_v49 = vld [vmem:[#allocation3 + $0x718] sm:$0xff]  ;;  %v6259_v16 = vld [vmem:[#allocation3 + $0x700] sm:$0xff]  ;;  %v11819_v5 = vld [vmem:[#allocation60_spill] sm:$0xff] }
 0x622   : > { %6060 = vmatprep.subr.mxu1 %v5973_v60  ;;  %6149 = vmatprep.subr.mxu0 %v5975_v12  ;;  %v6261_v60 = vld [vmem:[#allocation3 + $0x710] sm:$0xff]  ;;  %v6256_v12 = vld [vmem:[#allocation3 + $0x6e8] sm:$0xff] }
 0x623   : > { %6061 = vmatpush1.msra.mxu1 %v5972_v0  ;;  %6150 = vmatpush1.msra.mxu0 %v5974_v33  ;;  %v6255_v0 = vld [vmem:[#allocation3 + $0x6e0] sm:$0xff]  ;;  %v6257_v33 = vld [vmem:[#allocation3 + $0x6f0] sm:$0xff] }
 0x624   : > { %6062 = vmatprep.subr.mxu1 %v5969_v59  ;;  %6151 = vmatprep.subr.mxu0 %v5971_v11  ;;  %v6254_v59 = vld [vmem:[#allocation3 + $0x6d8] sm:$0xff]  ;;  %v8331_v11 = vpop.f32.mrf.mxu1 }
 0x625   : > { %6063 = vmatpush1.msra.mxu1 %v5968_v52  ;;  %6096 = vmatprep.mubr.f32.mxu1 %v8624_v43  ;;  %v6253_v52 = vld [vmem:[#allocation3 + $0x6d0] sm:$0xff] }
 0x626   : > { %6152 = vmatpush1.msra.mxu0 %v5970_v54  ;;  %6185 = vmatprep.mubr.f32.mxu0 %v8624_v43  ;;  %v6250_v54 = vld [vmem:[#allocation3 + $0x6b8] sm:$0xff]  ;;  %v5282_v15 = vpop.f32.mrf.mxu1 }
 0x627   : > { %6097 = vmatmul.mubr.f32.vlgmr.msra.gmra.mxu1 %v5474_v46  ;;  %6186 = vmatmul.mubr.f32.vlgmr.msra.gmra.mxu0 %v5474_v46  ;;  %v6249_v46 = vld [vmem:[#allocation3 + $0x6b0] sm:$0xff] }
 0x628   : > { %6291 = vmatprep.subr.mxu1 %v6288_v4  ;;  %6380 = vmatprep.subr.mxu0 %v6290_v9  ;;  %v6244_v4 = vld [vmem:[#allocation3 + $0x688] sm:$0xff]  ;;  %v6246_v9 = vld [vmem:[#allocation3 + $0x698] sm:$0xff] }
 0x629   : > { %6292 = vmatpush1.msra.mxu1 %v6287_v23  ;;  %6381 = vmatpush1.msra.mxu0 %v6289_v47  ;;  %v6243_v23 = vld [vmem:[#allocation3 + $0x680] sm:$0xff]  ;;  %v6245_v47 = vld [vmem:[#allocation3 + $0x690] sm:$0xff] }
 0x62a   : > { %6293 = vmatprep.subr.mxu1 %v6284_v42  ;;  %6382 = vmatprep.subr.mxu0 %v6286_v31  ;;  %v6242_v42 = vld [vmem:[#allocation3 + $0x678] sm:$0xff]  ;;  %v8357_v31 = vpop.f32.mrf.mxu0 }
 0x62b   : > { %6102 = vmatprep.mubr.f32.mxu1 %v8624_v43  ;;  %6191 = vmatprep.mubr.f32.mxu0 %v8624_v43 }
 0x62c   : > { %6294 = vmatpush1.msra.mxu1 %v6283_v25  ;;  %6383 = vmatpush1.msra.mxu0 %v6285_v20  ;;  %v5283_v25 = vadd.f32 %v5282_v15, %v10924_v44  ;;  %v6236_v20 = vld [vmem:[#allocation3 + $0x648] sm:$0xff]  ;;  %v5289_v44 = vadd.f32 %v8331_v11, %v10920_v36 }
 0x62d   : > { %6103 = vmatmul.mubr.f32.gmra.mxu1 %v5475_v29  ;;  %6192 = vmatmul.mubr.f32.gmra.mxu0 %v5475_v29  ;;  %v8334_v29 = vpop.f32.mrf.mxu1 }
 0x62e   : > { %6295 = vmatprep.subr.mxu1 %v6280_v8  ;;  %6384 = vmatprep.subr.mxu0 %v6282_v62  ;;  %v6235_v8 = vld [vmem:[#allocation3 + $0x640] sm:$0xff]  ;;  %v6237_v62 = vld [vmem:[#allocation3 + $0x650] sm:$0xff] }
 0x62f   : > { %6296 = vmatpush1.msra.mxu1 %v6279_v1  ;;  %6385 = vmatpush1.msra.mxu0 %v6281_v55  ;;  %v6234_v1 = vld [vmem:[#allocation3 + $0x638] sm:$0xff]  ;;  %v5444_v55 = vpop.f32.mrf.mxu0 }
 0x630   : > { %6297 = vmatprep.subr.mxu1 %v6276_v2  ;;  %6386 = vmatprep.subr.mxu0 %v6278_v35  ;;  %v6233_v2 = vld [vmem:[#allocation3 + $0x630] sm:$0xff]  ;;  %v5445_v35 = vadd.f32 %v5444_v55, %v5283_v25 }
 0x631   : > { %6108 = vmatprep.mubr.f32.mxu1 %v8624_v43  ;;  %6197 = vmatprep.mubr.f32.mxu0 %v8624_v43 }
 0x632   : > { %6298 = vmatpush1.msra.mxu1 %v6275_v58  ;;  %6387 = vmatpush1.msra.mxu0 %v6277_v26  ;;  %v6230_v58 = vld [vmem:[#allocation3 + $0x618] sm:$0xff]  ;;  %v5294_v26 = vpop.f32.mrf.mxu1 }
 0x633   : > { %6109 = vmatmul.mubr.f32.gmra.mxu1 %v5476_v13  ;;  %6198 = vmatmul.mubr.f32.gmra.mxu0 %v5476_v13  ;;  %v6229_v13 = vld [vmem:[#allocation3 + $0x610] sm:$0xff]  ;;  %v5295_v36 = vadd.f32 %v5294_v26, %v10932_v37 }
 0x634   : > { %6299 = vmatprep.subr.mxu1 %v6272_v14  ;;  %6388 = vmatprep.subr.mxu0 %v6274_v39  ;;  %v8360_v14 = vpop.f32.mrf.mxu0  ;;  %v5451_v39 = vadd.f32 %v8357_v31, %v5289_v44 }
 0x635   : > { %6300 = vmatpush1.msra.mxu1 %v6271_v7  ;;  %6389 = vmatpush1.msra.mxu0 %v6273_v45  ;;  %v11817_v7 = vld [vmem:[#allocation55_spill] sm:$0xff] }
 0x636   : > { %6301 = vmatprep.subr.mxu1 %v6268_v40  ;;  %6390 = vmatprep.subr.mxu0 %v6270_v34  ;;  %v5478_v45 = vmul.f32 %v5445_v35, %v11817_v7  ;;  %v5456_v32 = vpop.f32.mrf.mxu0  ;;  %v11818_v40 = vld [vmem:[#allocation58_spill] sm:$0xff] }
 0x637   : > { %6114 = vmatprep.mubr.f32.mxu1 %v8624_v43  ;;  %6203 = vmatprep.mubr.f32.mxu0 %v8624_v43  ;;  %v5479_v34 = vmul.f32 %v5451_v39, %v11818_v40  ;;  %v6718_v7 = vld [vmem:[%s11213_s5 + $0x1] ss:$2 sm:$0xf] }
 0x638   : > { %6302 = vmatpush1.msra.mxu1 %v6267_v24  ;;  %6391 = vmatpush1.msra.mxu0 %v6269_v28  ;;  %v5301_v24 = vadd.f32 %v8334_v29, %v10926_v63  ;;  %v5457_v28 = vadd.f32 %v5456_v32, %v5295_v36 }
 0x639   : > { %6115 = vmatmul.mubr.f32.gmra.mxu1 %v5477_v41  ;;  %6204 = vmatmul.mubr.f32.gmra.mxu0 %v5477_v41 }
 0x63a   : > { %6303 = vmatprep.subr.mxu1 %v6264_v30  ;;  %6392 = vmatprep.subr.mxu0 %v6266_v57  ;;  %v5463_v37 = vadd.f32 %v8360_v14, %v5301_v24  ;;  %v5480_v41 = vmul.f32 %v5457_v28, %v11819_v5  ;;  %v11820_v30 = vld [vmem:[#allocation62_spill] sm:$0xff] }
 0x63b   : > { %6304 = vmatpush1.msra.mxu1 %v6263_v27  ;;  %6393 = vmatpush1.msra.mxu0 %v6265_v3 }
 0x63c   : > { %6305 = vmatprep.subr.mxu1 %v6260_v6  ;;  %6394 = vmatprep.subr.mxu0 %v6262_v49  ;;  %v5481_v57 = vmul.f32 %v5463_v37, %v11820_v30 }
 0x63d   : > { %6306 = vmatpush1.msra.mxu1 %v6259_v16  ;;  %6395 = vmatpush1.msra.mxu0 %v6261_v60 }
 0x63e   : > { %6307 = vmatprep.subr.mxu1 %v6256_v12  ;;  %6396 = vmatprep.subr.mxu0 %v6258_v48 }
 0x63f   : > { %6308 = vmatpush1.msra.mxu1 %v6255_v0  ;;  %6397 = vmatpush1.msra.mxu0 %v6257_v33 }
 0x640   : > { %6309 = vmatprep.subr.mxu1 %v6252_v56  ;;  %6398 = vmatprep.subr.mxu0 %v6254_v59 }
 0x641   : > { %6310 = vmatpush1.msra.mxu1 %v6251_v50  ;;  %6399 = vmatpush1.msra.mxu0 %v6253_v52 }
 0x642   : > { %6311 = vmatprep.subr.mxu1 %v6248_v22  ;;  %6400 = vmatprep.subr.mxu0 %v6250_v54 }
 0x643   : > { %6312 = vmatpush1.msra.mxu1 %v6247_v51  ;;  %6401 = vmatpush1.msra.mxu0 %v6249_v46 }
 0x644   : > { %6313 = vmatprep.subr.mxu1 %v6244_v4  ;;  %6402 = vmatprep.subr.mxu0 %v6246_v9 }
 0x645   : > { %6314 = vmatpush1.msra.mxu1 %v6243_v23  ;;  %6403 = vmatpush1.msra.mxu0 %v6245_v47 }
 0x646   : > { %6315 = vmatprep.subr.mxu1 %v6240_v38  ;;  %6404 = vmatprep.subr.mxu0 %v6242_v42 }
 0x647   : > { %6316 = vmatpush1.msra.mxu1 %v6239_v61  ;;  %6405 = vmatpush1.msra.mxu0 %v6241_v17 }
 0x648   : > { %6317 = vmatprep.subr.mxu1 %v6236_v20  ;;  %6406 = vmatprep.subr.mxu0 %v6238_v19 }
 0x649   : > { %6318 = vmatpush1.msra.mxu1 %v6235_v8  ;;  %6407 = vmatpush1.msra.mxu0 %v6237_v62 }
 0x64a   : > { %6319 = vmatprep.subr.mxu1 %v6232_v53  ;;  %6408 = vmatprep.subr.mxu0 %v6234_v1 }
 0x64b   : > { %6320 = vmatpush1.msra.mxu1 %v6231_v21  ;;  %6409 = vmatpush1.msra.mxu0 %v6233_v2  ;;  %v6489_v21 = vlaneseq }
 0x64c   : > { %6321 = vmatprep.subr.mxu1 %v6228_v10  ;;  %6410 = vmatprep.subr.mxu0 %v6230_v58 }
 0x64d   : > { %6322 = vmatpush1.msra.mxu1 %v6227_v18  ;;  %6355 = vmatprep.mubr.f32.mxu1 %v8624_v43  ;;  %v6490_v35 = vshrl.u32 %v6489_v21, 7 }
 0x64e   : > { %6411 = vmatpush1.msra.mxu0 %v6229_v13  ;;  %6444 = vmatprep.mubr.f32.mxu0 %v8624_v43  ;;  %v6485_v13 = vld [vmem:[%s11213_s5] ss:$2 sm:$0xf] }
 0x64f   : > { %6356 = vmatmul.mubr.f32.vlgmr.msra.gmra.mxu1 %v5478_v45  ;;  %6445 = vmatmul.mubr.f32.vlgmr.msra.gmra.mxu0 %v5478_v45  ;;  %v6491_v26 = vsub.s32 0, %v6490_v35  ;;  %v6499_v18 = vsub.s32 2, %v6490_v35  ;;  %v6495_v14 = vsub.s32 1, %v6490_v35  ;;  %v6503_v39 = vsub.s32 3, %v6490_v35 }
 0x650   : > { %6361 = vmatprep.mubr.f32.mxu1 %v8624_v43  ;;  %6450 = vmatprep.mubr.f32.mxu0 %v8624_v43 }
 0x651   : > { %v11055_v32 = vrot.slane %v6485_v13, %v6491_v26  ;;  %v11057_v40 = vrot.slane %v6485_v13, %v6499_v18  ;;  %v11061_v24 = vrot.slane %v6718_v7, %v6499_v18  ;;  %v11063_v28 = vrot.slane %v6485_v13, %v6495_v14 }
 0x652   : > { %v11065_v37 = vrot.slane %v6485_v13, %v6503_v39  ;;  %v11067_v30 = vrot.slane %v6718_v7, %v6495_v14 }
 0x653   : > { %6362 = vmatmul.mubr.f32.gmra.mxu1 %v5479_v34  ;;  %6451 = vmatmul.mubr.f32.gmra.mxu0 %v5479_v34  ;;  %v11059_v34 = vrot.slane %v6718_v7, %v6491_v26 }
 0x654   : > { %6367 = vmatprep.mubr.f32.mxu1 %v8624_v43  ;;  %6456 = vmatprep.mubr.f32.mxu0 %v8624_v43 }
 0x657   : > { %6368 = vmatmul.mubr.f32.gmra.mxu1 %v5480_v41  ;;  %6457 = vmatmul.mubr.f32.gmra.mxu0 %v5480_v41 }
 0x658   : > { %6373 = vmatprep.mubr.f32.mxu1 %v8624_v43  ;;  %6462 = vmatprep.mubr.f32.mxu0 %v8624_v43 }
 0x65b   : > { %6374 = vmatmul.mubr.f32.gmra.mxu1 %v5481_v57  ;;  %6463 = vmatmul.mubr.f32.gmra.mxu0 %v5481_v57  ;;  %v11069_v57 = vrot.slane %v6718_v7, %v6503_v39 }
 0x698   : > { %v5677_v63 = vpop.f32.mrf.mxu1  ;;  %v5766_v27 = vpop.f32.mrf.mxu0 }
 0x69a   : > { %v5679_v3 = vpop.f32.mrf.mxu1  ;;  %v5768_v6 = vpop.f32.mrf.mxu0 }
 0x69e   : > { %v5683_v49 = vpop.f32.mrf.mxu1  ;;  %v5772_v16 = vpop.f32.mrf.mxu0 }
 0x6a0   : > { %v11017_v60 = vpop.f32.mrf.mxu1  ;;  %v11019_v12 = vpop.f32.mrf.mxu0 }
 0x6a4   : > { %v11021_v48 = vpop.f32.mrf.mxu1  ;;  %v11023_v0 = vpop.f32.mrf.mxu0 }
 0x6a6   : > { %v11025_v33 = vpop.f32.mrf.mxu1  ;;  %v11027_v43 = vpop.f32.mrf.mxu0 }
 0x6aa   : > { %v11029_v56 = vpop.f32.mrf.mxu1  ;;  %v11031_v59 = vpop.f32.mrf.mxu0 }
 0x6ac   : > { %v11033_v11 = vpop.f32.mrf.mxu1  ;;  %v11035_v50 = vpop.f32.mrf.mxu0 }
 0x6bf   : > { %v5855_v52 = vpop.f32.mrf.mxu1  ;;  %v5944_v22 = vpop.f32.mrf.mxu0 }
 0x6c0   : > { %v5856_v5 = vadd.f32 %v5855_v52, %v5677_v63  ;;  %v5945_v41 = vadd.f32 %v5944_v22, %v5766_v27 }
 0x6c1   : > { %v5857_v54 = vpop.f32.mrf.mxu1  ;;  %v5946_v51 = vpop.f32.mrf.mxu0 }
 0x6c2   : > { %v5858_v21 = vadd.f32 %v5857_v54, %v5679_v3  ;;  %v5947_v35 = vadd.f32 %v5946_v51, %v5768_v6 }
 0x6c5   : > { %v5861_v46 = vpop.f32.mrf.mxu1  ;;  %v5950_v4 = vpop.f32.mrf.mxu0 }
 0x6c7   : > { %v5863_v9 = vpop.f32.mrf.mxu1  ;;  %v5952_v15 = vpop.f32.mrf.mxu0 }
 0x6c8   : > { %v5864_v18 = vadd.f32 %v5863_v9, %v11017_v60  ;;  %v5953_v13 = vadd.f32 %v5952_v15, %v11019_v12 }
 0x6cb   : > { %v5867_v23 = vpop.f32.mrf.mxu1  ;;  %v5956_v47 = vpop.f32.mrf.mxu0 }
 0x6cc   : > { %v5868_v27 = vadd.f32 %v5867_v23, %v11021_v48  ;;  %v5957_v52 = vadd.f32 %v5956_v47, %v11023_v0 }
 0x6cd   : > { %v5869_v38 = vpop.f32.mrf.mxu1  ;;  %v5958_v42 = vpop.f32.mrf.mxu0 }
 0x6ce   : > { %v5870_v3 = vadd.f32 %v5869_v38, %v11025_v33  ;;  %v5959_v6 = vadd.f32 %v5958_v42, %v11027_v43 }
 0x6d1   : > { %v5873_v31 = vpop.f32.mrf.mxu1  ;;  %v5962_v61 = vpop.f32.mrf.mxu0 }
 0x6d2   : > { %v5874_v60 = vadd.f32 %v5873_v31, %v11029_v56  ;;  %v5963_v12 = vadd.f32 %v5962_v61, %v11031_v59 }
 0x6d3   : > { %v5875_v17 = vpop.f32.mrf.mxu1  ;;  %v5964_v25 = vpop.f32.mrf.mxu0 }
 0x6d4   : > { %v5965_v48 = vadd.f32 %v5964_v25, %v11035_v50 }
 0x6e7   : > { %v6098_v20 = vpop.f32.mrf.mxu1  ;;  %v6187_v19 = vpop.f32.mrf.mxu0 }
 0x6e8   : > { %v6212_v63 = vadd.f32 %v6187_v19, %v5945_v41 }
 0x6e9   : > { %v6100_v29 = vpop.f32.mrf.mxu1  ;;  %v6189_v8 = vpop.f32.mrf.mxu0 }
 0x6ea   : > { %v6211_v22 = vadd.f32 %v6100_v29, %v5858_v21  ;;  %v6213_v54 = vadd.f32 %v6189_v8, %v5947_v35 }
 0x6ed   : > { %v6104_v62 = vpop.f32.mrf.mxu1  ;;  %v6193_v53 = vpop.f32.mrf.mxu0 }
 0x6ef   : > { %v6106_v1 = vpop.f32.mrf.mxu1  ;;  %v6195_v55 = vpop.f32.mrf.mxu0 }
 0x6f0   : > { %v6215_v42 = vadd.f32 %v6106_v1, %v5864_v18 }
 0x6f3   : > { %v11037_v2 = vpop.f32.mrf.mxu1  ;;  %v11039_v44 = vpop.f32.mrf.mxu0 }
 0x6f4   : > { %v6218_v61 = vadd.f32 %v11037_v2, %v5868_v27 }
 0x6f5   : > { %v11041_v10 = vpop.f32.mrf.mxu1  ;;  %v11043_v58 = vpop.f32.mrf.mxu0 }
 0x6f6   : > { %11821 = vst [vmem:[#allocation89_spill] sm:$0xff] %v11041_v10  ;;  %11822 = vst [vmem:[#allocation88_spill] sm:$0xff] %v11043_v58  ;;  %v6210_v10 = vadd.f32 %v6098_v20, %v5856_v5  ;;  %v6217_v20 = vadd.f32 %v6195_v55, %v5953_v13 }
 0x6f9   : > { %v11051_v45 = vpop.f32.mrf.mxu1  ;;  %v11053_v36 = vpop.f32.mrf.mxu0 }
 0x6fa   : > { %11823 = vst [vmem:[#allocation14_spill] sm:$0xff] %v11051_v45  ;;  %11824 = vst [vmem:[#allocation90_spill] sm:$0xff] %v11053_v36  ;;  %v5862_v36 = vadd.f32 %v5861_v46, %v5683_v49  ;;  %v5951_v45 = vadd.f32 %v5950_v4, %v5772_v16  ;;  %v5876_v4 = vadd.f32 %v5875_v17, %v11033_v11 }
 0x6fb   : > { %v11071_v58 = vpop.f32.mrf.mxu1  ;;  %v11073_v26 = vpop.f32.mrf.mxu0  ;;  %v6220_v17 = vadd.f32 %v11039_v44, %v5957_v52 }
 0x6fc   : > { %v6214_v47 = vadd.f32 %v6104_v62, %v5862_v36  ;;  %v6216_v38 = vadd.f32 %v6193_v53, %v5951_v45 }
 0x6fd   : > { %v11825_v44 = vld [vmem:[#allocation89_spill] sm:$0xff]  ;;  %v11826_v14 = vld [vmem:[#allocation88_spill] sm:$0xff] }
 0x6fe   : > { %v6221_v39 = vadd.f32 %v11826_v14, %v5959_v6 }
 0x701   : > { %v11827_v13 = vld [vmem:[#allocation14_spill] sm:$0xff] }
 0x702   : > { %v11828_v27 = vld [vmem:[#allocation90_spill] sm:$0xff] }
 0x703   : > { %v6224_v52 = vadd.f32 %v11828_v27, %v5963_v12  ;;  %v6225_v12 = vadd.f32 %v11073_v26, %v5965_v48 }
 0x70f   : > { %v6357_v49 = vpop.f32.mrf.mxu1  ;;  %v6446_v16 = vpop.f32.mrf.mxu0 }
 0x710   : > { %v6469_v51 = vadd.f32 %v6357_v49, %v6210_v10  ;;  %v6471_v46 = vadd.f32 %v6446_v16, %v6212_v63  ;;  %v6219_v10 = vadd.f32 %v11825_v44, %v5870_v3  ;;  %v6222_v63 = vadd.f32 %v11827_v13, %v5874_v60 }
 0x711   : > { %v6359_v0 = vpop.f32.mrf.mxu1  ;;  %v6448_v9 = vpop.f32.mrf.mxu0  ;;  %v6223_v60 = vadd.f32 %v11071_v58, %v5876_v4 }
 0x712   : > { %v6509_v33 = vmul.f32 %v11055_v32, %v6469_v51  ;;  %v6511_v43 = vmul.f32 %v11057_v40, %v6471_v46  ;;  %v6470_v15 = vadd.f32 %v6359_v0, %v6211_v22  ;;  %v6472_v23 = vadd.f32 %v6448_v9, %v6213_v54 }
 0x713   : > { %v6363_v19 = vpop.f32.mrf.mxu1  ;;  %v6452_v56 = vpop.f32.mrf.mxu0 }
 0x714   : > { %v6546_v59 = vadd.f32 %v11059_v34, %v6509_v33  ;;  %v6548_v11 = vadd.f32 %v11061_v24, %v6511_v43  ;;  %v6510_v50 = vmul.f32 %v11063_v28, %v6470_v15  ;;  %v6512_v31 = vmul.f32 %v11065_v37, %v6472_v23 }
 0x715   : > { %v6473_v25 = vadd.f32 %v6363_v19, %v6214_v47  ;;  %v6475_v29 = vadd.f32 %v6452_v56, %v6216_v38  ;;  %v6365_v8 = vpop.f32.mrf.mxu1  ;;  %v6454_v62 = vpop.f32.mrf.mxu0 }
 0x716   : > { %6562 = vst [vmem:[%s11094_s30] sm:$0xff] %v6546_v59  ;;  %6564 = vst [vmem:[%s11094_s30 + $0x10] sm:$0xff] %v6548_v11  ;;  %v6547_v53 = vadd.f32 %v11067_v30, %v6510_v50  ;;  %v6549_v1 = vadd.f32 %v11069_v57, %v6512_v31  ;;  %v6474_v55 = vadd.f32 %v6365_v8, %v6215_v42 }
 0x717   : > { %v6476_v2 = vadd.f32 %v6454_v62, %v6217_v20  ;;  %v6513_v7 = vmul.f32 %v11055_v32, %v6473_v25  ;;  %v6515_v45 = vmul.f32 %v11057_v40, %v6475_v29  ;;  %v6369_v36 = vpop.f32.mrf.mxu1  ;;  %v6458_v5 = vpop.f32.mrf.mxu0 }
 0x718   : > { %6563 = vst [vmem:[%s11094_s30 + $0x8] sm:$0xff] %v6547_v53  ;;  %6565 = vst [vmem:[%s11094_s30 + $0x18] sm:$0xff] %v6549_v1  ;;  %v6514_v41 = vmul.f32 %v11063_v28, %v6474_v55  ;;  %v6477_v35 = vadd.f32 %v6369_v36, %v6218_v61  ;;  %v6479_v18 = vadd.f32 %v6458_v5, %v6220_v17 }
 0x719   : > { %v6516_v21 = vmul.f32 %v11065_v37, %v6476_v2  ;;  %v6550_v3 = vadd.f32 %v11059_v34, %v6513_v7  ;;  %v6552_v6 = vadd.f32 %v11061_v24, %v6515_v45  ;;  %v6371_v49 = vpop.f32.mrf.mxu1  ;;  %v6460_v16 = vpop.f32.mrf.mxu0 }
 0x71a   : > { %v6551_v22 = vadd.f32 %v11067_v30, %v6514_v41  ;;  %v6517_v51 = vmul.f32 %v11055_v32, %v6477_v35  ;;  %v6519_v46 = vmul.f32 %v11057_v40, %v6479_v18  ;;  %v6478_v0 = vadd.f32 %v6371_v49, %v6219_v10 }
 0x71b   : > { %v6553_v54 = vadd.f32 %v11069_v57, %v6516_v21  ;;  %6566 = vst [vmem:[%s11094_s30 + $0x20] sm:$0xff] %v6550_v3  ;;  %6568 = vst [vmem:[%s11094_s30 + $0x30] sm:$0xff] %v6552_v6  ;;  %v6480_v9 = vadd.f32 %v6460_v16, %v6221_v39  ;;  %v6375_v33 = vpop.f32.mrf.mxu1  ;;  %v6464_v43 = vpop.f32.mrf.mxu0 }
 0x71c   : > { %6567 = vst [vmem:[%s11094_s30 + $0x28] sm:$0xff] %v6551_v22  ;;  %v6554_v15 = vadd.f32 %v11059_v34, %v6517_v51  ;;  %v6556_v23 = vadd.f32 %v11061_v24, %v6519_v46  ;;  %v6481_v47 = vadd.f32 %v6375_v33, %v6222_v63  ;;  %v6483_v58 = vadd.f32 %v6464_v43, %v6224_v52 }
 0x71d   : > { %6569 = vst [vmem:[%s11094_s30 + $0x38] sm:$0xff] %v6553_v54  ;;  %v6518_v26 = vmul.f32 %v11063_v28, %v6478_v0  ;;  %v6520_v4 = vmul.f32 %v11065_v37, %v6480_v9  ;;  %v6377_v48 = vpop.f32.mrf.mxu1  ;;  %v6466_v38 = vpop.f32.mrf.mxu0 }
 0x71e   : > { %6570 = vst [vmem:[%s11094_s30 + $0x40] sm:$0xff] %v6554_v15  ;;  %6572 = vst [vmem:[%s11094_s30 + $0x50] sm:$0xff] %v6556_v23  ;;  %v6521_v42 = vmul.f32 %v11055_v32, %v6481_v47  ;;  %v6523_v20 = vmul.f32 %v11057_v40, %v6483_v58  ;;  %v6482_v19 = vadd.f32 %v6377_v48, %v6223_v60 }
 0x71f   : > { %v6484_v56 = vadd.f32 %v6466_v38, %v6225_v12  ;;  %v6555_v59 = vadd.f32 %v11067_v30, %v6518_v26  ;;  %v6557_v11 = vadd.f32 %v11069_v57, %v6520_v4 }
 0x720   : > { %v6558_v50 = vadd.f32 %v11059_v34, %v6521_v42  ;;  %v6560_v31 = vadd.f32 %v11061_v24, %v6523_v20  ;;  %v6522_v32 = vmul.f32 %v11063_v28, %v6482_v19 }
 0x721   : > { %v6524_v61 = vmul.f32 %v11065_v37, %v6484_v56  ;;  %6571 = vst [vmem:[%s11094_s30 + $0x48] sm:$0xff] %v6555_v59  ;;  %6573 = vst [vmem:[%s11094_s30 + $0x58] sm:$0xff] %v6557_v11 }
 0x722   : > { %6574 = vst [vmem:[%s11094_s30 + $0x60] sm:$0xff] %v6558_v50  ;;  %6576 = vst [vmem:[%s11094_s30 + $0x70] sm:$0xff] %v6560_v31  ;;  %v6559_v40 = vadd.f32 %v11067_v30, %v6522_v32 }
 0x723   : > { %v6561_v34 = vadd.f32 %v11069_v57, %v6524_v61 }
 0x724   : > { %6575 = vst [vmem:[%s11094_s30 + $0x68] sm:$0xff] %v6559_v40 }
 0x725   : > { %6577 = vst [vmem:[%s11094_s30 + $0x78] sm:$0xff] %v6561_v34 }
 0x726   : > { %8536 = shalt.err (!%p8533_p4)
}
 0x727   : > { %s8537_s14 = scalar_lea.hbm %s11145_s17, 2048  ;;  %s8541_s30 = scalar_lea.hbm %s11214_s6, 8192 }
 0x728   : > { %p8538_p5 = scmp.ne.s32.totalorder %s11145_s17, %s8537_s14  ;;  %p8542_p10 = scmp.lt.s32.totalorder %s11145_s17, %s11214_s6 }
 0x729   : > { %p8543_p11 = scmp.lt.s32.totalorder %s8541_s30, %s8537_s14 }
 0x72a   : > { %p8539_p6 = pnand %p8538_p5, %p11829_p8 }
 0x72b   : > { %p8544_p12 = por %p8543_p11, %p8542_p10 }
 0x72c   : > { %p8540_p7 = pneg %p8539_p6 }
 0x72e   : > { %p8545_p3 = pnand %p8544_p12, %p8540_p7 }
 0x730   : > { %8548 = shalt.err (!%p8545_p3)
}
 0x731   : > { %s8626_s24 = smov 512   ;;  %s8627_s25 = smov 1024  }
 0x732   : > { %s8628_s13 = smov 32  }
 0x733   : > { %8397 = dma.vmem_to_hbm [thread:$0]  (%p11829_p8), %s11149_s21, 2048, %s11145_s17, %s6579_s11, %s8626_s24, %s8627_s25, %s8628_s13  }
 0x734 PF: > { %s11830_s16 = sld [smem:[#allocation9_spill]]  ;;  %p8409_p9 = scmp.ge.s32.totalorder %s8619_s28, 2 }
 0x735   : > { %s11831_s18 = sld [smem:[#allocation12_spill]] }
 0x73a   : > { %s6609_s29 = sand.u32 1, %s11830_s16  }
 0x73b   : > { %p11832_p13 = scmp.ne.s32.totalorder %s11831_s18, 0  ;;  %s6610_s9 = scalar_lea.sflag [#allocation5], %s6609_s29 }
 0x73d   : > { %p8404_p0 = pnand %p8409_p9, %p11832_p13 }
 0x73f   : > { %p8405_p1 = pneg %p8404_p0 }
 0x741   : > { %8586 = dma.done.wait (%p8405_p1), %s6610_s9, 2048  }
 0x742   : > { %8588 = vsyncadd (%p8405_p1), %s6610_s9, 4294965248  ;;  %s20_s28 = sadd.s32 1, %s8619_s28   ;;  %s11833_s12 = sld [smem:[#allocation13_spill]] }
 0x743   : > { %p17_p2 = scmp.ge.s32.totalorder %s20_s28, 6   ;;  %s11834_s7 = sld [smem:[#allocation10_spill]] }
 0x744   : > { %s11835_s17 = sld [smem:[#allocation11_spill]]  ;;  %s11836_s21 = smov %s8595_s22 }
 0x745   : > { %s11837_s22 = smov %s8599_s23  ;;  %s11839_s24 = smov %s8611_s26 }
 0x746   : > { %s11840_s25 = smov %s8615_s27  ;;  %19 = sbr.rel (!%p17_p2) target bundleno = 6 (0x6), region = 131 }
 0x748   : > { %s11838_s23 = smov %s11833_s12 }
 0x749   : > { %s11841_s26 = smov %s11834_s7 }
 0x74a   : > { %s11842_s27 = smov %s11835_s17 }
 0x74b   :  { %6615 = vsyncpa [#allocation4], 1 }
 0x74c   :  { %6617 = vsyncpa [#allocation4 + $0x1], 1 }
 0x74d   :  { %6618 = vsyncpa [#allocation5], 1 }
 0x74e   :  { %6620 = vsyncpa [#allocation5 + $0x1], 1 }

</bundles_post_ra>
